<compile_context>
chip_gen: v5e
topology: v5e:2x2
jax: 0.10.0
libtpu: 0.0.40
codegen_flags: <defaults>
</compile_context>

<pallas_src>
import functools

import jax
import jax.numpy as jnp
from jax.experimental import pallas as pl
from jax.experimental.pallas import tpu as pltpu


# ----------------------------- Pallas kernels -------------------------------

def _conv3x3_relu_pool_kernel(x_ref, w_ref, b_ref, o_ref, *, phase_w):
    """Fused 3x3 'same' conv + bias + ReLU + 2x2/stride-2 max-pool, one image.

    x_ref : (1, 4, Lpad, Cin) bf16. Phase p = 2a+b holds the padded-input
            sub-grid xpad[a::2, b::2, :], flattened row-major to
            ((Ho+1)*(Wo+1) + slack, Cin) rows.
    w_ref : (9, Cin, Cout)    bf16, tap t = kh*3 + kw.
    b_ref : (1, Cout)         f32.
    o_ref : (1, M, Cout)      bf16, M = Ho*(Wo+1). Row k = oh*(Wo+1)+ow; the
            ow == Wo column is junk and is sliced off by the caller.
    """
    m = o_ref.shape[1]
    cout = o_ref.shape[2]
    xph = [x_ref[0, p] for p in range(4)]          # 4 x (Lpad, Cin), loaded once

    pooled = None
    for r in (0, 1):            # position of the conv pixel inside the 2x2 window
        for s in (0, 1):
            acc = jnp.zeros((m, cout), jnp.float32)
            for dh in range(3):
                for dw in range(3):
                    pa, di = (r + dh) % 2, (r + dh) // 2
                    pb, dj = (s + dw) % 2, (s + dw) // 2
                    off = di * phase_w + dj
                    xs = xph[2 * pa + pb][off:off + m, :]      # unit-stride slice
                    acc = acc + jnp.dot(xs, w_ref[dh * 3 + dw],
                                        preferred_element_type=jnp.float32)
            pooled = acc if pooled is None else jnp.maximum(pooled, acc)

    # Bias + ReLU commute with the 2x2 max (same bias for all 4 positions).
    y = jnp.maximum(pooled + b_ref[...], 0.0)
    o_ref[0] = y.astype(o_ref.dtype)


def _fc_tail_kernel(x_ref, w3_ref, b3_ref, w4_ref, b4_ref, o_ref, *, l2):
    """fc1 + ReLU + fc2 (+ optional row-wise L2 normalize), fully fused."""
    h = jnp.dot(x_ref[...], w3_ref[...], preferred_element_type=jnp.float32)
    h = jnp.maximum(h + b3_ref[...], 0.0)
    z = jnp.dot(h.astype(w4_ref.dtype), w4_ref[...],
                preferred_element_type=jnp.float32)
    z = z + b4_ref[...]
    if l2:
        ss = jnp.sum(z * z, axis=-1, keepdims=True)
        z = z * jax.lax.rsqrt(jnp.maximum(ss, 1e-24))   # == z / max(||z||, 1e-12)
    o_ref[...] = z.astype(o_ref.dtype)


_VMEM = pl.BlockSpec(memory_space=pltpu.MemorySpace.VMEM)


# ------------------------------- wrappers ------------------------------------

def conv3x3_relu_pool(x, w, bias):
    """x: (B, H, W, Cin) NHWC, H/W even -> (B, H//2, W//2, Cout)."""
    B, H, W, Cin = x.shape
    assert H % 2 == 0 and W % 2 == 0
    Cout = w.shape[-1]
    Ho, Wo = H // 2, W // 2
    pw = Wo + 1                    # phase-grid row width
    M = Ho * pw                    # pooled rows incl. one junk column per row
    Lp = (Ho + 1) * pw
    Lpad = Lp + 8                  # slack: tap slices reach row Lp

    # Pad + space-to-depth(2) phase split; XLA fuses this into one small copy
    # (~1x the input volume, not the old 9x im2col materialization).
    xp = jnp.pad(x, ((0, 0), (1, 1), (1, 1), (0, 0)))
    ph = jnp.stack([xp[:, a::2, c::2, :] for a in (0, 1) for c in (0, 1)], axis=1)
    ph = ph.reshape(B, 4, Lp, Cin)
    ph = jnp.pad(ph, ((0, 0), (0, 0), (0, Lpad - Lp), (0, 0)))

    out = pl.pallas_call(
        functools.partial(_conv3x3_relu_pool_kernel, phase_w=pw),
        out_shape=jax.ShapeDtypeStruct((B, M, Cout), x.dtype),
        grid=(B,),
        in_specs=[
            pl.BlockSpec((1, 4, Lpad, Cin), lambda i: (i, 0, 0, 0)),
            pl.BlockSpec((9, Cin, Cout), lambda i: (0, 0, 0)),
            pl.BlockSpec((1, Cout), lambda i: (0, 0)),
        ],
        out_specs=pl.BlockSpec((1, M, Cout), lambda i: (i, 0, 0)),
        compiler_params=pltpu.CompilerParams(
            dimension_semantics=("parallel",),     # shard batch across TCs (v7x)
            vmem_limit_bytes=32 * 1024 * 1024,     # per-step usage is only ~KBs
        ),
    )(ph, w, bias)

    # Drop the junk (ow == Wo) column and restore NHWC.
    return out.reshape(B, Ho, pw, Cout)[:, :, :Wo, :]


def fc_tail(x, w3, b3, w4, b4, l2=True):
    M, emb = x.shape[0], w4.shape[1]
    return pl.pallas_call(
        functools.partial(_fc_tail_kernel, l2=l2),
        out_shape=jax.ShapeDtypeStruct((M, emb), jnp.float32),
        in_specs=[_VMEM] * 5,
        out_specs=_VMEM,
    )(x, w3, b3, w4, b4)


def init_params(in_ch, H, W, c1=8, c2=16, h1=64, emb=32):
    """Deterministic synthetic weights in the kernel-native layouts.
    Conv weights: (KH*KW, Cin, Cout), tap = kh*3 + kw
      (from PyTorch (Cout,Cin,KH,KW): w.transpose(2,3,1,0).reshape(9,Cin,Cout)).
    FC weights: (in, out) = torch_weight.T; w3 rows are in NHWC-flatten order
      (permute rows from PyTorch's CHW-flatten order when importing real weights).
    """
    ks = jax.random.split(jax.random.PRNGKey(42), 4)
    f32, bf16 = jnp.float32, jnp.bfloat16
    flat = (H // 4) * (W // 4) * c2
    return {
        "w1": (jax.random.normal(ks[0], (9, in_ch, c1)) * 0.10).astype(bf16),
        "b1": jnp.zeros((1, c1), f32),
        "w2": (jax.random.normal(ks[1], (9, c1, c2)) * 0.05).astype(bf16),
        "b2": jnp.zeros((1, c2), f32),
        "w3": (jax.random.normal(ks[2], (flat, h1)) * 0.05).astype(bf16),
        "b3": jnp.zeros((1, h1), f32),
        "w4": (jax.random.normal(ks[3], (h1, emb)) * 0.05).astype(bf16),
        "b4": jnp.zeros((1, emb), f32),
    }


def embedding_net(params, x_nchw, l2=True):
    """EmbeddingNet forward. Input is NCHW (PyTorch convention)."""
    x = jnp.transpose(x_nchw, (0, 2, 3, 1)).astype(jnp.bfloat16)   # -> NHWC bf16
    y = conv3x3_relu_pool(x, params["w1"], params["b1"])
    y = conv3x3_relu_pool(y, params["w2"], params["b2"])
    y = y.reshape(y.shape[0], -1)        # NHWC flatten; matches w3 row layout
    return fc_tail(y, params["w3"], params["b3"], params["w4"], params["b4"], l2)


def siamese_net(params, x1, x2, l2=True):
    """SiameseNet.forward: shared-weight embedding of both inputs, executed as
    ONE batched pass (halves kernel launches and weight DMAs)."""
    n = x1.shape[0]
    emb = embedding_net(params, jnp.concatenate([x1, x2], axis=0), l2)
    return emb[:n], emb[n:]


# --------------------------------- main --------------------------------------

if __name__ == "__main__":
    N, C, H, W = 2, 4, 16, 16
    k1, k2 = jax.random.split(jax.random.PRNGKey(0))
    x1 = jax.random.normal(k1, (N, C, H, W), jnp.float32)
    x2 = jax.random.normal(k2, (N, C, H, W), jnp.float32)

    params = init_params(C, H, W)
    fwd = jax.jit(functools.partial(siamese_net, l2=True))
    out1, out2 = fwd(params, x1, x2)
    jax.block_until_ready((out1, out2))

    assert out1.shape == (N, 32) and out2.shape == (N, 32)
    assert bool(jnp.all(jnp.isfinite(out1))) and bool(jnp.all(jnp.isfinite(out2)))
    # L2-normalized embeddings -> unit norm (normalization done in f32 in-kernel).
    assert bool(jnp.allclose(jnp.linalg.norm(out1, axis=1), 1.0, atol=1e-2))
    print("KERNEL_OK")
</pallas_src>

<mosaic_0001>
module attributes {stable_mosaic.version = 11 : i64} {
  func.func @_conv3x3_relu_pool_kernel(%arg0: i32, %arg1: memref<1x4x89x4xbf16, #tpu.memory_space<vmem>>, %arg2: memref<9x4x8xbf16, #tpu.memory_space<vmem>>, %arg3: memref<1x8xf32, #tpu.memory_space<vmem>>, %arg4: memref<1x72x8xbf16, #tpu.memory_space<vmem>>) attributes {dimension_semantics = [#tpu.dimension_semantics<parallel>], iteration_bounds = array<i64: 4>, scalar_prefetch = 0 : i64, scratch_operands = 0 : i64, tpu.core_type = #tpu.core_type<tc>, window_params = [{transform_indices = @transform_0, window_bounds = array<i64: 1, 4, 89, 4>}, {pipeline_mode = #tpu.pipeline_mode<synchronous>, transform_indices = @transform_1, window_bounds = array<i64: 9, 4, 8>}, {pipeline_mode = #tpu.pipeline_mode<synchronous>, transform_indices = @transform_2, window_bounds = array<i64: 1, 8>}, {transform_indices = @transform_3, window_bounds = array<i64: 1, 72, 8>}]} {
    %c0 = arith.constant 0 : index
    %c0_0 = arith.constant 0 : index
    %c0_1 = arith.constant 0 : index
    %c0_2 = arith.constant 0 : index
    %0 = vector.load %arg1[%c0, %c0_0, %c0_1, %c0_2] : memref<1x4x89x4xbf16, #tpu.memory_space<vmem>>, vector<1x1x89x4xbf16>
    %1 = vector.shape_cast %0 : vector<1x1x89x4xbf16> to vector<89x4xbf16>
    %c0_3 = arith.constant 0 : index
    %c1 = arith.constant 1 : index
    %c0_4 = arith.constant 0 : index
    %c0_5 = arith.constant 0 : index
    %2 = vector.load %arg1[%c0_3, %c1, %c0_4, %c0_5] : memref<1x4x89x4xbf16, #tpu.memory_space<vmem>>, vector<1x1x89x4xbf16>
    %3 = vector.shape_cast %2 : vector<1x1x89x4xbf16> to vector<89x4xbf16>
    %c0_6 = arith.constant 0 : index
    %c2 = arith.constant 2 : index
    %c0_7 = arith.constant 0 : index
    %c0_8 = arith.constant 0 : index
    %4 = vector.load %arg1[%c0_6, %c2, %c0_7, %c0_8] : memref<1x4x89x4xbf16, #tpu.memory_space<vmem>>, vector<1x1x89x4xbf16>
    %5 = vector.shape_cast %4 : vector<1x1x89x4xbf16> to vector<89x4xbf16>
    %c0_9 = arith.constant 0 : index
    %c3 = arith.constant 3 : index
    %c0_10 = arith.constant 0 : index
    %c0_11 = arith.constant 0 : index
    %6 = vector.load %arg1[%c0_9, %c3, %c0_10, %c0_11] : memref<1x4x89x4xbf16, #tpu.memory_space<vmem>>, vector<1x1x89x4xbf16>
    %7 = vector.shape_cast %6 : vector<1x1x89x4xbf16> to vector<89x4xbf16>
    %cst = arith.constant 0.000000e+00 : f32
    %8 = vector.broadcast %cst : f32 to vector<72x8xf32>
    %9 = vector.extract_strided_slice %1 {offsets = [0, 0], sizes = [72, 4], strides = [1, 1]} : vector<89x4xbf16> to vector<72x4xbf16>
    %c0_12 = arith.constant 0 : index
    %c0_13 = arith.constant 0 : index
    %c0_14 = arith.constant 0 : index
    %10 = vector.load %arg2[%c0_12, %c0_13, %c0_14] : memref<9x4x8xbf16, #tpu.memory_space<vmem>>, vector<1x4x8xbf16>
    %11 = vector.shape_cast %10 : vector<1x4x8xbf16> to vector<4x8xbf16>
    %cst_15 = arith.constant dense<0.000000e+00> : vector<72x8xf32>
    %12 = tpu.matmul %9, %11, %cst_15 {dimension_numbers = #tpu.dot_dimension_numbers<[1], [0], [0], [1], [0, 0, 1, 1], [], []>} : vector<72x4xbf16>, vector<4x8xbf16>, vector<72x8xf32> -> vector<72x8xf32>
    %13 = arith.addf %8, %12 : vector<72x8xf32>
    %14 = vector.extract_strided_slice %3 {offsets = [0, 0], sizes = [72, 4], strides = [1, 1]} : vector<89x4xbf16> to vector<72x4xbf16>
    %c1_16 = arith.constant 1 : index
    %c0_17 = arith.constant 0 : index
    %c0_18 = arith.constant 0 : index
    %15 = vector.load %arg2[%c1_16, %c0_17, %c0_18] : memref<9x4x8xbf16, #tpu.memory_space<vmem>>, vector<1x4x8xbf16>
    %16 = vector.shape_cast %15 : vector<1x4x8xbf16> to vector<4x8xbf16>
    %cst_19 = arith.constant dense<0.000000e+00> : vector<72x8xf32>
    %17 = tpu.matmul %14, %16, %cst_19 {dimension_numbers = #tpu.dot_dimension_numbers<[1], [0], [0], [1], [0, 0, 1, 1], [], []>} : vector<72x4xbf16>, vector<4x8xbf16>, vector<72x8xf32> -> vector<72x8xf32>
    %18 = arith.addf %13, %17 : vector<72x8xf32>
    %19 = vector.extract_strided_slice %1 {offsets = [1, 0], sizes = [72, 4], strides = [1, 1]} : vector<89x4xbf16> to vector<72x4xbf16>
    %c2_20 = arith.constant 2 : index
    %c0_21 = arith.constant 0 : index
    %c0_22 = arith.constant 0 : index
    %20 = vector.load %arg2[%c2_20, %c0_21, %c0_22] : memref<9x4x8xbf16, #tpu.memory_space<vmem>>, vector<1x4x8xbf16>
    %21 = vector.shape_cast %20 : vector<1x4x8xbf16> to vector<4x8xbf16>
    %cst_23 = arith.constant dense<0.000000e+00> : vector<72x8xf32>
    %22 = tpu.matmul %19, %21, %cst_23 {dimension_numbers = #tpu.dot_dimension_numbers<[1], [0], [0], [1], [0, 0, 1, 1], [], []>} : vector<72x4xbf16>, vector<4x8xbf16>, vector<72x8xf32> -> vector<72x8xf32>
    %23 = arith.addf %18, %22 : vector<72x8xf32>
    %24 = vector.extract_strided_slice %5 {offsets = [0, 0], sizes = [72, 4], strides = [1, 1]} : vector<89x4xbf16> to vector<72x4xbf16>
    %c3_24 = arith.constant 3 : index
    %c0_25 = arith.constant 0 : index
    %c0_26 = arith.constant 0 : index
    %25 = vector.load %arg2[%c3_24, %c0_25, %c0_26] : memref<9x4x8xbf16, #tpu.memory_space<vmem>>, vector<1x4x8xbf16>
    %26 = vector.shape_cast %25 : vector<1x4x8xbf16> to vector<4x8xbf16>
    %cst_27 = arith.constant dense<0.000000e+00> : vector<72x8xf32>
    %27 = tpu.matmul %24, %26, %cst_27 {dimension_numbers = #tpu.dot_dimension_numbers<[1], [0], [0], [1], [0, 0, 1, 1], [], []>} : vector<72x4xbf16>, vector<4x8xbf16>, vector<72x8xf32> -> vector<72x8xf32>
    %28 = arith.addf %23, %27 : vector<72x8xf32>
    %29 = vector.extract_strided_slice %7 {offsets = [0, 0], sizes = [72, 4], strides = [1, 1]} : vector<89x4xbf16> to vector<72x4xbf16>
    %c4 = arith.constant 4 : index
    %c0_28 = arith.constant 0 : index
    %c0_29 = arith.constant 0 : index
    %30 = vector.load %arg2[%c4, %c0_28, %c0_29] : memref<9x4x8xbf16, #tpu.memory_space<vmem>>, vector<1x4x8xbf16>
    %31 = vector.shape_cast %30 : vector<1x4x8xbf16> to vector<4x8xbf16>
    %cst_30 = arith.constant dense<0.000000e+00> : vector<72x8xf32>
    %32 = tpu.matmul %29, %31, %cst_30 {dimension_numbers = #tpu.dot_dimension_numbers<[1], [0], [0], [1], [0, 0, 1, 1], [], []>} : vector<72x4xbf16>, vector<4x8xbf16>, vector<72x8xf32> -> vector<72x8xf32>
    %33 = arith.addf %28, %32 : vector<72x8xf32>
    %34 = vector.extract_strided_slice %5 {offsets = [1, 0], sizes = [72, 4], strides = [1, 1]} : vector<89x4xbf16> to vector<72x4xbf16>
    %c5 = arith.constant 5 : index
    %c0_31 = arith.constant 0 : index
    %c0_32 = arith.constant 0 : index
    %35 = vector.load %arg2[%c5, %c0_31, %c0_32] : memref<9x4x8xbf16, #tpu.memory_space<vmem>>, vector<1x4x8xbf16>
    %36 = vector.shape_cast %35 : vector<1x4x8xbf16> to vector<4x8xbf16>
    %cst_33 = arith.constant dense<0.000000e+00> : vector<72x8xf32>
    %37 = tpu.matmul %34, %36, %cst_33 {dimension_numbers = #tpu.dot_dimension_numbers<[1], [0], [0], [1], [0, 0, 1, 1], [], []>} : vector<72x4xbf16>, vector<4x8xbf16>, vector<72x8xf32> -> vector<72x8xf32>
    %38 = arith.addf %33, %37 : vector<72x8xf32>
    %39 = vector.extract_strided_slice %1 {offsets = [9, 0], sizes = [72, 4], strides = [1, 1]} : vector<89x4xbf16> to vector<72x4xbf16>
    %c6 = arith.constant 6 : index
    %c0_34 = arith.constant 0 : index
    %c0_35 = arith.constant 0 : index
    %40 = vector.load %arg2[%c6, %c0_34, %c0_35] : memref<9x4x8xbf16, #tpu.memory_space<vmem>>, vector<1x4x8xbf16>
    %41 = vector.shape_cast %40 : vector<1x4x8xbf16> to vector<4x8xbf16>
    %cst_36 = arith.constant dense<0.000000e+00> : vector<72x8xf32>
    %42 = tpu.matmul %39, %41, %cst_36 {dimension_numbers = #tpu.dot_dimension_numbers<[1], [0], [0], [1], [0, 0, 1, 1], [], []>} : vector<72x4xbf16>, vector<4x8xbf16>, vector<72x8xf32> -> vector<72x8xf32>
    %43 = arith.addf %38, %42 : vector<72x8xf32>
    %44 = vector.extract_strided_slice %3 {offsets = [9, 0], sizes = [72, 4], strides = [1, 1]} : vector<89x4xbf16> to vector<72x4xbf16>
    %c7 = arith.constant 7 : index
    %c0_37 = arith.constant 0 : index
    %c0_38 = arith.constant 0 : index
    %45 = vector.load %arg2[%c7, %c0_37, %c0_38] : memref<9x4x8xbf16, #tpu.memory_space<vmem>>, vector<1x4x8xbf16>
    %46 = vector.shape_cast %45 : vector<1x4x8xbf16> to vector<4x8xbf16>
    %cst_39 = arith.constant dense<0.000000e+00> : vector<72x8xf32>
    %47 = tpu.matmul %44, %46, %cst_39 {dimension_numbers = #tpu.dot_dimension_numbers<[1], [0], [0], [1], [0, 0, 1, 1], [], []>} : vector<72x4xbf16>, vector<4x8xbf16>, vector<72x8xf32> -> vector<72x8xf32>
    %48 = arith.addf %43, %47 : vector<72x8xf32>
    %49 = vector.extract_strided_slice %1 {offsets = [10, 0], sizes = [72, 4], strides = [1, 1]} : vector<89x4xbf16> to vector<72x4xbf16>
    %c8 = arith.constant 8 : index
    %c0_40 = arith.constant 0 : index
    %c0_41 = arith.constant 0 : index
    %50 = vector.load %arg2[%c8, %c0_40, %c0_41] : memref<9x4x8xbf16, #tpu.memory_space<vmem>>, vector<1x4x8xbf16>
    %51 = vector.shape_cast %50 : vector<1x4x8xbf16> to vector<4x8xbf16>
    %cst_42 = arith.constant dense<0.000000e+00> : vector<72x8xf32>
    %52 = tpu.matmul %49, %51, %cst_42 {dimension_numbers = #tpu.dot_dimension_numbers<[1], [0], [0], [1], [0, 0, 1, 1], [], []>} : vector<72x4xbf16>, vector<4x8xbf16>, vector<72x8xf32> -> vector<72x8xf32>
    %53 = arith.addf %48, %52 : vector<72x8xf32>
    %cst_43 = arith.constant 0.000000e+00 : f32
    %54 = vector.broadcast %cst_43 : f32 to vector<72x8xf32>
    %55 = vector.extract_strided_slice %3 {offsets = [0, 0], sizes = [72, 4], strides = [1, 1]} : vector<89x4xbf16> to vector<72x4xbf16>
    %c0_44 = arith.constant 0 : index
    %c0_45 = arith.constant 0 : index
    %c0_46 = arith.constant 0 : index
    %56 = vector.load %arg2[%c0_44, %c0_45, %c0_46] : memref<9x4x8xbf16, #tpu.memory_space<vmem>>, vector<1x4x8xbf16>
    %57 = vector.shape_cast %56 : vector<1x4x8xbf16> to vector<4x8xbf16>
    %cst_47 = arith.constant dense<0.000000e+00> : vector<72x8xf32>
    %58 = tpu.matmul %55, %57, %cst_47 {dimension_numbers = #tpu.dot_dimension_numbers<[1], [0], [0], [1], [0, 0, 1, 1], [], []>} : vector<72x4xbf16>, vector<4x8xbf16>, vector<72x8xf32> -> vector<72x8xf32>
    %59 = arith.addf %54, %58 : vector<72x8xf32>
    %60 = vector.extract_strided_slice %1 {offsets = [1, 0], sizes = [72, 4], strides = [1, 1]} : vector<89x4xbf16> to vector<72x4xbf16>
    %c1_48 = arith.constant 1 : index
    %c0_49 = arith.constant 0 : index
    %c0_50 = arith.constant 0 : index
    %61 = vector.load %arg2[%c1_48, %c0_49, %c0_50] : memref<9x4x8xbf16, #tpu.memory_space<vmem>>, vector<1x4x8xbf16>
    %62 = vector.shape_cast %61 : vector<1x4x8xbf16> to vector<4x8xbf16>
    %cst_51 = arith.constant dense<0.000000e+00> : vector<72x8xf32>
    %63 = tpu.matmul %60, %62, %cst_51 {dimension_numbers = #tpu.dot_dimension_numbers<[1], [0], [0], [1], [0, 0, 1, 1], [], []>} : vector<72x4xbf16>, vector<4x8xbf16>, vector<72x8xf32> -> vector<72x8xf32>
    %64 = arith.addf %59, %63 : vector<72x8xf32>
    %65 = vector.extract_strided_slice %3 {offsets = [1, 0], sizes = [72, 4], strides = [1, 1]} : vector<89x4xbf16> to vector<72x4xbf16>
    %c2_52 = arith.constant 2 : index
    %c0_53 = arith.constant 0 : index
    %c0_54 = arith.constant 0 : index
    %66 = vector.load %arg2[%c2_52, %c0_53, %c0_54] : memref<9x4x8xbf16, #tpu.memory_space<vmem>>, vector<1x4x8xbf16>
    %67 = vector.shape_cast %66 : vector<1x4x8xbf16> to vector<4x8xbf16>
    %cst_55 = arith.constant dense<0.000000e+00> : vector<72x8xf32>
    %68 = tpu.matmul %65, %67, %cst_55 {dimension_numbers = #tpu.dot_dimension_numbers<[1], [0], [0], [1], [0, 0, 1, 1], [], []>} : vector<72x4xbf16>, vector<4x8xbf16>, vector<72x8xf32> -> vector<72x8xf32>
    %69 = arith.addf %64, %68 : vector<72x8xf32>
    %70 = vector.extract_strided_slice %7 {offsets = [0, 0], sizes = [72, 4], strides = [1, 1]} : vector<89x4xbf16> to vector<72x4xbf16>
    %c3_56 = arith.constant 3 : index
    %c0_57 = arith.constant 0 : index
    %c0_58 = arith.constant 0 : index
    %71 = vector.load %arg2[%c3_56, %c0_57, %c0_58] : memref<9x4x8xbf16, #tpu.memory_space<vmem>>, vector<1x4x8xbf16>
    %72 = vector.shape_cast %71 : vector<1x4x8xbf16> to vector<4x8xbf16>
    %cst_59 = arith.constant dense<0.000000e+00> : vector<72x8xf32>
    %73 = tpu.matmul %70, %72, %cst_59 {dimension_numbers = #tpu.dot_dimension_numbers<[1], [0], [0], [1], [0, 0, 1, 1], [], []>} : vector<72x4xbf16>, vector<4x8xbf16>, vector<72x8xf32> -> vector<72x8xf32>
    %74 = arith.addf %69, %73 : vector<72x8xf32>
    %75 = vector.extract_strided_slice %5 {offsets = [1, 0], sizes = [72, 4], strides = [1, 1]} : vector<89x4xbf16> to vector<72x4xbf16>
    %c4_60 = arith.constant 4 : index
    %c0_61 = arith.constant 0 : index
    %c0_62 = arith.constant 0 : index
    %76 = vector.load %arg2[%c4_60, %c0_61, %c0_62] : memref<9x4x8xbf16, #tpu.memory_space<vmem>>, vector<1x4x8xbf16>
    %77 = vector.shape_cast %76 : vector<1x4x8xbf16> to vector<4x8xbf16>
    %cst_63 = arith.constant dense<0.000000e+00> : vector<72x8xf32>
    %78 = tpu.matmul %75, %77, %cst_63 {dimension_numbers = #tpu.dot_dimension_numbers<[1], [0], [0], [1], [0, 0, 1, 1], [], []>} : vector<72x4xbf16>, vector<4x8xbf16>, vector<72x8xf32> -> vector<72x8xf32>
    %79 = arith.addf %74, %78 : vector<72x8xf32>
    %80 = vector.extract_strided_slice %7 {offsets = [1, 0], sizes = [72, 4], strides = [1, 1]} : vector<89x4xbf16> to vector<72x4xbf16>
    %c5_64 = arith.constant 5 : index
    %c0_65 = arith.constant 0 : index
    %c0_66 = arith.constant 0 : index
    %81 = vector.load %arg2[%c5_64, %c0_65, %c0_66] : memref<9x4x8xbf16, #tpu.memory_space<vmem>>, vector<1x4x8xbf16>
    %82 = vector.shape_cast %81 : vector<1x4x8xbf16> to vector<4x8xbf16>
    %cst_67 = arith.constant dense<0.000000e+00> : vector<72x8xf32>
    %83 = tpu.matmul %80, %82, %cst_67 {dimension_numbers = #tpu.dot_dimension_numbers<[1], [0], [0], [1], [0, 0, 1, 1], [], []>} : vector<72x4xbf16>, vector<4x8xbf16>, vector<72x8xf32> -> vector<72x8xf32>
    %84 = arith.addf %79, %83 : vector<72x8xf32>
    %85 = vector.extract_strided_slice %3 {offsets = [9, 0], sizes = [72, 4], strides = [1, 1]} : vector<89x4xbf16> to vector<72x4xbf16>
    %c6_68 = arith.constant 6 : index
    %c0_69 = arith.constant 0 : index
    %c0_70 = arith.constant 0 : index
    %86 = vector.load %arg2[%c6_68, %c0_69, %c0_70] : memref<9x4x8xbf16, #tpu.memory_space<vmem>>, vector<1x4x8xbf16>
    %87 = vector.shape_cast %86 : vector<1x4x8xbf16> to vector<4x8xbf16>
    %cst_71 = arith.constant dense<0.000000e+00> : vector<72x8xf32>
    %88 = tpu.matmul %85, %87, %cst_71 {dimension_numbers = #tpu.dot_dimension_numbers<[1], [0], [0], [1], [0, 0, 1, 1], [], []>} : vector<72x4xbf16>, vector<4x8xbf16>, vector<72x8xf32> -> vector<72x8xf32>
    %89 = arith.addf %84, %88 : vector<72x8xf32>
    %90 = vector.extract_strided_slice %1 {offsets = [10, 0], sizes = [72, 4], strides = [1, 1]} : vector<89x4xbf16> to vector<72x4xbf16>
    %c7_72 = arith.constant 7 : index
    %c0_73 = arith.constant 0 : index
    %c0_74 = arith.constant 0 : index
    %91 = vector.load %arg2[%c7_72, %c0_73, %c0_74] : memref<9x4x8xbf16, #tpu.memory_space<vmem>>, vector<1x4x8xbf16>
    %92 = vector.shape_cast %91 : vector<1x4x8xbf16> to vector<4x8xbf16>
    %cst_75 = arith.constant dense<0.000000e+00> : vector<72x8xf32>
    %93 = tpu.matmul %90, %92, %cst_75 {dimension_numbers = #tpu.dot_dimension_numbers<[1], [0], [0], [1], [0, 0, 1, 1], [], []>} : vector<72x4xbf16>, vector<4x8xbf16>, vector<72x8xf32> -> vector<72x8xf32>
    %94 = arith.addf %89, %93 : vector<72x8xf32>
    %95 = vector.extract_strided_slice %3 {offsets = [10, 0], sizes = [72, 4], strides = [1, 1]} : vector<89x4xbf16> to vector<72x4xbf16>
    %c8_76 = arith.constant 8 : index
    %c0_77 = arith.constant 0 : index
    %c0_78 = arith.constant 0 : index
    %96 = vector.load %arg2[%c8_76, %c0_77, %c0_78] : memref<9x4x8xbf16, #tpu.memory_space<vmem>>, vector<1x4x8xbf16>
    %97 = vector.shape_cast %96 : vector<1x4x8xbf16> to vector<4x8xbf16>
    %cst_79 = arith.constant dense<0.000000e+00> : vector<72x8xf32>
    %98 = tpu.matmul %95, %97, %cst_79 {dimension_numbers = #tpu.dot_dimension_numbers<[1], [0], [0], [1], [0, 0, 1, 1], [], []>} : vector<72x4xbf16>, vector<4x8xbf16>, vector<72x8xf32> -> vector<72x8xf32>
    %99 = arith.addf %94, %98 : vector<72x8xf32>
    %100 = arith.maximumf %53, %99 : vector<72x8xf32>
    %cst_80 = arith.constant 0.000000e+00 : f32
    %101 = vector.broadcast %cst_80 : f32 to vector<72x8xf32>
    %102 = vector.extract_strided_slice %5 {offsets = [0, 0], sizes = [72, 4], strides = [1, 1]} : vector<89x4xbf16> to vector<72x4xbf16>
    %c0_81 = arith.constant 0 : index
    %c0_82 = arith.constant 0 : index
    %c0_83 = arith.constant 0 : index
    %103 = vector.load %arg2[%c0_81, %c0_82, %c0_83] : memref<9x4x8xbf16, #tpu.memory_space<vmem>>, vector<1x4x8xbf16>
    %104 = vector.shape_cast %103 : vector<1x4x8xbf16> to vector<4x8xbf16>
    %cst_84 = arith.constant dense<0.000000e+00> : vector<72x8xf32>
    %105 = tpu.matmul %102, %104, %cst_84 {dimension_numbers = #tpu.dot_dimension_numbers<[1], [0], [0], [1], [0, 0, 1, 1], [], []>} : vector<72x4xbf16>, vector<4x8xbf16>, vector<72x8xf32> -> vector<72x8xf32>
    %106 = arith.addf %101, %105 : vector<72x8xf32>
    %107 = vector.extract_strided_slice %7 {offsets = [0, 0], sizes = [72, 4], strides = [1, 1]} : vector<89x4xbf16> to vector<72x4xbf16>
    %c1_85 = arith.constant 1 : index
    %c0_86 = arith.constant 0 : index
    %c0_87 = arith.constant 0 : index
    %108 = vector.load %arg2[%c1_85, %c0_86, %c0_87] : memref<9x4x8xbf16, #tpu.memory_space<vmem>>, vector<1x4x8xbf16>
    %109 = vector.shape_cast %108 : vector<1x4x8xbf16> to vector<4x8xbf16>
    %cst_88 = arith.constant dense<0.000000e+00> : vector<72x8xf32>
    %110 = tpu.matmul %107, %109, %cst_88 {dimension_numbers = #tpu.dot_dimension_numbers<[1], [0], [0], [1], [0, 0, 1, 1], [], []>} : vector<72x4xbf16>, vector<4x8xbf16>, vector<72x8xf32> -> vector<72x8xf32>
    %111 = arith.addf %106, %110 : vector<72x8xf32>
    %112 = vector.extract_strided_slice %5 {offsets = [1, 0], sizes = [72, 4], strides = [1, 1]} : vector<89x4xbf16> to vector<72x4xbf16>
    %c2_89 = arith.constant 2 : index
    %c0_90 = arith.constant 0 : index
    %c0_91 = arith.constant 0 : index
    %113 = vector.load %arg2[%c2_89, %c0_90, %c0_91] : memref<9x4x8xbf16, #tpu.memory_space<vmem>>, vector<1x4x8xbf16>
    %114 = vector.shape_cast %113 : vector<1x4x8xbf16> to vector<4x8xbf16>
    %cst_92 = arith.constant dense<0.000000e+00> : vector<72x8xf32>
    %115 = tpu.matmul %112, %114, %cst_92 {dimension_numbers = #tpu.dot_dimension_numbers<[1], [0], [0], [1], [0, 0, 1, 1], [], []>} : vector<72x4xbf16>, vector<4x8xbf16>, vector<72x8xf32> -> vector<72x8xf32>
    %116 = arith.addf %111, %115 : vector<72x8xf32>
    %117 = vector.extract_strided_slice %1 {offsets = [9, 0], sizes = [72, 4], strides = [1, 1]} : vector<89x4xbf16> to vector<72x4xbf16>
    %c3_93 = arith.constant 3 : index
    %c0_94 = arith.constant 0 : index
    %c0_95 = arith.constant 0 : index
    %118 = vector.load %arg2[%c3_93, %c0_94, %c0_95] : memref<9x4x8xbf16, #tpu.memory_space<vmem>>, vector<1x4x8xbf16>
    %119 = vector.shape_cast %118 : vector<1x4x8xbf16> to vector<4x8xbf16>
    %cst_96 = arith.constant dense<0.000000e+00> : vector<72x8xf32>
    %120 = tpu.matmul %117, %119, %cst_96 {dimension_numbers = #tpu.dot_dimension_numbers<[1], [0], [0], [1], [0, 0, 1, 1], [], []>} : vector<72x4xbf16>, vector<4x8xbf16>, vector<72x8xf32> -> vector<72x8xf32>
    %121 = arith.addf %116, %120 : vector<72x8xf32>
    %122 = vector.extract_strided_slice %3 {offsets = [9, 0], sizes = [72, 4], strides = [1, 1]} : vector<89x4xbf16> to vector<72x4xbf16>
    %c4_97 = arith.constant 4 : index
    %c0_98 = arith.constant 0 : index
    %c0_99 = arith.constant 0 : index
    %123 = vector.load %arg2[%c4_97, %c0_98, %c0_99] : memref<9x4x8xbf16, #tpu.memory_space<vmem>>, vector<1x4x8xbf16>
    %124 = vector.shape_cast %123 : vector<1x4x8xbf16> to vector<4x8xbf16>
    %cst_100 = arith.constant dense<0.000000e+00> : vector<72x8xf32>
    %125 = tpu.matmul %122, %124, %cst_100 {dimension_numbers = #tpu.dot_dimension_numbers<[1], [0], [0], [1], [0, 0, 1, 1], [], []>} : vector<72x4xbf16>, vector<4x8xbf16>, vector<72x8xf32> -> vector<72x8xf32>
    %126 = arith.addf %121, %125 : vector<72x8xf32>
    %127 = vector.extract_strided_slice %1 {offsets = [10, 0], sizes = [72, 4], strides = [1, 1]} : vector<89x4xbf16> to vector<72x4xbf16>
    %c5_101 = arith.constant 5 : index
    %c0_102 = arith.constant 0 : index
    %c0_103 = arith.constant 0 : index
    %128 = vector.load %arg2[%c5_101, %c0_102, %c0_103] : memref<9x4x8xbf16, #tpu.memory_space<vmem>>, vector<1x4x8xbf16>
    %129 = vector.shape_cast %128 : vector<1x4x8xbf16> to vector<4x8xbf16>
    %cst_104 = arith.constant dense<0.000000e+00> : vector<72x8xf32>
    %130 = tpu.matmul %127, %129, %cst_104 {dimension_numbers = #tpu.dot_dimension_numbers<[1], [0], [0], [1], [0, 0, 1, 1], [], []>} : vector<72x4xbf16>, vector<4x8xbf16>, vector<72x8xf32> -> vector<72x8xf32>
    %131 = arith.addf %126, %130 : vector<72x8xf32>
    %132 = vector.extract_strided_slice %5 {offsets = [9, 0], sizes = [72, 4], strides = [1, 1]} : vector<89x4xbf16> to vector<72x4xbf16>
    %c6_105 = arith.constant 6 : index
    %c0_106 = arith.constant 0 : index
    %c0_107 = arith.constant 0 : index
    %133 = vector.load %arg2[%c6_105, %c0_106, %c0_107] : memref<9x4x8xbf16, #tpu.memory_space<vmem>>, vector<1x4x8xbf16>
    %134 = vector.shape_cast %133 : vector<1x4x8xbf16> to vector<4x8xbf16>
    %cst_108 = arith.constant dense<0.000000e+00> : vector<72x8xf32>
    %135 = tpu.matmul %132, %134, %cst_108 {dimension_numbers = #tpu.dot_dimension_numbers<[1], [0], [0], [1], [0, 0, 1, 1], [], []>} : vector<72x4xbf16>, vector<4x8xbf16>, vector<72x8xf32> -> vector<72x8xf32>
    %136 = arith.addf %131, %135 : vector<72x8xf32>
    %137 = vector.extract_strided_slice %7 {offsets = [9, 0], sizes = [72, 4], strides = [1, 1]} : vector<89x4xbf16> to vector<72x4xbf16>
    %c7_109 = arith.constant 7 : index
    %c0_110 = arith.constant 0 : index
    %c0_111 = arith.constant 0 : index
    %138 = vector.load %arg2[%c7_109, %c0_110, %c0_111] : memref<9x4x8xbf16, #tpu.memory_space<vmem>>, vector<1x4x8xbf16>
    %139 = vector.shape_cast %138 : vector<1x4x8xbf16> to vector<4x8xbf16>
    %cst_112 = arith.constant dense<0.000000e+00> : vector<72x8xf32>
    %140 = tpu.matmul %137, %139, %cst_112 {dimension_numbers = #tpu.dot_dimension_numbers<[1], [0], [0], [1], [0, 0, 1, 1], [], []>} : vector<72x4xbf16>, vector<4x8xbf16>, vector<72x8xf32> -> vector<72x8xf32>
    %141 = arith.addf %136, %140 : vector<72x8xf32>
    %142 = vector.extract_strided_slice %5 {offsets = [10, 0], sizes = [72, 4], strides = [1, 1]} : vector<89x4xbf16> to vector<72x4xbf16>
    %c8_113 = arith.constant 8 : index
    %c0_114 = arith.constant 0 : index
    %c0_115 = arith.constant 0 : index
    %143 = vector.load %arg2[%c8_113, %c0_114, %c0_115] : memref<9x4x8xbf16, #tpu.memory_space<vmem>>, vector<1x4x8xbf16>
    %144 = vector.shape_cast %143 : vector<1x4x8xbf16> to vector<4x8xbf16>
    %cst_116 = arith.constant dense<0.000000e+00> : vector<72x8xf32>
    %145 = tpu.matmul %142, %144, %cst_116 {dimension_numbers = #tpu.dot_dimension_numbers<[1], [0], [0], [1], [0, 0, 1, 1], [], []>} : vector<72x4xbf16>, vector<4x8xbf16>, vector<72x8xf32> -> vector<72x8xf32>
    %146 = arith.addf %141, %145 : vector<72x8xf32>
    %147 = arith.maximumf %100, %146 : vector<72x8xf32>
    %cst_117 = arith.constant 0.000000e+00 : f32
    %148 = vector.broadcast %cst_117 : f32 to vector<72x8xf32>
    %149 = vector.extract_strided_slice %7 {offsets = [0, 0], sizes = [72, 4], strides = [1, 1]} : vector<89x4xbf16> to vector<72x4xbf16>
    %c0_118 = arith.constant 0 : index
    %c0_119 = arith.constant 0 : index
    %c0_120 = arith.constant 0 : index
    %150 = vector.load %arg2[%c0_118, %c0_119, %c0_120] : memref<9x4x8xbf16, #tpu.memory_space<vmem>>, vector<1x4x8xbf16>
    %151 = vector.shape_cast %150 : vector<1x4x8xbf16> to vector<4x8xbf16>
    %cst_121 = arith.constant dense<0.000000e+00> : vector<72x8xf32>
    %152 = tpu.matmul %149, %151, %cst_121 {dimension_numbers = #tpu.dot_dimension_numbers<[1], [0], [0], [1], [0, 0, 1, 1], [], []>} : vector<72x4xbf16>, vector<4x8xbf16>, vector<72x8xf32> -> vector<72x8xf32>
    %153 = arith.addf %148, %152 : vector<72x8xf32>
    %154 = vector.extract_strided_slice %5 {offsets = [1, 0], sizes = [72, 4], strides = [1, 1]} : vector<89x4xbf16> to vector<72x4xbf16>
    %c1_122 = arith.constant 1 : index
    %c0_123 = arith.constant 0 : index
    %c0_124 = arith.constant 0 : index
    %155 = vector.load %arg2[%c1_122, %c0_123, %c0_124] : memref<9x4x8xbf16, #tpu.memory_space<vmem>>, vector<1x4x8xbf16>
    %156 = vector.shape_cast %155 : vector<1x4x8xbf16> to vector<4x8xbf16>
    %cst_125 = arith.constant dense<0.000000e+00> : vector<72x8xf32>
    %157 = tpu.matmul %154, %156, %cst_125 {dimension_numbers = #tpu.dot_dimension_numbers<[1], [0], [0], [1], [0, 0, 1, 1], [], []>} : vector<72x4xbf16>, vector<4x8xbf16>, vector<72x8xf32> -> vector<72x8xf32>
    %158 = arith.addf %153, %157 : vector<72x8xf32>
    %159 = vector.extract_strided_slice %7 {offsets = [1, 0], sizes = [72, 4], strides = [1, 1]} : vector<89x4xbf16> to vector<72x4xbf16>
    %c2_126 = arith.constant 2 : index
    %c0_127 = arith.constant 0 : index
    %c0_128 = arith.constant 0 : index
    %160 = vector.load %arg2[%c2_126, %c0_127, %c0_128] : memref<9x4x8xbf16, #tpu.memory_space<vmem>>, vector<1x4x8xbf16>
    %161 = vector.shape_cast %160 : vector<1x4x8xbf16> to vector<4x8xbf16>
    %cst_129 = arith.constant dense<0.000000e+00> : vector<72x8xf32>
    %162 = tpu.matmul %159, %161, %cst_129 {dimension_numbers = #tpu.dot_dimension_numbers<[1], [0], [0], [1], [0, 0, 1, 1], [], []>} : vector<72x4xbf16>, vector<4x8xbf16>, vector<72x8xf32> -> vector<72x8xf32>
    %163 = arith.addf %158, %162 : vector<72x8xf32>
    %164 = vector.extract_strided_slice %3 {offsets = [9, 0], sizes = [72, 4], strides = [1, 1]} : vector<89x4xbf16> to vector<72x4xbf16>
    %c3_130 = arith.constant 3 : index
    %c0_131 = arith.constant 0 : index
    %c0_132 = arith.constant 0 : index
    %165 = vector.load %arg2[%c3_130, %c0_131, %c0_132] : memref<9x4x8xbf16, #tpu.memory_space<vmem>>, vector<1x4x8xbf16>
    %166 = vector.shape_cast %165 : vector<1x4x8xbf16> to vector<4x8xbf16>
    %cst_133 = arith.constant dense<0.000000e+00> : vector<72x8xf32>
    %167 = tpu.matmul %164, %166, %cst_133 {dimension_numbers = #tpu.dot_dimension_numbers<[1], [0], [0], [1], [0, 0, 1, 1], [], []>} : vector<72x4xbf16>, vector<4x8xbf16>, vector<72x8xf32> -> vector<72x8xf32>
    %168 = arith.addf %163, %167 : vector<72x8xf32>
    %169 = vector.extract_strided_slice %1 {offsets = [10, 0], sizes = [72, 4], strides = [1, 1]} : vector<89x4xbf16> to vector<72x4xbf16>
    %c4_134 = arith.constant 4 : index
    %c0_135 = arith.constant 0 : index
    %c0_136 = arith.constant 0 : index
    %170 = vector.load %arg2[%c4_134, %c0_135, %c0_136] : memref<9x4x8xbf16, #tpu.memory_space<vmem>>, vector<1x4x8xbf16>
    %171 = vector.shape_cast %170 : vector<1x4x8xbf16> to vector<4x8xbf16>
    %cst_137 = arith.constant dense<0.000000e+00> : vector<72x8xf32>
    %172 = tpu.matmul %169, %171, %cst_137 {dimension_numbers = #tpu.dot_dimension_numbers<[1], [0], [0], [1], [0, 0, 1, 1], [], []>} : vector<72x4xbf16>, vector<4x8xbf16>, vector<72x8xf32> -> vector<72x8xf32>
    %173 = arith.addf %168, %172 : vector<72x8xf32>
    %174 = vector.extract_strided_slice %3 {offsets = [10, 0], sizes = [72, 4], strides = [1, 1]} : vector<89x4xbf16> to vector<72x4xbf16>
    %c5_138 = arith.constant 5 : index
    %c0_139 = arith.constant 0 : index
    %c0_140 = arith.constant 0 : index
    %175 = vector.load %arg2[%c5_138, %c0_139, %c0_140] : memref<9x4x8xbf16, #tpu.memory_space<vmem>>, vector<1x4x8xbf16>
    %176 = vector.shape_cast %175 : vector<1x4x8xbf16> to vector<4x8xbf16>
    %cst_141 = arith.constant dense<0.000000e+00> : vector<72x8xf32>
    %177 = tpu.matmul %174, %176, %cst_141 {dimension_numbers = #tpu.dot_dimension_numbers<[1], [0], [0], [1], [0, 0, 1, 1], [], []>} : vector<72x4xbf16>, vector<4x8xbf16>, vector<72x8xf32> -> vector<72x8xf32>
    %178 = arith.addf %173, %177 : vector<72x8xf32>
    %179 = vector.extract_strided_slice %7 {offsets = [9, 0], sizes = [72, 4], strides = [1, 1]} : vector<89x4xbf16> to vector<72x4xbf16>
    %c6_142 = arith.constant 6 : index
    %c0_143 = arith.constant 0 : index
    %c0_144 = arith.constant 0 : index
    %180 = vector.load %arg2[%c6_142, %c0_143, %c0_144] : memref<9x4x8xbf16, #tpu.memory_space<vmem>>, vector<1x4x8xbf16>
    %181 = vector.shape_cast %180 : vector<1x4x8xbf16> to vector<4x8xbf16>
    %cst_145 = arith.constant dense<0.000000e+00> : vector<72x8xf32>
    %182 = tpu.matmul %179, %181, %cst_145 {dimension_numbers = #tpu.dot_dimension_numbers<[1], [0], [0], [1], [0, 0, 1, 1], [], []>} : vector<72x4xbf16>, vector<4x8xbf16>, vector<72x8xf32> -> vector<72x8xf32>
    %183 = arith.addf %178, %182 : vector<72x8xf32>
    %184 = vector.extract_strided_slice %5 {offsets = [10, 0], sizes = [72, 4], strides = [1, 1]} : vector<89x4xbf16> to vector<72x4xbf16>
    %c7_146 = arith.constant 7 : index
    %c0_147 = arith.constant 0 : index
    %c0_148 = arith.constant 0 : index
    %185 = vector.load %arg2[%c7_146, %c0_147, %c0_148] : memref<9x4x8xbf16, #tpu.memory_space<vmem>>, vector<1x4x8xbf16>
    %186 = vector.shape_cast %185 : vector<1x4x8xbf16> to vector<4x8xbf16>
    %cst_149 = arith.constant dense<0.000000e+00> : vector<72x8xf32>
    %187 = tpu.matmul %184, %186, %cst_149 {dimension_numbers = #tpu.dot_dimension_numbers<[1], [0], [0], [1], [0, 0, 1, 1], [], []>} : vector<72x4xbf16>, vector<4x8xbf16>, vector<72x8xf32> -> vector<72x8xf32>
    %188 = arith.addf %183, %187 : vector<72x8xf32>
    %189 = vector.extract_strided_slice %7 {offsets = [10, 0], sizes = [72, 4], strides = [1, 1]} : vector<89x4xbf16> to vector<72x4xbf16>
    %c8_150 = arith.constant 8 : index
    %c0_151 = arith.constant 0 : index
    %c0_152 = arith.constant 0 : index
    %190 = vector.load %arg2[%c8_150, %c0_151, %c0_152] : memref<9x4x8xbf16, #tpu.memory_space<vmem>>, vector<1x4x8xbf16>
    %191 = vector.shape_cast %190 : vector<1x4x8xbf16> to vector<4x8xbf16>
    %cst_153 = arith.constant dense<0.000000e+00> : vector<72x8xf32>
    %192 = tpu.matmul %189, %191, %cst_153 {dimension_numbers = #tpu.dot_dimension_numbers<[1], [0], [0], [1], [0, 0, 1, 1], [], []>} : vector<72x4xbf16>, vector<4x8xbf16>, vector<72x8xf32> -> vector<72x8xf32>
    %193 = arith.addf %188, %192 : vector<72x8xf32>
    %194 = arith.maximumf %147, %193 : vector<72x8xf32>
    %c0_154 = arith.constant 0 : index
    %c0_155 = arith.constant 0 : index
    %195 = vector.load %arg3[%c0_154, %c0_155] : memref<1x8xf32, #tpu.memory_space<vmem>>, vector<1x8xf32>
    %196 = vector.broadcast %195 : vector<1x8xf32> to vector<72x8xf32>
    %197 = arith.addf %194, %196 : vector<72x8xf32>
    %cst_156 = arith.constant 0.000000e+00 : f32
    %198 = vector.broadcast %cst_156 : f32 to vector<72x8xf32>
    %199 = arith.maximumf %197, %198 : vector<72x8xf32>
    %200 = arith.truncf %199 : vector<72x8xf32> to vector<72x8xbf16>
    %c0_157 = arith.constant 0 : index
    %c0_158 = arith.constant 0 : index
    %c0_159 = arith.constant 0 : index
    %201 = vector.load %arg4[%c0_157, %c0_158, %c0_159] : memref<1x72x8xbf16, #tpu.memory_space<vmem>>, vector<1x72x8xbf16>
    %202 = vector.shape_cast %201 : vector<1x72x8xbf16> to vector<72x8xbf16>
    %203 = vector.shape_cast %200 : vector<72x8xbf16> to vector<1x72x8xbf16>
    tpu.vector_store %arg4[%c0_157, %c0_158, %c0_159], %203 {strides = array<i32>} : memref<1x72x8xbf16, #tpu.memory_space<vmem>>, vector<1x72x8xbf16>,
    return
  }
  func.func @transform_0(%arg0: i32) -> (i32, i32, i32, i32) {
    %c0_i32 = arith.constant 0 : i32
    %c0_i32_0 = arith.constant 0 : i32
    %c0_i32_1 = arith.constant 0 : i32
    %c0_i32_2 = arith.constant 0 : i32
    return %arg0, %c0_i32, %c0_i32_0, %c0_i32_1 : i32, i32, i32, i32
  }
  func.func @transform_1(%arg0: i32) -> (i32, i32, i32) {
    %c0_i32 = arith.constant 0 : i32
    %c0_i32_0 = arith.constant 0 : i32
    %c0_i32_1 = arith.constant 0 : i32
    %c0_i32_2 = arith.constant 0 : i32
    return %c0_i32, %c0_i32_0, %c0_i32_1 : i32, i32, i32
  }
  func.func @transform_2(%arg0: i32) -> (i32, i32) {
    %c0_i32 = arith.constant 0 : i32
    %c0_i32_0 = arith.constant 0 : i32
    %c0_i32_1 = arith.constant 0 : i32
    return %c0_i32, %c0_i32_0 : i32, i32
  }
  func.func @transform_3(%arg0: i32) -> (i32, i32, i32) {
    %c0_i32 = arith.constant 0 : i32
    %c0_i32_0 = arith.constant 0 : i32
    %c0_i32_1 = arith.constant 0 : i32
    return %arg0, %c0_i32, %c0_i32_0 : i32, i32, i32
  }
}

module attributes {stable_mosaic.version = 11 : i64} {
  func.func @_conv3x3_relu_pool_kernel(%arg0: i32, %arg1: memref<1x4x33x8xbf16, #tpu.memory_space<vmem>>, %arg2: memref<9x8x16xbf16, #tpu.memory_space<vmem>>, %arg3: memref<1x16xf32, #tpu.memory_space<vmem>>, %arg4: memref<1x20x16xbf16, #tpu.memory_space<vmem>>) attributes {dimension_semantics = [#tpu.dimension_semantics<parallel>], iteration_bounds = array<i64: 4>, scalar_prefetch = 0 : i64, scratch_operands = 0 : i64, tpu.core_type = #tpu.core_type<tc>, window_params = [{transform_indices = @transform_0, window_bounds = array<i64: 1, 4, 33, 8>}, {pipeline_mode = #tpu.pipeline_mode<synchronous>, transform_indices = @transform_1, window_bounds = array<i64: 9, 8, 16>}, {pipeline_mode = #tpu.pipeline_mode<synchronous>, transform_indices = @transform_2, window_bounds = array<i64: 1, 16>}, {transform_indices = @transform_3, window_bounds = array<i64: 1, 20, 16>}]} {
    %c0 = arith.constant 0 : index
    %c0_0 = arith.constant 0 : index
    %c0_1 = arith.constant 0 : index
    %c0_2 = arith.constant 0 : index
    %0 = vector.load %arg1[%c0, %c0_0, %c0_1, %c0_2] : memref<1x4x33x8xbf16, #tpu.memory_space<vmem>>, vector<1x1x33x8xbf16>
    %1 = vector.shape_cast %0 : vector<1x1x33x8xbf16> to vector<33x8xbf16>
    %c0_3 = arith.constant 0 : index
    %c1 = arith.constant 1 : index
    %c0_4 = arith.constant 0 : index
    %c0_5 = arith.constant 0 : index
    %2 = vector.load %arg1[%c0_3, %c1, %c0_4, %c0_5] : memref<1x4x33x8xbf16, #tpu.memory_space<vmem>>, vector<1x1x33x8xbf16>
    %3 = vector.shape_cast %2 : vector<1x1x33x8xbf16> to vector<33x8xbf16>
    %c0_6 = arith.constant 0 : index
    %c2 = arith.constant 2 : index
    %c0_7 = arith.constant 0 : index
    %c0_8 = arith.constant 0 : index
    %4 = vector.load %arg1[%c0_6, %c2, %c0_7, %c0_8] : memref<1x4x33x8xbf16, #tpu.memory_space<vmem>>, vector<1x1x33x8xbf16>
    %5 = vector.shape_cast %4 : vector<1x1x33x8xbf16> to vector<33x8xbf16>
    %c0_9 = arith.constant 0 : index
    %c3 = arith.constant 3 : index
    %c0_10 = arith.constant 0 : index
    %c0_11 = arith.constant 0 : index
    %6 = vector.load %arg1[%c0_9, %c3, %c0_10, %c0_11] : memref<1x4x33x8xbf16, #tpu.memory_space<vmem>>, vector<1x1x33x8xbf16>
    %7 = vector.shape_cast %6 : vector<1x1x33x8xbf16> to vector<33x8xbf16>
    %cst = arith.constant 0.000000e+00 : f32
    %8 = vector.broadcast %cst : f32 to vector<20x16xf32>
    %9 = vector.extract_strided_slice %1 {offsets = [0, 0], sizes = [20, 8], strides = [1, 1]} : vector<33x8xbf16> to vector<20x8xbf16>
    %c0_12 = arith.constant 0 : index
    %c0_13 = arith.constant 0 : index
    %c0_14 = arith.constant 0 : index
    %10 = vector.load %arg2[%c0_12, %c0_13, %c0_14] : memref<9x8x16xbf16, #tpu.memory_space<vmem>>, vector<1x8x16xbf16>
    %11 = vector.shape_cast %10 : vector<1x8x16xbf16> to vector<8x16xbf16>
    %cst_15 = arith.constant dense<0.000000e+00> : vector<20x16xf32>
    %12 = tpu.matmul %9, %11, %cst_15 {dimension_numbers = #tpu.dot_dimension_numbers<[1], [0], [0], [1], [0, 0, 1, 1], [], []>} : vector<20x8xbf16>, vector<8x16xbf16>, vector<20x16xf32> -> vector<20x16xf32>
    %13 = arith.addf %8, %12 : vector<20x16xf32>
    %14 = vector.extract_strided_slice %3 {offsets = [0, 0], sizes = [20, 8], strides = [1, 1]} : vector<33x8xbf16> to vector<20x8xbf16>
    %c1_16 = arith.constant 1 : index
    %c0_17 = arith.constant 0 : index
    %c0_18 = arith.constant 0 : index
    %15 = vector.load %arg2[%c1_16, %c0_17, %c0_18] : memref<9x8x16xbf16, #tpu.memory_space<vmem>>, vector<1x8x16xbf16>
    %16 = vector.shape_cast %15 : vector<1x8x16xbf16> to vector<8x16xbf16>
    %cst_19 = arith.constant dense<0.000000e+00> : vector<20x16xf32>
    %17 = tpu.matmul %14, %16, %cst_19 {dimension_numbers = #tpu.dot_dimension_numbers<[1], [0], [0], [1], [0, 0, 1, 1], [], []>} : vector<20x8xbf16>, vector<8x16xbf16>, vector<20x16xf32> -> vector<20x16xf32>
    %18 = arith.addf %13, %17 : vector<20x16xf32>
    %19 = vector.extract_strided_slice %1 {offsets = [1, 0], sizes = [20, 8], strides = [1, 1]} : vector<33x8xbf16> to vector<20x8xbf16>
    %c2_20 = arith.constant 2 : index
    %c0_21 = arith.constant 0 : index
    %c0_22 = arith.constant 0 : index
    %20 = vector.load %arg2[%c2_20, %c0_21, %c0_22] : memref<9x8x16xbf16, #tpu.memory_space<vmem>>, vector<1x8x16xbf16>
    %21 = vector.shape_cast %20 : vector<1x8x16xbf16> to vector<8x16xbf16>
    %cst_23 = arith.constant dense<0.000000e+00> : vector<20x16xf32>
    %22 = tpu.matmul %19, %21, %cst_23 {dimension_numbers = #tpu.dot_dimension_numbers<[1], [0], [0], [1], [0, 0, 1, 1], [], []>} : vector<20x8xbf16>, vector<8x16xbf16>, vector<20x16xf32> -> vector<20x16xf32>
    %23 = arith.addf %18, %22 : vector<20x16xf32>
    %24 = vector.extract_strided_slice %5 {offsets = [0, 0], sizes = [20, 8], strides = [1, 1]} : vector<33x8xbf16> to vector<20x8xbf16>
    %c3_24 = arith.constant 3 : index
    %c0_25 = arith.constant 0 : index
    %c0_26 = arith.constant 0 : index
    %25 = vector.load %arg2[%c3_24, %c0_25, %c0_26] : memref<9x8x16xbf16, #tpu.memory_space<vmem>>, vector<1x8x16xbf16>
    %26 = vector.shape_cast %25 : vector<1x8x16xbf16> to vector<8x16xbf16>
    %cst_27 = arith.constant dense<0.000000e+00> : vector<20x16xf32>
    %27 = tpu.matmul %24, %26, %cst_27 {dimension_numbers = #tpu.dot_dimension_numbers<[1], [0], [0], [1], [0, 0, 1, 1], [], []>} : vector<20x8xbf16>, vector<8x16xbf16>, vector<20x16xf32> -> vector<20x16xf32>
    %28 = arith.addf %23, %27 : vector<20x16xf32>
    %29 = vector.extract_strided_slice %7 {offsets = [0, 0], sizes = [20, 8], strides = [1, 1]} : vector<33x8xbf16> to vector<20x8xbf16>
    %c4 = arith.constant 4 : index
    %c0_28 = arith.constant 0 : index
    %c0_29 = arith.constant 0 : index
    %30 = vector.load %arg2[%c4, %c0_28, %c0_29] : memref<9x8x16xbf16, #tpu.memory_space<vmem>>, vector<1x8x16xbf16>
    %31 = vector.shape_cast %30 : vector<1x8x16xbf16> to vector<8x16xbf16>
    %cst_30 = arith.constant dense<0.000000e+00> : vector<20x16xf32>
    %32 = tpu.matmul %29, %31, %cst_30 {dimension_numbers = #tpu.dot_dimension_numbers<[1], [0], [0], [1], [0, 0, 1, 1], [], []>} : vector<20x8xbf16>, vector<8x16xbf16>, vector<20x16xf32> -> vector<20x16xf32>
    %33 = arith.addf %28, %32 : vector<20x16xf32>
    %34 = vector.extract_strided_slice %5 {offsets = [1, 0], sizes = [20, 8], strides = [1, 1]} : vector<33x8xbf16> to vector<20x8xbf16>
    %c5 = arith.constant 5 : index
    %c0_31 = arith.constant 0 : index
    %c0_32 = arith.constant 0 : index
    %35 = vector.load %arg2[%c5, %c0_31, %c0_32] : memref<9x8x16xbf16, #tpu.memory_space<vmem>>, vector<1x8x16xbf16>
    %36 = vector.shape_cast %35 : vector<1x8x16xbf16> to vector<8x16xbf16>
    %cst_33 = arith.constant dense<0.000000e+00> : vector<20x16xf32>
    %37 = tpu.matmul %34, %36, %cst_33 {dimension_numbers = #tpu.dot_dimension_numbers<[1], [0], [0], [1], [0, 0, 1, 1], [], []>} : vector<20x8xbf16>, vector<8x16xbf16>, vector<20x16xf32> -> vector<20x16xf32>
    %38 = arith.addf %33, %37 : vector<20x16xf32>
    %39 = vector.extract_strided_slice %1 {offsets = [5, 0], sizes = [20, 8], strides = [1, 1]} : vector<33x8xbf16> to vector<20x8xbf16>
    %c6 = arith.constant 6 : index
    %c0_34 = arith.constant 0 : index
    %c0_35 = arith.constant 0 : index
    %40 = vector.load %arg2[%c6, %c0_34, %c0_35] : memref<9x8x16xbf16, #tpu.memory_space<vmem>>, vector<1x8x16xbf16>
    %41 = vector.shape_cast %40 : vector<1x8x16xbf16> to vector<8x16xbf16>
    %cst_36 = arith.constant dense<0.000000e+00> : vector<20x16xf32>
    %42 = tpu.matmul %39, %41, %cst_36 {dimension_numbers = #tpu.dot_dimension_numbers<[1], [0], [0], [1], [0, 0, 1, 1], [], []>} : vector<20x8xbf16>, vector<8x16xbf16>, vector<20x16xf32> -> vector<20x16xf32>
    %43 = arith.addf %38, %42 : vector<20x16xf32>
    %44 = vector.extract_strided_slice %3 {offsets = [5, 0], sizes = [20, 8], strides = [1, 1]} : vector<33x8xbf16> to vector<20x8xbf16>
    %c7 = arith.constant 7 : index
    %c0_37 = arith.constant 0 : index
    %c0_38 = arith.constant 0 : index
    %45 = vector.load %arg2[%c7, %c0_37, %c0_38] : memref<9x8x16xbf16, #tpu.memory_space<vmem>>, vector<1x8x16xbf16>
    %46 = vector.shape_cast %45 : vector<1x8x16xbf16> to vector<8x16xbf16>
    %cst_39 = arith.constant dense<0.000000e+00> : vector<20x16xf32>
    %47 = tpu.matmul %44, %46, %cst_39 {dimension_numbers = #tpu.dot_dimension_numbers<[1], [0], [0], [1], [0, 0, 1, 1], [], []>} : vector<20x8xbf16>, vector<8x16xbf16>, vector<20x16xf32> -> vector<20x16xf32>
    %48 = arith.addf %43, %47 : vector<20x16xf32>
    %49 = vector.extract_strided_slice %1 {offsets = [6, 0], sizes = [20, 8], strides = [1, 1]} : vector<33x8xbf16> to vector<20x8xbf16>
    %c8 = arith.constant 8 : index
    %c0_40 = arith.constant 0 : index
    %c0_41 = arith.constant 0 : index
    %50 = vector.load %arg2[%c8, %c0_40, %c0_41] : memref<9x8x16xbf16, #tpu.memory_space<vmem>>, vector<1x8x16xbf16>
    %51 = vector.shape_cast %50 : vector<1x8x16xbf16> to vector<8x16xbf16>
    %cst_42 = arith.constant dense<0.000000e+00> : vector<20x16xf32>
    %52 = tpu.matmul %49, %51, %cst_42 {dimension_numbers = #tpu.dot_dimension_numbers<[1], [0], [0], [1], [0, 0, 1, 1], [], []>} : vector<20x8xbf16>, vector<8x16xbf16>, vector<20x16xf32> -> vector<20x16xf32>
    %53 = arith.addf %48, %52 : vector<20x16xf32>
    %cst_43 = arith.constant 0.000000e+00 : f32
    %54 = vector.broadcast %cst_43 : f32 to vector<20x16xf32>
    %55 = vector.extract_strided_slice %3 {offsets = [0, 0], sizes = [20, 8], strides = [1, 1]} : vector<33x8xbf16> to vector<20x8xbf16>
    %c0_44 = arith.constant 0 : index
    %c0_45 = arith.constant 0 : index
    %c0_46 = arith.constant 0 : index
    %56 = vector.load %arg2[%c0_44, %c0_45, %c0_46] : memref<9x8x16xbf16, #tpu.memory_space<vmem>>, vector<1x8x16xbf16>
    %57 = vector.shape_cast %56 : vector<1x8x16xbf16> to vector<8x16xbf16>
    %cst_47 = arith.constant dense<0.000000e+00> : vector<20x16xf32>
    %58 = tpu.matmul %55, %57, %cst_47 {dimension_numbers = #tpu.dot_dimension_numbers<[1], [0], [0], [1], [0, 0, 1, 1], [], []>} : vector<20x8xbf16>, vector<8x16xbf16>, vector<20x16xf32> -> vector<20x16xf32>
    %59 = arith.addf %54, %58 : vector<20x16xf32>
    %60 = vector.extract_strided_slice %1 {offsets = [1, 0], sizes = [20, 8], strides = [1, 1]} : vector<33x8xbf16> to vector<20x8xbf16>
    %c1_48 = arith.constant 1 : index
    %c0_49 = arith.constant 0 : index
    %c0_50 = arith.constant 0 : index
    %61 = vector.load %arg2[%c1_48, %c0_49, %c0_50] : memref<9x8x16xbf16, #tpu.memory_space<vmem>>, vector<1x8x16xbf16>
    %62 = vector.shape_cast %61 : vector<1x8x16xbf16> to vector<8x16xbf16>
    %cst_51 = arith.constant dense<0.000000e+00> : vector<20x16xf32>
    %63 = tpu.matmul %60, %62, %cst_51 {dimension_numbers = #tpu.dot_dimension_numbers<[1], [0], [0], [1], [0, 0, 1, 1], [], []>} : vector<20x8xbf16>, vector<8x16xbf16>, vector<20x16xf32> -> vector<20x16xf32>
    %64 = arith.addf %59, %63 : vector<20x16xf32>
    %65 = vector.extract_strided_slice %3 {offsets = [1, 0], sizes = [20, 8], strides = [1, 1]} : vector<33x8xbf16> to vector<20x8xbf16>
    %c2_52 = arith.constant 2 : index
    %c0_53 = arith.constant 0 : index
    %c0_54 = arith.constant 0 : index
    %66 = vector.load %arg2[%c2_52, %c0_53, %c0_54] : memref<9x8x16xbf16, #tpu.memory_space<vmem>>, vector<1x8x16xbf16>
    %67 = vector.shape_cast %66 : vector<1x8x16xbf16> to vector<8x16xbf16>
    %cst_55 = arith.constant dense<0.000000e+00> : vector<20x16xf32>
    %68 = tpu.matmul %65, %67, %cst_55 {dimension_numbers = #tpu.dot_dimension_numbers<[1], [0], [0], [1], [0, 0, 1, 1], [], []>} : vector<20x8xbf16>, vector<8x16xbf16>, vector<20x16xf32> -> vector<20x16xf32>
    %69 = arith.addf %64, %68 : vector<20x16xf32>
    %70 = vector.extract_strided_slice %7 {offsets = [0, 0], sizes = [20, 8], strides = [1, 1]} : vector<33x8xbf16> to vector<20x8xbf16>
    %c3_56 = arith.constant 3 : index
    %c0_57 = arith.constant 0 : index
    %c0_58 = arith.constant 0 : index
    %71 = vector.load %arg2[%c3_56, %c0_57, %c0_58] : memref<9x8x16xbf16, #tpu.memory_space<vmem>>, vector<1x8x16xbf16>
    %72 = vector.shape_cast %71 : vector<1x8x16xbf16> to vector<8x16xbf16>
    %cst_59 = arith.constant dense<0.000000e+00> : vector<20x16xf32>
    %73 = tpu.matmul %70, %72, %cst_59 {dimension_numbers = #tpu.dot_dimension_numbers<[1], [0], [0], [1], [0, 0, 1, 1], [], []>} : vector<20x8xbf16>, vector<8x16xbf16>, vector<20x16xf32> -> vector<20x16xf32>
    %74 = arith.addf %69, %73 : vector<20x16xf32>
    %75 = vector.extract_strided_slice %5 {offsets = [1, 0], sizes = [20, 8], strides = [1, 1]} : vector<33x8xbf16> to vector<20x8xbf16>
    %c4_60 = arith.constant 4 : index
    %c0_61 = arith.constant 0 : index
    %c0_62 = arith.constant 0 : index
    %76 = vector.load %arg2[%c4_60, %c0_61, %c0_62] : memref<9x8x16xbf16, #tpu.memory_space<vmem>>, vector<1x8x16xbf16>
    %77 = vector.shape_cast %76 : vector<1x8x16xbf16> to vector<8x16xbf16>
    %cst_63 = arith.constant dense<0.000000e+00> : vector<20x16xf32>
    %78 = tpu.matmul %75, %77, %cst_63 {dimension_numbers = #tpu.dot_dimension_numbers<[1], [0], [0], [1], [0, 0, 1, 1], [], []>} : vector<20x8xbf16>, vector<8x16xbf16>, vector<20x16xf32> -> vector<20x16xf32>
    %79 = arith.addf %74, %78 : vector<20x16xf32>
    %80 = vector.extract_strided_slice %7 {offsets = [1, 0], sizes = [20, 8], strides = [1, 1]} : vector<33x8xbf16> to vector<20x8xbf16>
    %c5_64 = arith.constant 5 : index
    %c0_65 = arith.constant 0 : index
    %c0_66 = arith.constant 0 : index
    %81 = vector.load %arg2[%c5_64, %c0_65, %c0_66] : memref<9x8x16xbf16, #tpu.memory_space<vmem>>, vector<1x8x16xbf16>
    %82 = vector.shape_cast %81 : vector<1x8x16xbf16> to vector<8x16xbf16>
    %cst_67 = arith.constant dense<0.000000e+00> : vector<20x16xf32>
    %83 = tpu.matmul %80, %82, %cst_67 {dimension_numbers = #tpu.dot_dimension_numbers<[1], [0], [0], [1], [0, 0, 1, 1], [], []>} : vector<20x8xbf16>, vector<8x16xbf16>, vector<20x16xf32> -> vector<20x16xf32>
    %84 = arith.addf %79, %83 : vector<20x16xf32>
    %85 = vector.extract_strided_slice %3 {offsets = [5, 0], sizes = [20, 8], strides = [1, 1]} : vector<33x8xbf16> to vector<20x8xbf16>
    %c6_68 = arith.constant 6 : index
    %c0_69 = arith.constant 0 : index
    %c0_70 = arith.constant 0 : index
    %86 = vector.load %arg2[%c6_68, %c0_69, %c0_70] : memref<9x8x16xbf16, #tpu.memory_space<vmem>>, vector<1x8x16xbf16>
    %87 = vector.shape_cast %86 : vector<1x8x16xbf16> to vector<8x16xbf16>
    %cst_71 = arith.constant dense<0.000000e+00> : vector<20x16xf32>
    %88 = tpu.matmul %85, %87, %cst_71 {dimension_numbers = #tpu.dot_dimension_numbers<[1], [0], [0], [1], [0, 0, 1, 1], [], []>} : vector<20x8xbf16>, vector<8x16xbf16>, vector<20x16xf32> -> vector<20x16xf32>
    %89 = arith.addf %84, %88 : vector<20x16xf32>
    %90 = vector.extract_strided_slice %1 {offsets = [6, 0], sizes = [20, 8], strides = [1, 1]} : vector<33x8xbf16> to vector<20x8xbf16>
    %c7_72 = arith.constant 7 : index
    %c0_73 = arith.constant 0 : index
    %c0_74 = arith.constant 0 : index
    %91 = vector.load %arg2[%c7_72, %c0_73, %c0_74] : memref<9x8x16xbf16, #tpu.memory_space<vmem>>, vector<1x8x16xbf16>
    %92 = vector.shape_cast %91 : vector<1x8x16xbf16> to vector<8x16xbf16>
    %cst_75 = arith.constant dense<0.000000e+00> : vector<20x16xf32>
    %93 = tpu.matmul %90, %92, %cst_75 {dimension_numbers = #tpu.dot_dimension_numbers<[1], [0], [0], [1], [0, 0, 1, 1], [], []>} : vector<20x8xbf16>, vector<8x16xbf16>, vector<20x16xf32> -> vector<20x16xf32>
    %94 = arith.addf %89, %93 : vector<20x16xf32>
    %95 = vector.extract_strided_slice %3 {offsets = [6, 0], sizes = [20, 8], strides = [1, 1]} : vector<33x8xbf16> to vector<20x8xbf16>
    %c8_76 = arith.constant 8 : index
    %c0_77 = arith.constant 0 : index
    %c0_78 = arith.constant 0 : index
    %96 = vector.load %arg2[%c8_76, %c0_77, %c0_78] : memref<9x8x16xbf16, #tpu.memory_space<vmem>>, vector<1x8x16xbf16>
    %97 = vector.shape_cast %96 : vector<1x8x16xbf16> to vector<8x16xbf16>
    %cst_79 = arith.constant dense<0.000000e+00> : vector<20x16xf32>
    %98 = tpu.matmul %95, %97, %cst_79 {dimension_numbers = #tpu.dot_dimension_numbers<[1], [0], [0], [1], [0, 0, 1, 1], [], []>} : vector<20x8xbf16>, vector<8x16xbf16>, vector<20x16xf32> -> vector<20x16xf32>
    %99 = arith.addf %94, %98 : vector<20x16xf32>
    %100 = arith.maximumf %53, %99 : vector<20x16xf32>
    %cst_80 = arith.constant 0.000000e+00 : f32
    %101 = vector.broadcast %cst_80 : f32 to vector<20x16xf32>
    %102 = vector.extract_strided_slice %5 {offsets = [0, 0], sizes = [20, 8], strides = [1, 1]} : vector<33x8xbf16> to vector<20x8xbf16>
    %c0_81 = arith.constant 0 : index
    %c0_82 = arith.constant 0 : index
    %c0_83 = arith.constant 0 : index
    %103 = vector.load %arg2[%c0_81, %c0_82, %c0_83] : memref<9x8x16xbf16, #tpu.memory_space<vmem>>, vector<1x8x16xbf16>
    %104 = vector.shape_cast %103 : vector<1x8x16xbf16> to vector<8x16xbf16>
    %cst_84 = arith.constant dense<0.000000e+00> : vector<20x16xf32>
    %105 = tpu.matmul %102, %104, %cst_84 {dimension_numbers = #tpu.dot_dimension_numbers<[1], [0], [0], [1], [0, 0, 1, 1], [], []>} : vector<20x8xbf16>, vector<8x16xbf16>, vector<20x16xf32> -> vector<20x16xf32>
    %106 = arith.addf %101, %105 : vector<20x16xf32>
    %107 = vector.extract_strided_slice %7 {offsets = [0, 0], sizes = [20, 8], strides = [1, 1]} : vector<33x8xbf16> to vector<20x8xbf16>
    %c1_85 = arith.constant 1 : index
    %c0_86 = arith.constant 0 : index
    %c0_87 = arith.constant 0 : index
    %108 = vector.load %arg2[%c1_85, %c0_86, %c0_87] : memref<9x8x16xbf16, #tpu.memory_space<vmem>>, vector<1x8x16xbf16>
    %109 = vector.shape_cast %108 : vector<1x8x16xbf16> to vector<8x16xbf16>
    %cst_88 = arith.constant dense<0.000000e+00> : vector<20x16xf32>
    %110 = tpu.matmul %107, %109, %cst_88 {dimension_numbers = #tpu.dot_dimension_numbers<[1], [0], [0], [1], [0, 0, 1, 1], [], []>} : vector<20x8xbf16>, vector<8x16xbf16>, vector<20x16xf32> -> vector<20x16xf32>
    %111 = arith.addf %106, %110 : vector<20x16xf32>
    %112 = vector.extract_strided_slice %5 {offsets = [1, 0], sizes = [20, 8], strides = [1, 1]} : vector<33x8xbf16> to vector<20x8xbf16>
    %c2_89 = arith.constant 2 : index
    %c0_90 = arith.constant 0 : index
    %c0_91 = arith.constant 0 : index
    %113 = vector.load %arg2[%c2_89, %c0_90, %c0_91] : memref<9x8x16xbf16, #tpu.memory_space<vmem>>, vector<1x8x16xbf16>
    %114 = vector.shape_cast %113 : vector<1x8x16xbf16> to vector<8x16xbf16>
    %cst_92 = arith.constant dense<0.000000e+00> : vector<20x16xf32>
    %115 = tpu.matmul %112, %114, %cst_92 {dimension_numbers = #tpu.dot_dimension_numbers<[1], [0], [0], [1], [0, 0, 1, 1], [], []>} : vector<20x8xbf16>, vector<8x16xbf16>, vector<20x16xf32> -> vector<20x16xf32>
    %116 = arith.addf %111, %115 : vector<20x16xf32>
    %117 = vector.extract_strided_slice %1 {offsets = [5, 0], sizes = [20, 8], strides = [1, 1]} : vector<33x8xbf16> to vector<20x8xbf16>
    %c3_93 = arith.constant 3 : index
    %c0_94 = arith.constant 0 : index
    %c0_95 = arith.constant 0 : index
    %118 = vector.load %arg2[%c3_93, %c0_94, %c0_95] : memref<9x8x16xbf16, #tpu.memory_space<vmem>>, vector<1x8x16xbf16>
    %119 = vector.shape_cast %118 : vector<1x8x16xbf16> to vector<8x16xbf16>
    %cst_96 = arith.constant dense<0.000000e+00> : vector<20x16xf32>
    %120 = tpu.matmul %117, %119, %cst_96 {dimension_numbers = #tpu.dot_dimension_numbers<[1], [0], [0], [1], [0, 0, 1, 1], [], []>} : vector<20x8xbf16>, vector<8x16xbf16>, vector<20x16xf32> -> vector<20x16xf32>
    %121 = arith.addf %116, %120 : vector<20x16xf32>
    %122 = vector.extract_strided_slice %3 {offsets = [5, 0], sizes = [20, 8], strides = [1, 1]} : vector<33x8xbf16> to vector<20x8xbf16>
    %c4_97 = arith.constant 4 : index
    %c0_98 = arith.constant 0 : index
    %c0_99 = arith.constant 0 : index
    %123 = vector.load %arg2[%c4_97, %c0_98, %c0_99] : memref<9x8x16xbf16, #tpu.memory_space<vmem>>, vector<1x8x16xbf16>
    %124 = vector.shape_cast %123 : vector<1x8x16xbf16> to vector<8x16xbf16>
    %cst_100 = arith.constant dense<0.000000e+00> : vector<20x16xf32>
    %125 = tpu.matmul %122, %124, %cst_100 {dimension_numbers = #tpu.dot_dimension_numbers<[1], [0], [0], [1], [0, 0, 1, 1], [], []>} : vector<20x8xbf16>, vector<8x16xbf16>, vector<20x16xf32> -> vector<20x16xf32>
    %126 = arith.addf %121, %125 : vector<20x16xf32>
    %127 = vector.extract_strided_slice %1 {offsets = [6, 0], sizes = [20, 8], strides = [1, 1]} : vector<33x8xbf16> to vector<20x8xbf16>
    %c5_101 = arith.constant 5 : index
    %c0_102 = arith.constant 0 : index
    %c0_103 = arith.constant 0 : index
    %128 = vector.load %arg2[%c5_101, %c0_102, %c0_103] : memref<9x8x16xbf16, #tpu.memory_space<vmem>>, vector<1x8x16xbf16>
    %129 = vector.shape_cast %128 : vector<1x8x16xbf16> to vector<8x16xbf16>
    %cst_104 = arith.constant dense<0.000000e+00> : vector<20x16xf32>
    %130 = tpu.matmul %127, %129, %cst_104 {dimension_numbers = #tpu.dot_dimension_numbers<[1], [0], [0], [1], [0, 0, 1, 1], [], []>} : vector<20x8xbf16>, vector<8x16xbf16>, vector<20x16xf32> -> vector<20x16xf32>
    %131 = arith.addf %126, %130 : vector<20x16xf32>
    %132 = vector.extract_strided_slice %5 {offsets = [5, 0], sizes = [20, 8], strides = [1, 1]} : vector<33x8xbf16> to vector<20x8xbf16>
    %c6_105 = arith.constant 6 : index
    %c0_106 = arith.constant 0 : index
    %c0_107 = arith.constant 0 : index
    %133 = vector.load %arg2[%c6_105, %c0_106, %c0_107] : memref<9x8x16xbf16, #tpu.memory_space<vmem>>, vector<1x8x16xbf16>
    %134 = vector.shape_cast %133 : vector<1x8x16xbf16> to vector<8x16xbf16>
    %cst_108 = arith.constant dense<0.000000e+00> : vector<20x16xf32>
    %135 = tpu.matmul %132, %134, %cst_108 {dimension_numbers = #tpu.dot_dimension_numbers<[1], [0], [0], [1], [0, 0, 1, 1], [], []>} : vector<20x8xbf16>, vector<8x16xbf16>, vector<20x16xf32> -> vector<20x16xf32>
    %136 = arith.addf %131, %135 : vector<20x16xf32>
    %137 = vector.extract_strided_slice %7 {offsets = [5, 0], sizes = [20, 8], strides = [1, 1]} : vector<33x8xbf16> to vector<20x8xbf16>
    %c7_109 = arith.constant 7 : index
    %c0_110 = arith.constant 0 : index
    %c0_111 = arith.constant 0 : index
    %138 = vector.load %arg2[%c7_109, %c0_110, %c0_111] : memref<9x8x16xbf16, #tpu.memory_space<vmem>>, vector<1x8x16xbf16>
    %139 = vector.shape_cast %138 : vector<1x8x16xbf16> to vector<8x16xbf16>
    %cst_112 = arith.constant dense<0.000000e+00> : vector<20x16xf32>
    %140 = tpu.matmul %137, %139, %cst_112 {dimension_numbers = #tpu.dot_dimension_numbers<[1], [0], [0], [1], [0, 0, 1, 1], [], []>} : vector<20x8xbf16>, vector<8x16xbf16>, vector<20x16xf32> -> vector<20x16xf32>
    %141 = arith.addf %136, %140 : vector<20x16xf32>
    %142 = vector.extract_strided_slice %5 {offsets = [6, 0], sizes = [20, 8], strides = [1, 1]} : vector<33x8xbf16> to vector<20x8xbf16>
    %c8_113 = arith.constant 8 : index
    %c0_114 = arith.constant 0 : index
    %c0_115 = arith.constant 0 : index
    %143 = vector.load %arg2[%c8_113, %c0_114, %c0_115] : memref<9x8x16xbf16, #tpu.memory_space<vmem>>, vector<1x8x16xbf16>
    %144 = vector.shape_cast %143 : vector<1x8x16xbf16> to vector<8x16xbf16>
    %cst_116 = arith.constant dense<0.000000e+00> : vector<20x16xf32>
    %145 = tpu.matmul %142, %144, %cst_116 {dimension_numbers = #tpu.dot_dimension_numbers<[1], [0], [0], [1], [0, 0, 1, 1], [], []>} : vector<20x8xbf16>, vector<8x16xbf16>, vector<20x16xf32> -> vector<20x16xf32>
    %146 = arith.addf %141, %145 : vector<20x16xf32>
    %147 = arith.maximumf %100, %146 : vector<20x16xf32>
    %cst_117 = arith.constant 0.000000e+00 : f32
    %148 = vector.broadcast %cst_117 : f32 to vector<20x16xf32>
    %149 = vector.extract_strided_slice %7 {offsets = [0, 0], sizes = [20, 8], strides = [1, 1]} : vector<33x8xbf16> to vector<20x8xbf16>
    %c0_118 = arith.constant 0 : index
    %c0_119 = arith.constant 0 : index
    %c0_120 = arith.constant 0 : index
    %150 = vector.load %arg2[%c0_118, %c0_119, %c0_120] : memref<9x8x16xbf16, #tpu.memory_space<vmem>>, vector<1x8x16xbf16>
    %151 = vector.shape_cast %150 : vector<1x8x16xbf16> to vector<8x16xbf16>
    %cst_121 = arith.constant dense<0.000000e+00> : vector<20x16xf32>
    %152 = tpu.matmul %149, %151, %cst_121 {dimension_numbers = #tpu.dot_dimension_numbers<[1], [0], [0], [1], [0, 0, 1, 1], [], []>} : vector<20x8xbf16>, vector<8x16xbf16>, vector<20x16xf32> -> vector<20x16xf32>
    %153 = arith.addf %148, %152 : vector<20x16xf32>
    %154 = vector.extract_strided_slice %5 {offsets = [1, 0], sizes = [20, 8], strides = [1, 1]} : vector<33x8xbf16> to vector<20x8xbf16>
    %c1_122 = arith.constant 1 : index
    %c0_123 = arith.constant 0 : index
    %c0_124 = arith.constant 0 : index
    %155 = vector.load %arg2[%c1_122, %c0_123, %c0_124] : memref<9x8x16xbf16, #tpu.memory_space<vmem>>, vector<1x8x16xbf16>
    %156 = vector.shape_cast %155 : vector<1x8x16xbf16> to vector<8x16xbf16>
    %cst_125 = arith.constant dense<0.000000e+00> : vector<20x16xf32>
    %157 = tpu.matmul %154, %156, %cst_125 {dimension_numbers = #tpu.dot_dimension_numbers<[1], [0], [0], [1], [0, 0, 1, 1], [], []>} : vector<20x8xbf16>, vector<8x16xbf16>, vector<20x16xf32> -> vector<20x16xf32>
    %158 = arith.addf %153, %157 : vector<20x16xf32>
    %159 = vector.extract_strided_slice %7 {offsets = [1, 0], sizes = [20, 8], strides = [1, 1]} : vector<33x8xbf16> to vector<20x8xbf16>
    %c2_126 = arith.constant 2 : index
    %c0_127 = arith.constant 0 : index
    %c0_128 = arith.constant 0 : index
    %160 = vector.load %arg2[%c2_126, %c0_127, %c0_128] : memref<9x8x16xbf16, #tpu.memory_space<vmem>>, vector<1x8x16xbf16>
    %161 = vector.shape_cast %160 : vector<1x8x16xbf16> to vector<8x16xbf16>
    %cst_129 = arith.constant dense<0.000000e+00> : vector<20x16xf32>
    %162 = tpu.matmul %159, %161, %cst_129 {dimension_numbers = #tpu.dot_dimension_numbers<[1], [0], [0], [1], [0, 0, 1, 1], [], []>} : vector<20x8xbf16>, vector<8x16xbf16>, vector<20x16xf32> -> vector<20x16xf32>
    %163 = arith.addf %158, %162 : vector<20x16xf32>
    %164 = vector.extract_strided_slice %3 {offsets = [5, 0], sizes = [20, 8], strides = [1, 1]} : vector<33x8xbf16> to vector<20x8xbf16>
    %c3_130 = arith.constant 3 : index
    %c0_131 = arith.constant 0 : index
    %c0_132 = arith.constant 0 : index
    %165 = vector.load %arg2[%c3_130, %c0_131, %c0_132] : memref<9x8x16xbf16, #tpu.memory_space<vmem>>, vector<1x8x16xbf16>
    %166 = vector.shape_cast %165 : vector<1x8x16xbf16> to vector<8x16xbf16>
    %cst_133 = arith.constant dense<0.000000e+00> : vector<20x16xf32>
    %167 = tpu.matmul %164, %166, %cst_133 {dimension_numbers = #tpu.dot_dimension_numbers<[1], [0], [0], [1], [0, 0, 1, 1], [], []>} : vector<20x8xbf16>, vector<8x16xbf16>, vector<20x16xf32> -> vector<20x16xf32>
    %168 = arith.addf %163, %167 : vector<20x16xf32>
    %169 = vector.extract_strided_slice %1 {offsets = [6, 0], sizes = [20, 8], strides = [1, 1]} : vector<33x8xbf16> to vector<20x8xbf16>
    %c4_134 = arith.constant 4 : index
    %c0_135 = arith.constant 0 : index
    %c0_136 = arith.constant 0 : index
    %170 = vector.load %arg2[%c4_134, %c0_135, %c0_136] : memref<9x8x16xbf16, #tpu.memory_space<vmem>>, vector<1x8x16xbf16>
    %171 = vector.shape_cast %170 : vector<1x8x16xbf16> to vector<8x16xbf16>
    %cst_137 = arith.constant dense<0.000000e+00> : vector<20x16xf32>
    %172 = tpu.matmul %169, %171, %cst_137 {dimension_numbers = #tpu.dot_dimension_numbers<[1], [0], [0], [1], [0, 0, 1, 1], [], []>} : vector<20x8xbf16>, vector<8x16xbf16>, vector<20x16xf32> -> vector<20x16xf32>
    %173 = arith.addf %168, %172 : vector<20x16xf32>
    %174 = vector.extract_strided_slice %3 {offsets = [6, 0], sizes = [20, 8], strides = [1, 1]} : vector<33x8xbf16> to vector<20x8xbf16>
    %c5_138 = arith.constant 5 : index
    %c0_139 = arith.constant 0 : index
    %c0_140 = arith.constant 0 : index
    %175 = vector.load %arg2[%c5_138, %c0_139, %c0_140] : memref<9x8x16xbf16, #tpu.memory_space<vmem>>, vector<1x8x16xbf16>
    %176 = vector.shape_cast %175 : vector<1x8x16xbf16> to vector<8x16xbf16>
    %cst_141 = arith.constant dense<0.000000e+00> : vector<20x16xf32>
    %177 = tpu.matmul %174, %176, %cst_141 {dimension_numbers = #tpu.dot_dimension_numbers<[1], [0], [0], [1], [0, 0, 1, 1], [], []>} : vector<20x8xbf16>, vector<8x16xbf16>, vector<20x16xf32> -> vector<20x16xf32>
    %178 = arith.addf %173, %177 : vector<20x16xf32>
    %179 = vector.extract_strided_slice %7 {offsets = [5, 0], sizes = [20, 8], strides = [1, 1]} : vector<33x8xbf16> to vector<20x8xbf16>
    %c6_142 = arith.constant 6 : index
    %c0_143 = arith.constant 0 : index
    %c0_144 = arith.constant 0 : index
    %180 = vector.load %arg2[%c6_142, %c0_143, %c0_144] : memref<9x8x16xbf16, #tpu.memory_space<vmem>>, vector<1x8x16xbf16>
    %181 = vector.shape_cast %180 : vector<1x8x16xbf16> to vector<8x16xbf16>
    %cst_145 = arith.constant dense<0.000000e+00> : vector<20x16xf32>
    %182 = tpu.matmul %179, %181, %cst_145 {dimension_numbers = #tpu.dot_dimension_numbers<[1], [0], [0], [1], [0, 0, 1, 1], [], []>} : vector<20x8xbf16>, vector<8x16xbf16>, vector<20x16xf32> -> vector<20x16xf32>
    %183 = arith.addf %178, %182 : vector<20x16xf32>
    %184 = vector.extract_strided_slice %5 {offsets = [6, 0], sizes = [20, 8], strides = [1, 1]} : vector<33x8xbf16> to vector<20x8xbf16>
    %c7_146 = arith.constant 7 : index
    %c0_147 = arith.constant 0 : index
    %c0_148 = arith.constant 0 : index
    %185 = vector.load %arg2[%c7_146, %c0_147, %c0_148] : memref<9x8x16xbf16, #tpu.memory_space<vmem>>, vector<1x8x16xbf16>
    %186 = vector.shape_cast %185 : vector<1x8x16xbf16> to vector<8x16xbf16>
    %cst_149 = arith.constant dense<0.000000e+00> : vector<20x16xf32>
    %187 = tpu.matmul %184, %186, %cst_149 {dimension_numbers = #tpu.dot_dimension_numbers<[1], [0], [0], [1], [0, 0, 1, 1], [], []>} : vector<20x8xbf16>, vector<8x16xbf16>, vector<20x16xf32> -> vector<20x16xf32>
    %188 = arith.addf %183, %187 : vector<20x16xf32>
    %189 = vector.extract_strided_slice %7 {offsets = [6, 0], sizes = [20, 8], strides = [1, 1]} : vector<33x8xbf16> to vector<20x8xbf16>
    %c8_150 = arith.constant 8 : index
    %c0_151 = arith.constant 0 : index
    %c0_152 = arith.constant 0 : index
    %190 = vector.load %arg2[%c8_150, %c0_151, %c0_152] : memref<9x8x16xbf16, #tpu.memory_space<vmem>>, vector<1x8x16xbf16>
    %191 = vector.shape_cast %190 : vector<1x8x16xbf16> to vector<8x16xbf16>
    %cst_153 = arith.constant dense<0.000000e+00> : vector<20x16xf32>
    %192 = tpu.matmul %189, %191, %cst_153 {dimension_numbers = #tpu.dot_dimension_numbers<[1], [0], [0], [1], [0, 0, 1, 1], [], []>} : vector<20x8xbf16>, vector<8x16xbf16>, vector<20x16xf32> -> vector<20x16xf32>
    %193 = arith.addf %188, %192 : vector<20x16xf32>
    %194 = arith.maximumf %147, %193 : vector<20x16xf32>
    %c0_154 = arith.constant 0 : index
    %c0_155 = arith.constant 0 : index
    %195 = vector.load %arg3[%c0_154, %c0_155] : memref<1x16xf32, #tpu.memory_space<vmem>>, vector<1x16xf32>
    %196 = vector.broadcast %195 : vector<1x16xf32> to vector<20x16xf32>
    %197 = arith.addf %194, %196 : vector<20x16xf32>
    %cst_156 = arith.constant 0.000000e+00 : f32
    %198 = vector.broadcast %cst_156 : f32 to vector<20x16xf32>
    %199 = arith.maximumf %197, %198 : vector<20x16xf32>
    %200 = arith.truncf %199 : vector<20x16xf32> to vector<20x16xbf16>
    %c0_157 = arith.constant 0 : index
    %c0_158 = arith.constant 0 : index
    %c0_159 = arith.constant 0 : index
    %201 = vector.load %arg4[%c0_157, %c0_158, %c0_159] : memref<1x20x16xbf16, #tpu.memory_space<vmem>>, vector<1x20x16xbf16>
    %202 = vector.shape_cast %201 : vector<1x20x16xbf16> to vector<20x16xbf16>
    %203 = vector.shape_cast %200 : vector<20x16xbf16> to vector<1x20x16xbf16>
    tpu.vector_store %arg4[%c0_157, %c0_158, %c0_159], %203 {strides = array<i32>} : memref<1x20x16xbf16, #tpu.memory_space<vmem>>, vector<1x20x16xbf16>,
    return
  }
  func.func @transform_0(%arg0: i32) -> (i32, i32, i32, i32) {
    %c0_i32 = arith.constant 0 : i32
    %c0_i32_0 = arith.constant 0 : i32
    %c0_i32_1 = arith.constant 0 : i32
    %c0_i32_2 = arith.constant 0 : i32
    return %arg0, %c0_i32, %c0_i32_0, %c0_i32_1 : i32, i32, i32, i32
  }
  func.func @transform_1(%arg0: i32) -> (i32, i32, i32) {
    %c0_i32 = arith.constant 0 : i32
    %c0_i32_0 = arith.constant 0 : i32
    %c0_i32_1 = arith.constant 0 : i32
    %c0_i32_2 = arith.constant 0 : i32
    return %c0_i32, %c0_i32_0, %c0_i32_1 : i32, i32, i32
  }
  func.func @transform_2(%arg0: i32) -> (i32, i32) {
    %c0_i32 = arith.constant 0 : i32
    %c0_i32_0 = arith.constant 0 : i32
    %c0_i32_1 = arith.constant 0 : i32
    return %c0_i32, %c0_i32_0 : i32, i32
  }
  func.func @transform_3(%arg0: i32) -> (i32, i32, i32) {
    %c0_i32 = arith.constant 0 : i32
    %c0_i32_0 = arith.constant 0 : i32
    %c0_i32_1 = arith.constant 0 : i32
    return %arg0, %c0_i32, %c0_i32_0 : i32, i32, i32
  }
}

module attributes {stable_mosaic.version = 11 : i64} {
  func.func @_fc_tail_kernel(%arg0: memref<4x256xbf16, #tpu.memory_space<vmem>>, %arg1: memref<256x64xbf16, #tpu.memory_space<vmem>>, %arg2: memref<1x64xf32, #tpu.memory_space<vmem>>, %arg3: memref<64x32xbf16, #tpu.memory_space<vmem>>, %arg4: memref<1x32xf32, #tpu.memory_space<vmem>>, %arg5: memref<4x32xf32, #tpu.memory_space<vmem>>) attributes {dimension_semantics = [], scalar_prefetch = 0 : i64, scratch_operands = 0 : i64, tpu.core_type = #tpu.core_type<tc>} {
    %c0 = arith.constant 0 : index
    %c0_0 = arith.constant 0 : index
    %0 = vector.load %arg0[%c0, %c0_0] : memref<4x256xbf16, #tpu.memory_space<vmem>>, vector<4x256xbf16>
    %c0_1 = arith.constant 0 : index
    %c0_2 = arith.constant 0 : index
    %1 = vector.load %arg1[%c0_1, %c0_2] : memref<256x64xbf16, #tpu.memory_space<vmem>>, vector<256x64xbf16>
    %cst = arith.constant dense<0.000000e+00> : vector<4x64xf32>
    %2 = tpu.matmul %0, %1, %cst {dimension_numbers = #tpu.dot_dimension_numbers<[1], [0], [0], [1], [0, 0, 1, 1], [], []>} : vector<4x256xbf16>, vector<256x64xbf16>, vector<4x64xf32> -> vector<4x64xf32>
    %c0_3 = arith.constant 0 : index
    %c0_4 = arith.constant 0 : index
    %3 = vector.load %arg2[%c0_3, %c0_4] : memref<1x64xf32, #tpu.memory_space<vmem>>, vector<1x64xf32>
    %4 = vector.broadcast %3 : vector<1x64xf32> to vector<4x64xf32>
    %5 = arith.addf %2, %4 : vector<4x64xf32>
    %cst_5 = arith.constant 0.000000e+00 : f32
    %6 = vector.broadcast %cst_5 : f32 to vector<4x64xf32>
    %7 = arith.maximumf %5, %6 : vector<4x64xf32>
    %8 = arith.truncf %7 : vector<4x64xf32> to vector<4x64xbf16>
    %c0_6 = arith.constant 0 : index
    %c0_7 = arith.constant 0 : index
    %9 = vector.load %arg3[%c0_6, %c0_7] : memref<64x32xbf16, #tpu.memory_space<vmem>>, vector<64x32xbf16>
    %cst_8 = arith.constant dense<0.000000e+00> : vector<4x32xf32>
    %10 = tpu.matmul %8, %9, %cst_8 {dimension_numbers = #tpu.dot_dimension_numbers<[1], [0], [0], [1], [0, 0, 1, 1], [], []>} : vector<4x64xbf16>, vector<64x32xbf16>, vector<4x32xf32> -> vector<4x32xf32>
    %c0_9 = arith.constant 0 : index
    %c0_10 = arith.constant 0 : index
    %11 = vector.load %arg4[%c0_9, %c0_10] : memref<1x32xf32, #tpu.memory_space<vmem>>, vector<1x32xf32>
    %12 = vector.broadcast %11 : vector<1x32xf32> to vector<4x32xf32>
    %13 = arith.addf %10, %12 : vector<4x32xf32>
    %14 = arith.mulf %13, %13 : vector<4x32xf32>
    %cst_11 = arith.constant dense<0.000000e+00> : vector<4xf32>
    %15 = vector.multi_reduction <add>, %14, %cst_11 [1] : vector<4x32xf32> to vector<4xf32>
    %16 = vector.shape_cast %15 : vector<4xf32> to vector<4x1xf32>
    %cst_12 = arith.constant 1.000000e-24 : f32
    %17 = vector.broadcast %cst_12 : f32 to vector<4x1xf32>
    %18 = arith.maximumf %16, %17 : vector<4x1xf32>
    %19 = math.rsqrt %18 : vector<4x1xf32>
    %20 = vector.broadcast %19 : vector<4x1xf32> to vector<4x32xf32>
    %21 = arith.mulf %13, %20 : vector<4x32xf32>
    %c0_13 = arith.constant 0 : index
    %c0_14 = arith.constant 0 : index
    %22 = vector.load %arg5[%c0_13, %c0_14] : memref<4x32xf32, #tpu.memory_space<vmem>>, vector<4x32xf32>
    tpu.vector_store %arg5[%c0_13, %c0_14], %21 {strides = array<i32>} : memref<4x32xf32, #tpu.memory_space<vmem>>, vector<4x32xf32>,
    return
  }
}

</mosaic_0001>

<bundles_post_ra>
// kernel: siamese_net.3
= control target key start
LH: loop header
LB: loop body
LE: loop exit
PB: predicated region body
PF: predicated region fallthrough
CT: control target
= control target key end

     0   :  { %s3019_s12 = smov 0   ;;  %s4198_s0 = inlined_call_operand.vmem [shape: bf16[4,4,89,4], index: 0, kind: input, shape index: {}]   ;;  %s4199_s1 = inlined_call_operand.vmem [shape: bf16[9,4,8], index: 1, kind: input, shape index: {}]   ;;  %s4200_s2 = inlined_call_operand.vmem [shape: f32[1,8], index: 2, kind: input, shape index: {}]   ;;  %s4201_s3 = inlined_call_operand.vmem [shape: bf16[4,72,8], index: 3, kind: output, shape index: {}]  }
   0x1 LB: > { %s2534_s13 = sadd.s32 4294967295, %s2997_s12   ;;  %p2538_p0 = scmp.ge.s32.totalorder %s2997_s12, 1  ;;  %s2997_s12 = sphi %s3019_s12, %s13_s12  }
   0x2   : > { %p137_p1 = scmp.lt.s32.totalorder %s2997_s12, 5 }
   0x4   : > { %p138_p2 = pnand %p2538_p0, %p137_p1 }
   0x6   : > { %141 = sbr.rel (%p138_p2) target bundleno = 874 (0x36a), region = 32 }
   0xb   : > { %v2574_v0 = vld [vmem:[%s4199_s1 + $0x2] sm:$0x3]  ;;  %vm261_vm0 = vcmask 1041408   ;;  %v219_v1 = vld [vmem:[%s4199_s1] sm:$0x3]  ;;  %p161_p3 = scmp.lt.s32.totalorder %s2534_s13, 3 }
   0xc   : > { %v3034_v2 = vsel %vm261_vm0, %v2574_v0, 0  ;;  %v3037_v3 = vsel %vm261_vm0, %v219_v1, 0  ;;  %v2591_v4 = vld [vmem:[%s4199_s1 + $0x6] sm:$0x3]  ;;  %v2585_v6 = vld [vmem:[%s4199_s1 + $0x4] sm:$0x3] }
   0xd   : > { %272 = vmatpush.bf16.msra.mxu0 %v3034_v2  ;;  %346 = vmatpush.bf16.msra.mxu1 %v3037_v3  ;;  %v3045_v5 = vsel %vm261_vm0, %v2591_v4, 0  ;;  %s4315_s13 = smov (!%p161_p3, %s2534_s13), 3  ;;  %v3054_v7 = vsel %vm261_vm0, %v2585_v6, 0  ;;  %v2609_v8 = vld [vmem:[%s4199_s1 + $0xc] sm:$0x3]  ;;  %vm245_vm1 = vcmask 31744  }
   0xe   : > { %523 = vmatpush.bf16.msra.mxu3 %v3045_v5  ;;  %v2597_v9 = vld [vmem:[%s4199_s1 + $0x8] sm:$0x3]  ;;  %s2975_s26 = smul.u32 192, %s4315_s13  ;;  %438 = vmatpush.bf16.msra.mxu2 %v3054_v7  ;;  %v3065_v10 = vsel %vm261_vm0, %v2609_v8, 0  ;;  %v2615_v12 = vld [vmem:[%s4199_s1 + $0xe] sm:$0x3] }
   0xf   : > { %4237 = vst [vmem:[#allocation2_spill] sm:$0xff] %v3065_v10  ;;  %v3068_v11 = vsel %vm261_vm0, %v2597_v9, 0  ;;  %v3076_v13 = vsel %vm261_vm0, %v2615_v12, 0  ;;  %v2603_v14 = vld [vmem:[%s4199_s1 + $0xa] sm:$0x3]  ;;  %vm963_vm3 = vcmask 1046528  }
  0x10   : > { %s3084_s6 = scalar_lea.vmem %s4198_s0, %s2975_s26  ;;  %v3088_v15 = vsel %vm261_vm0, %v2603_v14, 0  ;;  %vm377_vm2 = vsmask.f32 7424  ;;  %v2621_v53 = vld [vmem:[%s4199_s1 + $0x10] sm:$0x3]  ;;  %s2976_s11 = smul.u32 36, %s4315_s13 }
  0x11   : > { %608 = vmatpush.bf16.msrb.mxu0 %v3068_v11  ;;  %v3091_v16 = vld [vmem:[%s3084_s6 + $0x30] sm:$0xff]   ;;  %v2765_v17 = vld [vmem:[%s3084_s6] sm:$0xff]   ;;  %708 = vmatpush.bf16.msrb.mxu1 %v3088_v15  ;;  %v2844_v21 = vld [vmem:[%s3084_s6 + $0x8] sm:$0xff]   ;;  %v3183_v56 = vsel %vm261_vm0, %v2621_v53, 0  ;;  %vm2469_vm4 = vcmask 60416  }
  0x12   : > { %816 = vmatpush.bf16.msrb.mxu2 %v3065_v10  ;;  %926 = vmatpush.bf16.msrb.mxu3 %v3076_v13  ;;  %v3095_v18 = vld [vmem:[%s3084_s6 + $0x60] sm:$0xff]   ;;  %v378_v19 = vshrl.u32 %v2765_v17, 16  ;;  %v380_v20 = vshll.u32 %v2765_v17, 16  ;;  %v384_v22 = vshll.u32 %v2844_v21, 16  ;;  %v2845_v27 = vld [vmem:[%s3084_s6 + $0x10] sm:$0xff]   ;;  %v388_v28 = vshrl.u32 %v2844_v21, 16  ;;  %s4152_s16 = scalar_lea.vmem %s4201_s3, %s2976_s11 }
  0x13   : > { %4238 = vst [vmem:[#allocation3_spill] sm:$0xff] %v3095_v18  ;;  %2575 = vmatmul.msk.bf16.vlgmr.msra.gmra.mxu0 %vm245_vm1, %v3091_v16  ;;  %2580 = vmatmul.msk.bf16.vlgmr.msra.gmra.mxu1 %vm245_vm1, %v2765_v17  ;;  %v391_v29 = vshll.u32 %v2845_v27, 16  ;;  %v3114_v30 = vld [vmem:[%s3084_s6 + $0x38] sm:$0xff]   ;;  %v3117_v31 = vld [vmem:[%s3084_s6 + $0x68] sm:$0xff]   ;;  %v395_v36 = vshrl.u32 %v2845_v27, 16  ;;  %v3134_v38 = vld [vmem:[%s3084_s6 + $0x40] sm:$0xff]  }
  0x14   : > { %2592 = vmatmul.msk.bf16.vlgmr.msra.gmra.mxu3 %vm245_vm1, %v3095_v18  ;;  %v382_v23 = vrot.slane %v380_v20, 1  ;;  %v386_v24 = vrot.slane %v384_v22, 1  ;;  %4239 = vst [vmem:[#allocation4_spill] sm:$0xff] %v3117_v31  ;;  %v3130_v35 = vld [vmem:[%s3084_s6 + $0x18] sm:$0xff]   ;;  %v3137_v39 = vld [vmem:[%s3084_s6 + $0x70] sm:$0xff]   ;;  %v2847_v43 = vld [vmem:[%s3084_s6 + $0x20] sm:$0xff]  }
  0x15   : > { %1040 = vmatpush.bf16.msra.mxu1 %v3034_v2  ;;  %v393_v33 = vrot.slane %v391_v29, 1  ;;  %v398_v37 = vshll.u32 %v3130_v35, 16  ;;  %4240 = vst [vmem:[#allocation5_spill] sm:$0xff] %v3137_v39  ;;  %v402_v44 = vshrl.u32 %v3130_v35, 16  ;;  %v406_v45 = vshll.u32 %v2847_v43, 16  ;;  %v3152_v46 = vld [vmem:[%s3084_s6 + $0x48] sm:$0xff]   ;;  %998 = vmatpush.bf16.msra.mxu0 %v3183_v56 }
  0x16   : > { %1157 = vmatpush.bf16.msra.mxu3 %v3054_v7  ;;  %v383_v25 = vor.u32 %v382_v23, %v378_v19  ;;  %v390_v32 = vor.u32 %v388_v28, %v386_v24  ;;  %v3155_v47 = vld [vmem:[%s3084_s6 + $0x78] sm:$0xff]   ;;  %v3167_v51 = vld [vmem:[%s3084_s6 + $0x50] sm:$0xff]   ;;  %v3170_v52 = vld [vmem:[%s3084_s6 + $0x80] sm:$0xff]   ;;  %v3180_v55 = vunpack.c.l.b16 %v2847_v43  ;;  %v410_v62 = vshrl.u32 %v2847_v43, 16 }
  0x17   : > { %v397_v40 = vor.u32 %v395_v36, %v393_v33  ;;  %v400_v41 = vrot.slane %v398_v37, 1  ;;  %4241 = vst [vmem:[#allocation6_spill] sm:$0xff] %v3155_v47  ;;  %v408_v49 = vrot.slane %v406_v45, 1  ;;  %v3178_v54 = vunpack.c.l.b16 %v3167_v51  ;;  %v3200_v61 = vld [vmem:[%s3084_s6 + $0x34] sm:$0xff]   ;;  %v3209_v0 = vld [vmem:[%s3084_s6 + $0x3c] sm:$0xff]   ;;  %v3215_v6 = vld [vmem:[%s3084_s6 + $0x4] sm:$0xff]  }
  0x18   : > { %v3107_v26 = vsel %vm377_vm2, %v383_v25, %v386_v24  ;;  %v3125_v34 = vsel %vm377_vm2, %v390_v32, %v393_v33  ;;  %v3186_v57 = vunpack.c.l.b16 %v3170_v52  ;;  %v320_v59 = vpack.c.b16 %v3180_v55, %v3180_v55  ;;  %v3224_v20 = vld [vmem:[%s3084_s6 + $0xc] sm:$0xff]   ;;  %v3260_v53 = vld [vmem:[%s3084_s6 + $0x14] sm:$0xff]  }
  0x19   : > { %2586 = vmatmul.msk.bf16.vlgmr.msra.gmra.mxu2 %vm245_vm1, %v3107_v26  ;;  %v3145_v42 = vsel %vm377_vm2, %v397_v40, %v400_v41  ;;  %v404_v48 = vor.u32 %v402_v44, %v400_v41  ;;  %v3191_v58 = vpack.c.b16 %v3178_v54, %v3178_v54  ;;  %v650_v63 = vshll.u32 %v3095_v18, 16  ;;  %v3230_v32 = vld [vmem:[%s3084_s6 + $0x90] sm:$0xff]   ;;  %v3246_v41 = vld [vmem:[%s3084_s6 + $0x44] sm:$0xff]  }
  0x1a   : > { %1073 = vmatpush.bf16.msra.mxu2 %v3037_v3  ;;  %4242 = vst [vmem:[#allocation7_spill] sm:$0xff] %v3186_v57  ;;  %v3197_v60 = vpack.c.b16 %v3186_v57, %v3186_v57  ;;  %v865_v1 = vshll.u32 %v3200_v61, 16  ;;  %v3212_v4 = vor.u32 %v410_v62, %v408_v49  ;;  %v648_v8 = vshrl.u32 %v3095_v18, 16  ;;  %v3332_v57 = vld [vmem:[%s3084_s6 + $0xa8] sm:$0xff]  }
  0x1b   : > { %v3164_v50 = vsel %vm377_vm2, %v404_v48, %v408_v49  ;;  %v652_v9 = vrot.slane %v650_v63, 1  ;;  %v654_v12 = vshll.u32 %v3117_v31, 16  ;;  %v863_v14 = vshrl.u32 %v3200_v61, 16  ;;  %4244 = vst [vmem:[#allocation9_spill] sm:$0xff] %v3246_v41 }
  0x1c   : > { %4243 = vst [vmem:[#allocation8_spill] sm:$0xff] %v3197_v60  ;;  %v867_v17 = vrot.slane %v865_v1, 1  ;;  %v870_v19 = vshll.u32 %v3209_v0, 16  ;;  %v760_v29 = vshll.u32 %v3224_v20, 16  ;;  %v658_v44 = vshrl.u32 %v3117_v31, 16 }
  0x1d   : > { %v653_v22 = vor.u32 %v652_v9, %v648_v8  ;;  %v656_v23 = vrot.slane %v654_v12, 1  ;;  %v661_v45 = vshll.u32 %v3137_v39, 16  ;;  %v874_v48 = vshrl.u32 %v3209_v0, 16  ;;  %v3266_v12 = vld [vmem:[%s3084_s6 + $0x98] sm:$0xff]  }
  0x1e   : > { %v868_v24 = vor.u32 %v867_v17, %v863_v14  ;;  %v872_v25 = vrot.slane %v870_v19, 1  ;;  %v762_v40 = vrot.slane %v760_v29, 1  ;;  %v878_v49 = vshll.u32 %v3246_v41, 16 }
  0x1f   : > { %v3233_v33 = vsel %vm377_vm2, %v653_v22, %v656_v23  ;;  %v663_v62 = vrot.slane %v661_v45, 1  ;;  %v764_v8 = vshrl.u32 %v3224_v20, 16  ;;  %v768_v9 = vshll.u32 %v3260_v53, 16 }
  0x20   : > { %v3236_v36 = vsel %vm377_vm2, %v868_v24, %v872_v25  ;;  %v876_v63 = vor.u32 %v874_v48, %v872_v25  ;;  %v880_v1 = vrot.slane %v878_v49, 1  ;;  %v2799_v17 = vunpack.c.h.b16 %v3152_v46 }
  0x21   : > { %v770_v22 = vrot.slane %v768_v9, 1  ;;  %v2779_v24 = vunpack.c.h.b16 %v3130_v35  ;;  %v882_v29 = vshrl.u32 %v3246_v41, 16  ;;  %v772_v48 = vshrl.u32 %v3260_v53, 16 }
  0x22   : > { %v3273_v19 = vsel %vm377_vm2, %v876_v63, %v880_v1 }
  0x23   : > { %2576 = vmatmul.msk.bf16.gmra.mxu0 %vm245_vm1, %v3114_v30  ;;  %2581 = vmatmul.msk.bf16.gmra.mxu1 %vm245_vm1, %v2844_v21  ;;  %v755_v21 = vshll.u32 %v3215_v6, 16 }
  0x24   : > { %2593 = vmatmul.msk.bf16.gmra.mxu3 %vm245_vm1, %v3117_v31  ;;  %v964_v31 = vrot.slane %v3215_v6, 1 }
  0x25   : > { %v757_v28 = vrot.slane %v755_v21, 1  ;;  %v766_v21 = vor.u32 %v764_v8, %v762_v40 }
  0x27   : > { %v3286_v25 = vsel %vm377_vm2, %v766_v21, %v770_v22  ;;  %v676_v21 = vshll.u32 %v3170_v52, 16 }
  0x28   : > { %4247 = vst [vmem:[#allocation12_spill] sm:$0xff] %v3286_v25 }
  0x29   : > { %2587 = vmatmul.msk.bf16.gmra.mxu2 %vm245_vm1, %v3125_v34 }
  0x33   : > { %2577 = vmatmul.msk.bf16.gmra.mxu0 %vm245_vm1, %v3134_v38  ;;  %2582 = vmatmul.msk.bf16.gmra.mxu1 %vm245_vm1, %v2845_v27  ;;  %v753_v27 = vshrl.u32 %v3215_v6, 16 }
  0x34   : > { %2594 = vmatmul.msk.bf16.gmra.mxu3 %vm245_vm1, %v3137_v39 }
  0x35   : > { %v758_v37 = vor.u32 %v757_v28, %v753_v27  ;;  %v665_v27 = vshrl.u32 %v3137_v39, 16  ;;  %v668_v28 = vshll.u32 %v3155_v47, 16 }
  0x37   : > { %v3251_v43 = vsel %vm377_vm2, %v758_v37, %v762_v40  ;;  %v667_v40 = vor.u32 %v665_v27, %v663_v62 }
  0x38   : > { %4245 = vst [vmem:[#allocation10_spill] sm:$0xff] %v3251_v43 }
  0x39   : > { %2588 = vmatmul.msk.bf16.gmra.mxu2 %vm245_vm1, %v3145_v42 }
  0x43   : > { %2578 = vmatmul.msk.bf16.gmra.mxu0 %vm245_vm1, %v3152_v46  ;;  %2583 = vmatmul.msk.bf16.gmra.mxu1 %vm245_vm1, %v3130_v35  ;;  %v670_v35 = vrot.slane %v668_v28, 1 }
  0x44   : > { %2595 = vmatmul.msk.bf16.gmra.mxu3 %vm245_vm1, %v3155_v47 }
  0x45   : > { %v3303_v63 = vsel %vm377_vm2, %v667_v40, %v670_v35 }
  0x49   : > { %2589 = vmatmul.msk.bf16.gmra.mxu2 %vm245_vm1, %v3164_v50 }
  0x53   : > { %2579 = vmatmul.msk.bf16.gmra.mxu0 %vm245_vm1, %v3191_v58  ;;  %2584 = vmatmul.msk.bf16.gmra.mxu1 %vm245_vm1, %v320_v59  ;;  %v660_v59 = vor.u32 %v658_v44, %v656_v23  ;;  %v3282_v23 = vpack.c.b16 %v3178_v54, %v2799_v17  ;;  %v3295_v54 = vpack.c.b16 %v3180_v55, %v2779_v24  ;;  %v672_v17 = vshrl.u32 %v3155_v47, 16 }
  0x54   : > { %2596 = vmatmul.msk.bf16.gmra.mxu3 %vm245_vm1, %v3197_v60  ;;  %v884_v44 = vor.u32 %v882_v29, %v880_v1  ;;  %v774_v55 = vor.u32 %v772_v48, %v770_v22  ;;  %v3315_v1 = vld [vmem:[%s3084_s6 + $0x54] sm:$0xff]  ;;  %v3327_v22 = vld [vmem:[%s3084_s6 + $0x24] sm:$0xff]  ;;  %v678_v29 = vrot.slane %v676_v21, 1 }
  0x55   : > { %v3269_v14 = vsel %vm377_vm2, %v660_v59, %v663_v62  ;;  %4246 = vst [vmem:[#allocation11_spill] sm:$0xff] %v3282_v23  ;;  %v886_v37 = vshll.u32 %v3282_v23, 16  ;;  %v776_v49 = vshll.u32 %v3295_v54, 16  ;;  %v3300_v59 = vld [vmem:[%s3084_s6 + $0xa0] sm:$0xff]   ;;  %v890_v24 = vshrl.u32 %v3282_v23, 16 }
  0x56   : > { %4248 = vst [vmem:[#allocation13_spill] sm:$0xff] %v3315_v1  ;;  %v894_v27 = vshll.u32 %v3315_v1, 16  ;;  %v674_v28 = vor.u32 %v672_v17, %v670_v35  ;;  %v784_v48 = vshll.u32 %v3327_v22, 16 }
  0x57   : > { %v888_v45 = vrot.slane %v886_v37, 1  ;;  %v778_v62 = vrot.slane %v776_v49, 1 }
  0x58   : > { %v896_v40 = vrot.slane %v894_v27, 1 }
  0x59   : > { %2590 = vmatmul.msk.bf16.gmra.mxu2 %vm245_vm1, %v3212_v4  ;;  %v3306_v8 = vsel %vm377_vm2, %v884_v44, %v888_v45  ;;  %v3318_v9 = vsel %vm377_vm2, %v774_v55, %v778_v62  ;;  %v892_v37 = vor.u32 %v890_v24, %v888_v45  ;;  %v780_v44 = vshrl.u32 %v3295_v54, 16 }
  0x5a   : > { %4249 = vst [vmem:[#allocation14_spill] sm:$0xff] %v3318_v9  ;;  %v786_v45 = vrot.slane %v784_v48, 1 }
  0x5b   : > { %v782_v35 = vor.u32 %v780_v44, %v778_v62  ;;  %v680_v62 = vshrl.u32 %v3170_v52, 16  ;;  %v898_v44 = vshrl.u32 %v3315_v1, 16  ;;  %v788_v52 = vshrl.u32 %v3327_v22, 16 }
  0x5d   : > { %v3347_v21 = vsel %vm377_vm2, %v782_v35, %v786_v45  ;;  %v3363_v47 = vor.u32 %v680_v62, %v678_v29  ;;  %v3365_v39 = vor.u32 %v898_v44, %v896_v40 }
  0x5e   : > { %4250 = vst [vmem:[#allocation15_spill] sm:$0xff] %v3347_v21 }
  0x63   : > { %2598 = vmatmul.msk.bf16.vlgmr.msrb.gmra.mxu0 %vm245_vm1, %v3230_v32  ;;  %2604 = vmatmul.msk.bf16.vlgmr.msrb.gmra.mxu1 %vm245_vm1, %v3233_v33 }
  0x64   : > { %2616 = vmatmul.msk.bf16.vlgmr.msrb.gmra.mxu3 %vm245_vm1, %v3236_v36  ;;  %1199 = vmatpush.bf16.msrb.mxu0 %v3045_v5 }
  0x65   : > { %1378 = vmatpush.bf16.msrb.mxu3 %v3065_v10  ;;  %1241 = vmatpush.bf16.msrb.mxu1 %v3068_v11 }
  0x69   : > { %2610 = vmatmul.msk.bf16.vlgmr.msrb.gmra.mxu2 %vm245_vm1, %v3251_v43 }
  0x6a   : > { %1336 = vmatpush.bf16.msrb.mxu2 %v3088_v15 }
  0x73   : > { %2599 = vmatmul.msk.bf16.gmra.mxu0 %vm245_vm1, %v3266_v12  ;;  %2605 = vmatmul.msk.bf16.gmra.mxu1 %vm245_vm1, %v3269_v14 }
  0x74   : > { %2617 = vmatmul.msk.bf16.gmra.mxu3 %vm245_vm1, %v3273_v19 }
  0x79   : > { %2611 = vmatmul.msk.bf16.gmra.mxu2 %vm245_vm1, %v3286_v25  ;;  %v3335_v25 = vsel %vm377_vm2, %v674_v28, %v678_v29  ;;  %v3350_v28 = vld [vmem:[%s3084_s6 + $0xb0] sm:$0xff]  }
  0x83   : > { %2600 = vmatmul.msk.bf16.gmra.mxu0 %vm245_vm1, %v3300_v59  ;;  %2606 = vmatmul.msk.bf16.gmra.mxu1 %vm245_vm1, %v3303_v63 }
  0x84   : > { %2618 = vmatmul.msk.bf16.gmra.mxu3 %vm245_vm1, %v3306_v8 }
  0x89   : > { %2612 = vmatmul.msk.bf16.gmra.mxu2 %vm245_vm1, %v3318_v9  ;;  %v3338_v9 = vsel %vm377_vm2, %v892_v37, %v896_v40  ;;  %v3377_v40 = vor.u32 %v788_v52, %v786_v45 }
  0x90   : > { %v274_v49 = vpop.f32.mrf.mxu0  ;;  %v348_v55 = vpop.f32.mrf.mxu1 }
  0x91   : > { %v349_v43 = vadd.f32 %v348_v55, %v274_v49  ;;  %v3355_v49 = vunpack.c.l.b16 %v3350_v28 }
  0x93   : > { %2601 = vmatmul.msk.bf16.gmra.mxu0 %vm245_vm1, %v3332_v57  ;;  %2607 = vmatmul.msk.bf16.gmra.mxu1 %vm245_vm1, %v3335_v25  ;;  %4251 = vst [vmem:[#allocation16_spill] sm:$0xff] %v3355_v49  ;;  %v3361_v35 = vpack.c.b16 %v3355_v49, %v3355_v49  ;;  %v1106_v49 = vshll.u32 %v3114_v30, 16 }
  0x94   : > { %2619 = vmatmul.msk.bf16.gmra.mxu3 %vm245_vm1, %v3338_v9 }
  0x95   : > { %v1108_v52 = vrot.slane %v1106_v49, 1  ;;  %v1110_v49 = vshrl.u32 %v3114_v30, 16 }
  0x97   : > { %v525_v17 = vpop.f32.mrf.mxu3 }
  0x98   : > { %v276_v24 = vpop.f32.mrf.mxu0  ;;  %v350_v27 = vpop.f32.mrf.mxu1 }
  0x99   : > { %v351_v37 = vadd.f32 %v350_v27, %v276_v24  ;;  %2613 = vmatmul.msk.bf16.gmra.mxu2 %vm245_vm1, %v3347_v21 }
  0x9c   : > { %v440_v48 = vpop.f32.mrf.mxu2 }
  0x9d   : > { %v464_v55 = vadd.f32 %v440_v48, %v349_v43  ;;  %v1102_v43 = vshll.u32 %v3091_v16, 16 }
  0x9f   : > { %v527_v60 = vpop.f32.mrf.mxu3  ;;  %v3367_v21 = vadd.f32 %v525_v17, %v464_v55 }
  0xa0   : > { %v279_v24 = vpop.f32.mrf.mxu0  ;;  %v353_v27 = vpop.f32.mrf.mxu1 }
  0xa1   : > { %v354_v23 = vadd.f32 %v353_v27, %v279_v24  ;;  %v1100_v24 = vshrl.u32 %v3091_v16, 16  ;;  %v1104_v27 = vrot.slane %v1102_v43, 1 }
  0xa3   : > { %2602 = vmatmul.msk.bf16.gmra.mxu0 %vm245_vm1, %v3361_v35  ;;  %2608 = vmatmul.msk.bf16.gmra.mxu1 %vm245_vm1, %v3363_v47  ;;  %v1105_v45 = vor.u32 %v1104_v27, %v1100_v24  ;;  %v967_v24 = vrot.slane %v3260_v53, 1 }
  0xa4   : > { %2620 = vmatmul.msk.bf16.gmra.mxu3 %vm245_vm1, %v3365_v39  ;;  %v442_v29 = vpop.f32.mrf.mxu2 }
  0xa5   : > { %v465_v62 = vadd.f32 %v442_v29, %v351_v37  ;;  %v965_v37 = vrot.slane %v3224_v20, 1 }
  0xa7   : > { %v530_v17 = vpop.f32.mrf.mxu3  ;;  %v3379_v55 = vadd.f32 %v527_v60, %v465_v62  ;;  %v3388_v43 = vsel %vm963_vm3, %v964_v31, %v965_v37 }
  0xa8   : > { %v281_v44 = vpop.f32.mrf.mxu0  ;;  %v355_v48 = vpop.f32.mrf.mxu1 }
  0xa9   : > { %v356_v1 = vadd.f32 %v355_v48, %v281_v44  ;;  %2614 = vmatmul.msk.bf16.gmra.mxu2 %vm245_vm1, %v3377_v40  ;;  %v1109_v48 = vsel %vm377_vm2, %v1105_v45, %v1108_v52  ;;  %v1112_v45 = vor.u32 %v1110_v49, %v1108_v52 }
  0xac   : > { %v445_v29 = vpop.f32.mrf.mxu2 }
  0xad   : > { %v466_v41 = vadd.f32 %v445_v29, %v354_v23 }
  0xaf   : > { %v532_v60 = vpop.f32.mrf.mxu3  ;;  %v3390_v18 = vadd.f32 %v530_v17, %v466_v41 }
  0xb0   : > { %v284_v62 = vpop.f32.mrf.mxu0  ;;  %v358_v10 = vpop.f32.mrf.mxu1 }
  0xb1   : > { %v359_v44 = vadd.f32 %v358_v10, %v284_v62 }
  0xb3   : > { %2622 = vmatmul.msk.bf16.vlgmr.msra.gmra.mxu0 %vm245_vm1, %v3388_v43  ;;  %2627 = vmatmul.msk.bf16.vlgmr.msra.gmra.mxu1 %vm245_vm1, %v3107_v26  ;;  %v1113_v26 = vshll.u32 %v3134_v38, 16 }
  0xb4   : > { %2637 = vmatmul.msk.bf16.vlgmr.msra.gmra.mxu3 %vm245_vm1, %v1109_v48  ;;  %1420 = vmatpush.bf16.msra.mxu0 %v3076_v13  ;;  %v447_v6 = vpop.f32.mrf.mxu2 }
  0xb5   : > { %1570 = vmatpush.bf16.msra.mxu3 %v3037_v3  ;;  %1486 = vmatpush.bf16.msra.mxu1 %v3183_v56  ;;  %v467_v31 = vadd.f32 %v447_v6, %v356_v1  ;;  %v1115_v1 = vrot.slane %v1113_v26, 1  ;;  %v3410_v6 = vsel %vm963_vm3, %v965_v37, %v967_v24 }
  0xb7   : > { %v535_v20 = vpop.f32.mrf.mxu3  ;;  %v3401_v23 = vadd.f32 %v532_v60, %v467_v31 }
  0xb8   : > { %v286_v10 = vpop.f32.mrf.mxu0  ;;  %v360_v41 = vpop.f32.mrf.mxu1 }
  0xb9   : > { %v361_v17 = vadd.f32 %v360_v41, %v286_v10  ;;  %2632 = vmatmul.msk.bf16.vlgmr.msra.gmra.mxu2 %vm245_vm1, %v3091_v16  ;;  %v1116_v41 = vsel %vm377_vm2, %v1112_v45, %v1115_v1  ;;  %v969_v45 = vrot.slane %v3295_v54, 1 }
  0xba   : > { %1537 = vmatpush.bf16.msra.mxu2 %v3034_v2 }
  0xbc   : > { %v450_v27 = vpop.f32.mrf.mxu2 }
  0xbd   : > { %v468_v29 = vadd.f32 %v450_v27, %v359_v44  ;;  %v1120_v27 = vshll.u32 %v3152_v46, 16 }
  0xbf   : > { %v537_v62 = vpop.f32.mrf.mxu3  ;;  %v3412_v31 = vadd.f32 %v535_v20, %v468_v29  ;;  %v1117_v20 = vshrl.u32 %v3134_v38, 16 }
  0xc0   : > { %v289_v48 = vpop.f32.mrf.mxu0  ;;  %v363_v60 = vpop.f32.mrf.mxu1 }
  0xc1   : > { %v364_v10 = vadd.f32 %v363_v60, %v289_v48  ;;  %v1119_v29 = vor.u32 %v1117_v20, %v1115_v1  ;;  %v1122_v48 = vrot.slane %v1120_v27, 1  ;;  %v1128_v27 = vshll.u32 %v3167_v51, 16 }
  0xc3   : > { %2623 = vmatmul.msk.bf16.gmra.mxu0 %vm245_vm1, %v3410_v6  ;;  %2628 = vmatmul.msk.bf16.gmra.mxu1 %vm245_vm1, %v3125_v34 }
  0xc4   : > { %2638 = vmatmul.msk.bf16.gmra.mxu3 %vm245_vm1, %v1116_v41  ;;  %v452_v16 = vpop.f32.mrf.mxu2 }
  0xc5   : > { %v469_v53 = vadd.f32 %v452_v16, %v361_v17 }
  0xc7   : > { %v540_v52 = vpop.f32.mrf.mxu3  ;;  %v3420_v37 = vadd.f32 %v537_v62, %v469_v53  ;;  %v3428_v62 = vsel %vm963_vm3, %v967_v24, %v969_v45 }
  0xc8   : > { %v291_v44 = vpop.f32.mrf.mxu0  ;;  %v365_v49 = vpop.f32.mrf.mxu1 }
  0xc9   : > { %v366_v26 = vadd.f32 %v365_v49, %v291_v44  ;;  %2633 = vmatmul.msk.bf16.gmra.mxu2 %vm245_vm1, %v3114_v30  ;;  %v1123_v49 = vsel %vm377_vm2, %v1119_v29, %v1122_v48 }
  0xcc   : > { %v455_v34 = vpop.f32.mrf.mxu2 }
  0xcd   : > { %v470_v60 = vadd.f32 %v455_v34, %v364_v10  ;;  %v3445_v34 = vrot.slane %v3327_v22, 1 }
  0xcf   : > { %v542_v17 = vpop.f32.mrf.mxu3  ;;  %v3430_v53 = vadd.f32 %v540_v52, %v470_v60  ;;  %v1124_v52 = vshrl.u32 %v3152_v46, 16  ;;  %v1130_v60 = vrot.slane %v1128_v27, 1 }
  0xd0   : > { %v294_v41 = vpop.f32.mrf.mxu0  ;;  %v368_v16 = vpop.f32.mrf.mxu1 }
  0xd1   : > { %v369_v44 = vadd.f32 %v368_v16, %v294_v41  ;;  %v1126_v29 = vor.u32 %v1124_v52, %v1122_v48 }
  0xd3   : > { %2624 = vmatmul.msk.bf16.gmra.mxu0 %vm245_vm1, %v3428_v62  ;;  %2629 = vmatmul.msk.bf16.gmra.mxu1 %vm245_vm1, %v3145_v42 }
  0xd4   : > { %2639 = vmatmul.msk.bf16.gmra.mxu3 %vm245_vm1, %v1123_v49  ;;  %v457_v30 = vpop.f32.mrf.mxu2 }
  0xd5   : > { %v471_v54 = vadd.f32 %v457_v30, %v366_v26 }
  0xd7   : > { %v545_v1 = vpop.f32.mrf.mxu3  ;;  %v3438_v24 = vadd.f32 %v542_v17, %v471_v54  ;;  %v3449_v17 = vsel %vm963_vm3, %v969_v45, %v3445_v34 }
  0xd8   : > { %v296_v10 = vpop.f32.mrf.mxu0  ;;  %v370_v20 = vpop.f32.mrf.mxu1 }
  0xd9   : > { %2634 = vmatmul.msk.bf16.gmra.mxu2 %vm245_vm1, %v3134_v38  ;;  %v1131_v38 = vsel %vm377_vm2, %v1126_v29, %v1130_v60  ;;  %v1132_v20 = vshrl.u32 %v3167_v51, 16 }
  0xdc   : > { %v460_v42 = vpop.f32.mrf.mxu2 }
  0xdd   : > { %v472_v41 = vadd.f32 %v460_v42, %v369_v44 }
  0xdf   : > { %v547_v26 = vpop.f32.mrf.mxu3  ;;  %v3451_v30 = vadd.f32 %v545_v1, %v472_v41 }
  0xe0   : > { %v610_v16 = vpop.f32.mrf.mxu0  ;;  %v710_v49 = vpop.f32.mrf.mxu1 }
  0xe1   : > { %v634_v54 = vadd.f32 %v610_v16, %v3367_v21 }
  0xe3   : > { %v734_v10 = vadd.f32 %v710_v49, %v634_v54  ;;  %2625 = vmatmul.msk.bf16.gmra.mxu0 %vm245_vm1, %v3449_v17  ;;  %2630 = vmatmul.msk.bf16.gmra.mxu1 %vm245_vm1, %v3164_v50  ;;  %v1134_v50 = vor.u32 %v1132_v20, %v1130_v60 }
  0xe4   : > { %2640 = vmatmul.msk.bf16.gmra.mxu3 %vm245_vm1, %v1131_v38  ;;  %v462_v22 = vpop.f32.mrf.mxu2 }
  0xe5   : > { %v1281_v22 = vshll.u32 %v3230_v32, 16 }
  0xe7   : > { %v928_v48 = vpop.f32.mrf.mxu3 }
  0xe8   : > { %v612_v44 = vpop.f32.mrf.mxu0  ;;  %v712_v45 = vpop.f32.mrf.mxu1 }
  0xe9   : > { %v635_v1 = vadd.f32 %v612_v44, %v3379_v55  ;;  %2635 = vmatmul.msk.bf16.gmra.mxu2 %vm245_vm1, %v3152_v46 }
  0xeb   : > { %v735_v21 = vadd.f32 %v712_v45, %v635_v1  ;;  %v1279_v45 = vshrl.u32 %v3230_v32, 16  ;;  %v1283_v1 = vrot.slane %v1281_v22, 1 }
  0xec   : > { %v818_v52 = vpop.f32.mrf.mxu2 }
  0xed   : > { %v842_v27 = vadd.f32 %v818_v52, %v734_v10 }
  0xef   : > { %v930_v42 = vpop.f32.mrf.mxu3  ;;  %v3464_v26 = vadd.f32 %v928_v48, %v842_v27 }
  0xf0   : > { %v615_v29 = vpop.f32.mrf.mxu0  ;;  %v715_v41 = vpop.f32.mrf.mxu1 }
  0xf1   : > { %v636_v16 = vadd.f32 %v615_v29, %v3390_v18 }
  0xf3   : > { %v736_v49 = vadd.f32 %v715_v41, %v636_v16  ;;  %2626 = vmatmul.msk.bf16.gmra.mxu0 %vm245_vm1, %v3445_v34  ;;  %2631 = vmatmul.msk.bf16.gmra.mxu1 %vm245_vm1, %v3212_v4 }
  0xf4   : > { %2641 = vmatmul.msk.bf16.gmra.mxu3 %vm245_vm1, %v1134_v50  ;;  %v820_v46 = vpop.f32.mrf.mxu2 }
  0xf5   : > { %v843_v51 = vadd.f32 %v820_v46, %v735_v21  ;;  %v1285_v21 = vshll.u32 %v3266_v12, 16 }
  0xf7   : > { %v933_v55 = vpop.f32.mrf.mxu3  ;;  %v3472_v10 = vadd.f32 %v930_v42, %v843_v51  ;;  %v1287_v29 = vrot.slane %v1285_v21, 1 }
  0xf8   : > { %v617_v54 = vpop.f32.mrf.mxu0  ;;  %v717_v38 = vpop.f32.mrf.mxu1 }
  0xf9   : > { %v637_v60 = vadd.f32 %v617_v54, %v3401_v23  ;;  %2636 = vmatmul.msk.bf16.gmra.mxu2 %vm245_vm1, %v3191_v58  ;;  %v1284_v58 = vor.u32 %v1283_v1, %v1279_v45 }
  0xfb   : > { %v737_v18 = vadd.f32 %v717_v38, %v637_v60  ;;  %v3493_v16 = vsel %vm377_vm2, %v1284_v58, %v1287_v29 }
  0xfc   : > { %v823_v48 = vpop.f32.mrf.mxu2 }
  0xfd   : > { %v844_v44 = vadd.f32 %v823_v48, %v736_v49  ;;  %v1292_v48 = vshll.u32 %v3300_v59, 16 }
  0xff   : > { %v935_v4 = vpop.f32.mrf.mxu3  ;;  %v3480_v27 = vadd.f32 %v933_v55, %v844_v44 }
 0x100   : > { %v620_v20 = vpop.f32.mrf.mxu0  ;;  %v720_v52 = vpop.f32.mrf.mxu1 }
 0x101   : > { %v638_v23 = vadd.f32 %v620_v20, %v3412_v31  ;;  %v1294_v20 = vrot.slane %v1292_v48, 1 }
 0x103   : > { %v738_v42 = vadd.f32 %v720_v52, %v638_v23  ;;  %2642 = vmatmul.msk.bf16.vlgmr.msrb.gmra.mxu0 %vm245_vm1, %v3230_v32  ;;  %2647 = vmatmul.msk.bf16.vlgmr.msrb.gmra.mxu1 %vm245_vm1, %v3233_v33 }
 0x104   : > { %2657 = vmatmul.msk.bf16.vlgmr.msrb.gmra.mxu3 %vm245_vm1, %v3236_v36  ;;  %1603 = vmatpush.bf16.msrb.mxu0 %v3054_v7  ;;  %v825_v41 = vpop.f32.mrf.mxu2 }
 0x105   : > { %1729 = vmatpush.bf16.msrb.mxu3 %v3088_v15  ;;  %1645 = vmatpush.bf16.msrb.mxu1 %v3045_v5  ;;  %v845_v31 = vadd.f32 %v825_v41, %v737_v18  ;;  %v1289_v18 = vshrl.u32 %v3266_v12, 16 }
 0x107   : > { %v938_v50 = vpop.f32.mrf.mxu3  ;;  %v3495_v51 = vadd.f32 %v935_v4, %v845_v31  ;;  %v1291_v21 = vor.u32 %v1289_v18, %v1287_v29 }
 0x108   : > { %v622_v49 = vpop.f32.mrf.mxu0  ;;  %v722_v46 = vpop.f32.mrf.mxu1 }
 0x109   : > { %v639_v55 = vadd.f32 %v622_v49, %v3420_v37  ;;  %2652 = vmatmul.msk.bf16.vlgmr.msrb.gmra.mxu2 %vm245_vm1, %v3493_v16  ;;  %v3513_v58 = vsel %vm377_vm2, %v1291_v21, %v1294_v20 }
 0x10a   : > { %1687 = vmatpush.bf16.msrb.mxu2 %v3068_v11 }
 0x10b   : > { %v739_v54 = vadd.f32 %v722_v46, %v639_v55 }
 0x10c   : > { %v828_v38 = vpop.f32.mrf.mxu2 }
 0x10d   : > { %v846_v60 = vadd.f32 %v828_v38, %v738_v42  ;;  %v1296_v38 = vshrl.u32 %v3300_v59, 16 }
 0x10f   : > { %v940_v22 = vpop.f32.mrf.mxu3  ;;  %v3503_v1 = vadd.f32 %v938_v50, %v846_v60 }
 0x110   : > { %v625_v44 = vpop.f32.mrf.mxu0  ;;  %v725_v45 = vpop.f32.mrf.mxu1 }
 0x111   : > { %v640_v4 = vadd.f32 %v625_v44, %v3430_v53 }
 0x113   : > { %v740_v37 = vadd.f32 %v725_v45, %v640_v4  ;;  %2643 = vmatmul.msk.bf16.gmra.mxu0 %vm245_vm1, %v3266_v12  ;;  %2648 = vmatmul.msk.bf16.gmra.mxu1 %vm245_vm1, %v3269_v14 }
 0x114   : > { %2658 = vmatmul.msk.bf16.gmra.mxu3 %vm245_vm1, %v3273_v19  ;;  %v830_v52 = vpop.f32.mrf.mxu2 }
 0x115   : > { %v847_v23 = vadd.f32 %v830_v52, %v739_v54  ;;  %v1299_v54 = vshll.u32 %v3332_v57, 16 }
 0x117   : > { %v943_v42 = vpop.f32.mrf.mxu3  ;;  %v3515_v31 = vadd.f32 %v940_v22, %v847_v23  ;;  %v1301_v45 = vrot.slane %v1299_v54, 1 }
 0x118   : > { %v627_v41 = vpop.f32.mrf.mxu0  ;;  %v727_v53 = vpop.f32.mrf.mxu1 }
 0x119   : > { %v641_v50 = vadd.f32 %v627_v41, %v3438_v24  ;;  %2653 = vmatmul.msk.bf16.gmra.mxu2 %vm245_vm1, %v3513_v58  ;;  %v1298_v24 = vor.u32 %v1296_v38, %v1294_v20 }
 0x11b   : > { %v741_v29 = vadd.f32 %v727_v53, %v641_v50  ;;  %v3532_v52 = vsel %vm377_vm2, %v1298_v24, %v1301_v45  ;;  %v1303_v50 = vshrl.u32 %v3332_v57, 16 }
 0x11c   : > { %v833_v49 = vpop.f32.mrf.mxu2 }
 0x11d   : > { %v848_v46 = vadd.f32 %v833_v49, %v740_v37  ;;  %v1307_v49 = vshll.u32 %v3350_v28, 16 }
 0x11f   : > { %v945_v55 = vpop.f32.mrf.mxu3  ;;  %v3522_v48 = vadd.f32 %v943_v42, %v848_v46 }
 0x120   : > { %v630_v60 = vpop.f32.mrf.mxu0  ;;  %v730_v18 = vpop.f32.mrf.mxu1 }
 0x121   : > { %v642_v22 = vadd.f32 %v630_v60, %v3451_v30  ;;  %v1309_v60 = vrot.slane %v1307_v49, 1 }
 0x123   : > { %v742_v44 = vadd.f32 %v730_v18, %v642_v22  ;;  %2644 = vmatmul.msk.bf16.gmra.mxu0 %vm245_vm1, %v3300_v59  ;;  %2649 = vmatmul.msk.bf16.gmra.mxu1 %vm245_vm1, %v3303_v63 }
 0x124   : > { %2659 = vmatmul.msk.bf16.gmra.mxu3 %vm245_vm1, %v3306_v8  ;;  %v835_v4 = vpop.f32.mrf.mxu2 }
 0x125   : > { %v849_v37 = vadd.f32 %v835_v4, %v741_v29 }
 0x127   : > { %v948_v21 = vpop.f32.mrf.mxu3  ;;  %v3534_v42 = vadd.f32 %v945_v55, %v849_v37  ;;  %v1305_v55 = vor.u32 %v1303_v50, %v1301_v45 }
 0x128   : > { %v632_v23 = vpop.f32.mrf.mxu0  ;;  %v732_v30 = vpop.f32.mrf.mxu1 }
 0x129   : > { %2654 = vmatmul.msk.bf16.gmra.mxu2 %vm245_vm1, %v3532_v52 }
 0x12c   : > { %v838_v41 = vpop.f32.mrf.mxu2 }
 0x12d   : > { %v850_v53 = vadd.f32 %v838_v41, %v742_v44  ;;  %v3552_v44 = vsel %vm377_vm2, %v1305_v55, %v1309_v60 }
 0x12e   : > { %4252 = vst [vmem:[#allocation17_spill] sm:$0xff] %v3552_v44 }
 0x12f   : > { %v950_v20 = vpop.f32.mrf.mxu3  ;;  %v3540_v38 = vadd.f32 %v948_v21, %v850_v53 }
 0x130   : > { %v1000_v46 = vpop.f32.mrf.mxu0  ;;  %v1042_v29 = vpop.f32.mrf.mxu1  ;;  %v1311_v20 = vshrl.u32 %v3350_v28, 16 }
 0x131   : > { %v3543_v54 = vadd.f32 %v1000_v46, %v3464_v26 }
 0x132   : > { %v3571_v49 = vor.u32 %v1311_v20, %v1309_v60 }
 0x133   : > { %2645 = vmatmul.msk.bf16.gmra.mxu0 %vm245_vm1, %v3332_v57  ;;  %2650 = vmatmul.msk.bf16.gmra.mxu1 %vm245_vm1, %v3335_v25 }
 0x134   : > { %2660 = vmatmul.msk.bf16.gmra.mxu3 %vm245_vm1, %v3338_v9  ;;  %v840_v18 = vpop.f32.mrf.mxu2  ;;  %4254 = vst [vmem:[#allocation19_spill] sm:$0xff] %v3571_v49 }
 0x135   : > { %v1455_v18 = vrot.slane %v3200_v61, 1  ;;  %v4257_v61 = vld [vmem:[#allocation3_spill] sm:$0xff] }
 0x137   : > { %v1159_v22 = vpop.f32.mrf.mxu3 }
 0x138   : > { %v1002_v24 = vpop.f32.mrf.mxu0  ;;  %v1044_v4 = vpop.f32.mrf.mxu1 }
 0x139   : > { %v3555_v26 = vadd.f32 %v1002_v24, %v3472_v10  ;;  %2655 = vmatmul.msk.bf16.gmra.mxu2 %vm245_vm1, %v3552_v44 }
 0x13c   : > { %v1075_v37 = vpop.f32.mrf.mxu2 }
 0x13d   : > { %v1076_v21 = vadd.f32 %v1075_v37, %v1042_v29 }
 0x13f   : > { %v1161_v45 = vpop.f32.mrf.mxu3  ;;  %v3559_v41 = vadd.f32 %v1159_v22, %v1076_v21  ;;  %v1456_v22 = vrot.slane %v3209_v0, 1  ;;  %v4258_v0 = vld [vmem:[#allocation2_spill] sm:$0xff] }
 0x140   : > { %v1005_v23 = vpop.f32.mrf.mxu0  ;;  %v1047_v30 = vpop.f32.mrf.mxu1 }
 0x141   : > { %v3562_v53 = vadd.f32 %v1005_v23, %v3480_v27  ;;  %v3583_v23 = vsel %vm963_vm3, %v1455_v18, %v1456_v22  ;;  %v4259_v18 = vld [vmem:[#allocation9_spill] sm:$0xff] }
 0x142   : > { %4255 = vst [vmem:[#allocation20_spill] sm:$0xff] %v3583_v23 }
 0x143   : > { %4253 = vst [vmem:[#allocation18_spill] sm:$0xff] %v3562_v53  ;;  %2646 = vmatmul.msk.bf16.gmra.mxu0 %vm245_vm1, %v3361_v35  ;;  %2651 = vmatmul.msk.bf16.gmra.mxu1 %vm245_vm1, %v3363_v47 }
 0x144   : > { %2661 = vmatmul.msk.bf16.gmra.mxu3 %vm245_vm1, %v3365_v39  ;;  %v1077_v10 = vpop.f32.mrf.mxu2 }
 0x145   : > { %v1078_v50 = vadd.f32 %v1077_v10, %v1044_v4 }
 0x147   : > { %v1164_v46 = vpop.f32.mrf.mxu3  ;;  %v3573_v27 = vadd.f32 %v1161_v45, %v1078_v50 }
 0x148   : > { %v1007_v29 = vpop.f32.mrf.mxu0  ;;  %v1049_v55 = vpop.f32.mrf.mxu1 }
 0x149   : > { %v3576_v28 = vadd.f32 %v1007_v29, %v3495_v51  ;;  %2656 = vmatmul.msk.bf16.gmra.mxu2 %vm245_vm1, %v3571_v49 }
 0x14c   : > { %v1080_v24 = vpop.f32.mrf.mxu2 }
 0x14d   : > { %v1081_v37 = vadd.f32 %v1080_v24, %v1047_v30  ;;  %v1458_v24 = vrot.slane %v4259_v18, 1 }
 0x14f   : > { %v1166_v4 = vpop.f32.mrf.mxu3  ;;  %v3585_v45 = vadd.f32 %v1164_v46, %v1081_v37 }
 0x150   : > { %v1010_v60 = vpop.f32.mrf.mxu0  ;;  %v1052_v21 = vpop.f32.mrf.mxu1 }
 0x151   : > { %v3588_v51 = vadd.f32 %v1010_v60, %v3503_v1 }
 0x153   : > { %4256 = vst [vmem:[#allocation21_spill] sm:$0xff] %v3588_v51  ;;  %2662 = vmatmul.msk.bf16.vlgmr.msra.gmra.mxu0 %vm245_vm1, %v3388_v43  ;;  %2667 = vmatmul.msk.bf16.vlgmr.msra.gmra.mxu1 %vm245_vm1, %v3583_v23 }
 0x154   : > { %2677 = vmatmul.msk.bf16.vlgmr.msra.gmra.mxu3 %vm245_vm1, %v4257_v61  ;;  %1832 = vmatpush.bf16.msra.mxu0 %v4258_v0  ;;  %v1082_v30 = vpop.f32.mrf.mxu2 }
 0x155   : > { %2052 = vmatpush.bf16.msra.mxu3 %v3034_v2  ;;  %1935 = vmatpush.bf16.msra.mxu1 %v3076_v13  ;;  %v1083_v20 = vadd.f32 %v1082_v30, %v1049_v55  ;;  %v3609_v30 = vsel %vm963_vm3, %v1456_v22, %v1458_v24 }
 0x156   : > { %4260 = vst [vmem:[#allocation3_spill] sm:$0xff] %v3609_v30 }
 0x157   : > { %v1169_v10 = vpop.f32.mrf.mxu3  ;;  %v3599_v46 = vadd.f32 %v1166_v4, %v1083_v20 }
 0x158   : > { %v1012_v1 = vpop.f32.mrf.mxu0  ;;  %v1054_v50 = vpop.f32.mrf.mxu1 }
 0x159   : > { %v3602_v29 = vadd.f32 %v1012_v1, %v3515_v31  ;;  %2672 = vmatmul.msk.bf16.vlgmr.msra.gmra.mxu2 %vm245_vm1, %v3230_v32  ;;  %v4262_v32 = vld [vmem:[#allocation4_spill] sm:$0xff] }
 0x15a   : > { %2001 = vmatpush.bf16.msra.mxu2 %v3183_v56 }
 0x15c   : > { %v1085_v37 = vpop.f32.mrf.mxu2 }
 0x15d   : > { %v1086_v2 = vadd.f32 %v1085_v37, %v1052_v21 }
 0x15f   : > { %v1171_v60 = vpop.f32.mrf.mxu3  ;;  %v3611_v4 = vadd.f32 %v1169_v10, %v1086_v2 }
 0x160   : > { %v1015_v61 = vpop.f32.mrf.mxu0  ;;  %v1057_v55 = vpop.f32.mrf.mxu1 }
 0x161   : > { %v3614_v31 = vadd.f32 %v1015_v61, %v3522_v48  ;;  %v4264_v48 = vld [vmem:[#allocation11_spill] sm:$0xff] }
 0x162   : > { %v1460_v2 = vrot.slane %v4264_v48, 1 }
 0x163   : > { %4261 = vst [vmem:[#allocation2_spill] sm:$0xff] %v3614_v31  ;;  %2663 = vmatmul.msk.bf16.gmra.mxu0 %vm245_vm1, %v3410_v6  ;;  %2668 = vmatmul.msk.bf16.gmra.mxu1 %vm245_vm1, %v3609_v30 }
 0x164   : > { %2678 = vmatmul.msk.bf16.gmra.mxu3 %vm245_vm1, %v4262_v32  ;;  %v1087_v21 = vpop.f32.mrf.mxu2 }
 0x165   : > { %v1088_v20 = vadd.f32 %v1087_v21, %v1054_v50  ;;  %v3631_v50 = vsel %vm963_vm3, %v1458_v24, %v1460_v2 }
 0x166   : > { %4265 = vst [vmem:[#allocation4_spill] sm:$0xff] %v3631_v50 }
 0x167   : > { %v1174_v1 = vpop.f32.mrf.mxu3  ;;  %v3622_v37 = vadd.f32 %v1171_v60, %v1088_v20 }
 0x168   : > { %v1017_v18 = vpop.f32.mrf.mxu0  ;;  %v1059_v22 = vpop.f32.mrf.mxu1 }
 0x169   : > { %v3625_v10 = vadd.f32 %v1017_v18, %v3534_v42  ;;  %2673 = vmatmul.msk.bf16.gmra.mxu2 %vm245_vm1, %v3266_v12  ;;  %v4267_v12 = vld [vmem:[#allocation5_spill] sm:$0xff] }
 0x16b   : > { %4263 = vst [vmem:[#allocation9_spill] sm:$0xff] %v3625_v10 }
 0x16c   : > { %v1090_v61 = vpop.f32.mrf.mxu2 }
 0x16d   : > { %v1091_v30 = vadd.f32 %v1090_v61, %v1057_v55 }
 0x16f   : > { %v1176_v23 = vpop.f32.mrf.mxu3  ;;  %v3633_v21 = vadd.f32 %v1174_v1, %v1091_v30 }
 0x170   : > { %v1020_v49 = vpop.f32.mrf.mxu0  ;;  %v1062_v32 = vpop.f32.mrf.mxu1 }
 0x171   : > { %v3636_v60 = vadd.f32 %v1020_v49, %v3540_v38  ;;  %v4268_v38 = vld [vmem:[#allocation13_spill] sm:$0xff] }
 0x172   : > { %v3649_v49 = vrot.slane %v4268_v38, 1 }
 0x173   : > { %4266 = vst [vmem:[#allocation11_spill] sm:$0xff] %v3636_v60  ;;  %2664 = vmatmul.msk.bf16.gmra.mxu0 %vm245_vm1, %v3428_v62  ;;  %2669 = vmatmul.msk.bf16.gmra.mxu1 %vm245_vm1, %v3631_v50 }
 0x174   : > { %2679 = vmatmul.msk.bf16.gmra.mxu3 %vm245_vm1, %v4267_v12  ;;  %v1092_v42 = vpop.f32.mrf.mxu2  ;;  %4269 = vst [vmem:[#allocation5_spill] sm:$0xff] %v3649_v49  ;;  %v3653_v12 = vsel %vm963_vm3, %v1460_v2, %v3649_v49 }
 0x175   : > { %v1093_v55 = vadd.f32 %v1092_v42, %v1059_v22  ;;  %4270 = vst [vmem:[#allocation13_spill] sm:$0xff] %v3653_v12 }
 0x177   : > { %v1179_v20 = vpop.f32.mrf.mxu3  ;;  %v3644_v48 = vadd.f32 %v1176_v23, %v1093_v55 }
 0x178   : > { %v1022_v18 = vpop.f32.mrf.mxu0  ;;  %v1064_v24 = vpop.f32.mrf.mxu1 }
 0x179   : > { %2674 = vmatmul.msk.bf16.gmra.mxu2 %vm245_vm1, %v3300_v59  ;;  %v4271_v59 = vld [vmem:[#allocation6_spill] sm:$0xff] }
 0x17c   : > { %v1095_v30 = vpop.f32.mrf.mxu2 }
 0x17d   : > { %v1096_v1 = vadd.f32 %v1095_v30, %v1062_v32 }
 0x17f   : > { %v1181_v61 = vpop.f32.mrf.mxu3  ;;  %v3655_v22 = vadd.f32 %v1179_v20, %v1096_v1 }
 0x180   : > { %v1201_v50 = vpop.f32.mrf.mxu0  ;;  %v1243_v44 = vpop.f32.mrf.mxu1 }
 0x181   : > { %v1225_v23 = vadd.f32 %v1201_v50, %v3559_v41 }
 0x183   : > { %v1267_v42 = vadd.f32 %v1243_v44, %v1225_v23  ;;  %2665 = vmatmul.msk.bf16.gmra.mxu0 %vm245_vm1, %v3449_v17  ;;  %2670 = vmatmul.msk.bf16.gmra.mxu1 %vm245_vm1, %v3653_v12 }
 0x184   : > { %2680 = vmatmul.msk.bf16.gmra.mxu3 %vm245_vm1, %v4271_v59  ;;  %v1097_v32 = vpop.f32.mrf.mxu2 }
 0x187   : > { %v1380_v55 = vpop.f32.mrf.mxu3 }
 0x188   : > { %v1203_v18 = vpop.f32.mrf.mxu0  ;;  %v1245_v24 = vpop.f32.mrf.mxu1 }
 0x189   : > { %v1226_v2 = vadd.f32 %v1203_v18, %v3573_v27  ;;  %2675 = vmatmul.msk.bf16.gmra.mxu2 %vm245_vm1, %v3332_v57  ;;  %v4272_v27 = vld [vmem:[#allocation8_spill] sm:$0xff] }
 0x18b   : > { %v1268_v41 = vadd.f32 %v1245_v24, %v1226_v2 }
 0x18c   : > { %v1338_v44 = vpop.f32.mrf.mxu2 }
 0x18d   : > { %v1362_v50 = vadd.f32 %v1338_v44, %v1267_v42 }
 0x18f   : > { %v1382_v20 = vpop.f32.mrf.mxu3  ;;  %v3667_v1 = vadd.f32 %v1380_v55, %v1362_v50 }
 0x190   : > { %v1206_v38 = vpop.f32.mrf.mxu0  ;;  %v1248_v30 = vpop.f32.mrf.mxu1 }
 0x191   : > { %v1227_v61 = vadd.f32 %v1206_v38, %v3585_v45 }
 0x193   : > { %v1269_v23 = vadd.f32 %v1248_v30, %v1227_v61  ;;  %2666 = vmatmul.msk.bf16.gmra.mxu0 %vm245_vm1, %v3445_v34  ;;  %2671 = vmatmul.msk.bf16.gmra.mxu1 %vm245_vm1, %v3649_v49 }
 0x194   : > { %2681 = vmatmul.msk.bf16.gmra.mxu3 %vm245_vm1, %v4272_v27  ;;  %v1340_v57 = vpop.f32.mrf.mxu2 }
 0x195   : > { %v1363_v59 = vadd.f32 %v1340_v57, %v1268_v41 }
 0x197   : > { %v1385_v42 = vpop.f32.mrf.mxu3  ;;  %v3676_v24 = vadd.f32 %v1382_v20, %v1363_v59  ;;  %v4273_v20 = vld [vmem:[#allocation10_spill] sm:$0xff] }
 0x198   : > { %v1208_v32 = vpop.f32.mrf.mxu0  ;;  %v1250_v18 = vpop.f32.mrf.mxu1 }
 0x199   : > { %v1228_v55 = vadd.f32 %v1208_v32, %v3599_v46  ;;  %2676 = vmatmul.msk.bf16.gmra.mxu2 %vm245_vm1, %v3361_v35 }
 0x19b   : > { %v1270_v45 = vadd.f32 %v1250_v18, %v1228_v55 }
 0x19c   : > { %v1343_v2 = vpop.f32.mrf.mxu2 }
 0x19d   : > { %v1364_v44 = vadd.f32 %v1343_v2, %v1269_v23 }
 0x19f   : > { %v1387_v50 = vpop.f32.mrf.mxu3  ;;  %v3681_v61 = vadd.f32 %v1385_v42, %v1364_v44 }
 0x1a0   : > { %v1211_v38 = vpop.f32.mrf.mxu0  ;;  %v1253_v30 = vpop.f32.mrf.mxu1 }
 0x1a1   : > { %v1229_v41 = vadd.f32 %v1211_v38, %v3611_v4 }
 0x1a3   : > { %v1271_v27 = vadd.f32 %v1253_v30, %v1229_v41  ;;  %2682 = vmatmul.msk.bf16.vlgmr.msrb.gmra.mxu0 %vm245_vm1, %v3233_v33  ;;  %2687 = vmatmul.msk.bf16.vlgmr.msrb.gmra.mxu1 %vm245_vm1, %v4273_v20 }
 0x1a4   : > { %2697 = vmatmul.msk.bf16.vlgmr.msrb.gmra.mxu3 %vm245_vm1, %v3388_v43  ;;  %2085 = vmatpush.bf16.msrb.mxu0 %v3037_v3  ;;  %v1345_v46 = vpop.f32.mrf.mxu2 }
 0x1a5   : > { %2202 = vmatpush.bf16.msrb.mxu3 %v3068_v11  ;;  %2118 = vmatpush.bf16.msrb.mxu1 %v3054_v7  ;;  %v1365_v23 = vadd.f32 %v1345_v46, %v1270_v45 }
 0x1a7   : > { %v1390_v57 = vpop.f32.mrf.mxu3  ;;  %v3693_v42 = vadd.f32 %v1387_v50, %v1365_v23 }
 0x1a8   : > { %v1213_v4 = vpop.f32.mrf.mxu0  ;;  %v1255_v59 = vpop.f32.mrf.mxu1 }
 0x1a9   : > { %v1230_v32 = vadd.f32 %v1213_v4, %v3622_v37  ;;  %2692 = vmatmul.msk.bf16.vlgmr.msrb.gmra.mxu2 %vm245_vm1, %v3236_v36  ;;  %v4274_v37 = vld [vmem:[#allocation12_spill] sm:$0xff] }
 0x1aa   : > { %2160 = vmatpush.bf16.msrb.mxu2 %v3045_v5 }
 0x1ab   : > { %v1272_v18 = vadd.f32 %v1255_v59, %v1230_v32 }
 0x1ac   : > { %v1348_v3 = vpop.f32.mrf.mxu2 }
 0x1ad   : > { %v1366_v55 = vadd.f32 %v1348_v3, %v1271_v27 }
 0x1af   : > { %v1392_v2 = vpop.f32.mrf.mxu3  ;;  %v3699_v7 = vadd.f32 %v1390_v57, %v1366_v55 }
 0x1b0   : > { %v1216_v11 = vpop.f32.mrf.mxu0  ;;  %v1258_v44 = vpop.f32.mrf.mxu1 }
 0x1b1   : > { %v1231_v45 = vadd.f32 %v1216_v11, %v3633_v21 }
 0x1b3   : > { %v1273_v38 = vadd.f32 %v1258_v44, %v1231_v45  ;;  %2683 = vmatmul.msk.bf16.gmra.mxu0 %vm245_vm1, %v3269_v14  ;;  %2688 = vmatmul.msk.bf16.gmra.mxu1 %vm245_vm1, %v4274_v37 }
 0x1b4   : > { %2698 = vmatmul.msk.bf16.gmra.mxu3 %vm245_vm1, %v3410_v6  ;;  %v1350_v5 = vpop.f32.mrf.mxu2 }
 0x1b5   : > { %v1367_v50 = vadd.f32 %v1350_v5, %v1272_v18 }
 0x1b7   : > { %v1395_v30 = vpop.f32.mrf.mxu3  ;;  %v3708_v20 = vadd.f32 %v1392_v2, %v1367_v50  ;;  %v4275_v2 = vld [vmem:[#allocation14_spill] sm:$0xff] }
 0x1b8   : > { %v1218_v41 = vpop.f32.mrf.mxu0  ;;  %v1260_v27 = vpop.f32.mrf.mxu1 }
 0x1b9   : > { %v1232_v46 = vadd.f32 %v1218_v41, %v3644_v48  ;;  %2693 = vmatmul.msk.bf16.gmra.mxu2 %vm245_vm1, %v3273_v19 }
 0x1bb   : > { %v1274_v21 = vadd.f32 %v1260_v27, %v1232_v46 }
 0x1bc   : > { %v1353_v23 = vpop.f32.mrf.mxu2 }
 0x1bd   : > { %v1368_v57 = vadd.f32 %v1353_v23, %v1273_v38 }
 0x1bf   : > { %v1397_v4 = vpop.f32.mrf.mxu3  ;;  %v3713_v3 = vadd.f32 %v1395_v30, %v1368_v57 }
 0x1c0   : > { %v1221_v59 = vpop.f32.mrf.mxu0  ;;  %v1263_v32 = vpop.f32.mrf.mxu1 }
 0x1c1   : > { %v1233_v18 = vadd.f32 %v1221_v59, %v3655_v22 }
 0x1c3   : > { %v1275_v55 = vadd.f32 %v1263_v32, %v1233_v18  ;;  %2684 = vmatmul.msk.bf16.gmra.mxu0 %vm245_vm1, %v3303_v63  ;;  %2689 = vmatmul.msk.bf16.gmra.mxu1 %vm245_vm1, %v4275_v2 }
 0x1c4   : > { %2699 = vmatmul.msk.bf16.gmra.mxu3 %vm245_vm1, %v3428_v62  ;;  %v1355_v48 = vpop.f32.mrf.mxu2 }
 0x1c5   : > { %v1369_v11 = vadd.f32 %v1355_v48, %v1274_v21  ;;  %v4276_v21 = vld [vmem:[#allocation15_spill] sm:$0xff] }
 0x1c7   : > { %v1400_v44 = vpop.f32.mrf.mxu3  ;;  %v3722_v37 = vadd.f32 %v1397_v4, %v1369_v11 }
 0x1c8   : > { %v1223_v45 = vpop.f32.mrf.mxu0  ;;  %v1265_v38 = vpop.f32.mrf.mxu1 }
 0x1c9   : > { %2694 = vmatmul.msk.bf16.gmra.mxu2 %vm245_vm1, %v3306_v8  ;;  %v2954_v45 = vld [vmem:[%s3084_s6 + $0x64] sm:$0xff]  }
 0x1cc   : > { %v1358_v22 = vpop.f32.mrf.mxu2 }
 0x1cd   : > { %v1370_v5 = vadd.f32 %v1358_v22, %v1275_v55 }
 0x1cf   : > { %v1402_v50 = vpop.f32.mrf.mxu3  ;;  %v3727_v46 = vadd.f32 %v1400_v44, %v1370_v5  ;;  %v3750_v5 = vld [vmem:[%s3084_s6 + $0x94] sm:$0xff]  }
 0x1d0   : > { %v1422_v30 = vpop.f32.mrf.mxu0  ;;  %v1488_v41 = vpop.f32.mrf.mxu1  ;;  %4277 = vst [vmem:[#allocation6_spill] sm:$0xff] %v3750_v5 }
 0x1d1   : > { %v1446_v27 = vadd.f32 %v1422_v30, %v3667_v1  ;;  %v1774_v30 = vshll.u32 %v2954_v45, 16 }
 0x1d3   : > { %v3729_v23 = vadd.f32 %v1488_v41, %v1446_v27  ;;  %2685 = vmatmul.msk.bf16.gmra.mxu0 %vm245_vm1, %v3335_v25  ;;  %2690 = vmatmul.msk.bf16.gmra.mxu1 %vm245_vm1, %v4276_v21  ;;  %v3762_v41 = vld [vmem:[%s3084_s6 + $0x6c] sm:$0xff]   ;;  %v3765_v27 = vld [vmem:[%s3084_s6 + $0x9c] sm:$0xff]   ;;  %v1877_v21 = vshll.u32 %v3750_v5, 16 }
 0x1d4   : > { %2700 = vmatmul.msk.bf16.gmra.mxu3 %vm245_vm1, %v3449_v17  ;;  %v1360_v4 = vpop.f32.mrf.mxu2  ;;  %v1882_v2 = vshll.u32 %v3765_v27, 16 }
 0x1d7   : > { %v1572_v1 = vpop.f32.mrf.mxu3 }
 0x1d8   : > { %v1424_v59 = vpop.f32.mrf.mxu0  ;;  %v1490_v32 = vpop.f32.mrf.mxu1 }
 0x1d9   : > { %v1447_v18 = vadd.f32 %v1424_v59, %v3676_v24  ;;  %2695 = vmatmul.msk.bf16.gmra.mxu2 %vm245_vm1, %v3338_v9 }
 0x1db   : > { %v3742_v55 = vadd.f32 %v1490_v32, %v1447_v18  ;;  %v1772_v32 = vshrl.u32 %v2954_v45, 16  ;;  %v1776_v18 = vrot.slane %v1774_v30, 1  ;;  %v1884_v30 = vrot.slane %v1882_v2, 1 }
 0x1dc   : > { %v1539_v48 = vpop.f32.mrf.mxu2  ;;  %v1970_v2 = vrot.slane %v2954_v45, 1 }
 0x1dd   : > { %v3746_v11 = vadd.f32 %v1572_v1, %v1539_v48 }
 0x1df   : > { %v1574_v44 = vpop.f32.mrf.mxu3 }
 0x1e0   : > { %v1427_v38 = vpop.f32.mrf.mxu0  ;;  %v1493_v22 = vpop.f32.mrf.mxu1 }
 0x1e1   : > { %v1448_v24 = vadd.f32 %v1427_v38, %v3681_v61  ;;  %v1779_v38 = vshll.u32 %v3762_v41, 16 }
 0x1e3   : > { %v3753_v50 = vadd.f32 %v1493_v22, %v1448_v24  ;;  %2686 = vmatmul.msk.bf16.gmra.mxu0 %vm245_vm1, %v3363_v47  ;;  %2691 = vmatmul.msk.bf16.gmra.mxu1 %vm245_vm1, %v3377_v40  ;;  %v1875_v22 = vshrl.u32 %v3750_v5, 16  ;;  %v1879_v24 = vrot.slane %v1877_v21, 1 }
 0x1e4   : > { %2701 = vmatmul.msk.bf16.gmra.mxu3 %vm245_vm1, %v3445_v34  ;;  %v1541_v4 = vpop.f32.mrf.mxu2 }
 0x1e5   : > { %4278 = vst [vmem:[#allocation8_spill] sm:$0xff] %v3753_v50  ;;  %v3770_v1 = vadd.f32 %v1574_v44, %v1541_v4  ;;  %v1777_v44 = vor.u32 %v1776_v18, %v1772_v32  ;;  %v1781_v4 = vrot.slane %v1779_v38, 1  ;;  %v1880_v49 = vor.u32 %v1879_v24, %v1875_v22 }
 0x1e6   : > { %v1783_v24 = vshrl.u32 %v3762_v41, 16 }
 0x1e7   : > { %v1577_v59 = vpop.f32.mrf.mxu3 }
 0x1e8   : > { %v1429_v40 = vpop.f32.mrf.mxu0  ;;  %v1495_v48 = vpop.f32.mrf.mxu1 }
 0x1e9   : > { %v1449_v57 = vadd.f32 %v1429_v40, %v3693_v42  ;;  %2696 = vmatmul.msk.bf16.gmra.mxu2 %vm245_vm1, %v3365_v39  ;;  %v1782_v40 = vsel %vm377_vm2, %v1777_v44, %v1781_v4  ;;  %v1886_v44 = vshrl.u32 %v3765_v27, 16 }
 0x1eb   : > { %v3778_v61 = vadd.f32 %v1495_v48, %v1449_v57  ;;  %v3786_v57 = vsel %vm377_vm2, %v1880_v49, %v1884_v30  ;;  %v3801_v48 = vld [vmem:[%s3084_s6 + $0xa4] sm:$0xff]  }
 0x1ec   : > { %v1544_v50 = vpop.f32.mrf.mxu2 }
 0x1ed   : > { %v3782_v21 = vadd.f32 %v1577_v59, %v1544_v50  ;;  %v1971_v50 = vrot.slane %v3762_v41, 1  ;;  %v3798_v59 = vld [vmem:[%s3084_s6 + $0x74] sm:$0xff]   ;;  %v1888_v41 = vor.u32 %v1886_v44, %v1884_v30 }
 0x1ee   : > { %v4283_v44 = vld [vmem:[#allocation16_spill] sm:$0xff] }
 0x1ef   : > { %v1579_v53 = vpop.f32.mrf.mxu3  ;;  %v3811_v38 = vsel %vm963_vm3, %v1970_v2, %v1971_v50 }
 0x1f0   : > { %v1432_v5 = vpop.f32.mrf.mxu0  ;;  %v1498_v42 = vpop.f32.mrf.mxu1 }
 0x1f1   : > { %v1450_v32 = vadd.f32 %v1432_v5, %v3699_v7 }
 0x1f3   : > { %v3789_v18 = vadd.f32 %v1498_v42, %v1450_v32  ;;  %2702 = vmatmul.msk.bf16.vlgmr.msra.gmra.mxu0 %vm245_vm1, %v1782_v40  ;;  %2707 = vmatmul.msk.bf16.vlgmr.msra.gmra.mxu1 %vm245_vm1, %v3786_v57  ;;  %v1785_v42 = vor.u32 %v1783_v24, %v1781_v4 }
 0x1f4   : > { %2717 = vmatmul.msk.bf16.vlgmr.msra.gmra.mxu3 %vm245_vm1, %v3233_v33  ;;  %2244 = vmatpush.bf16.msra.mxu0 %v3088_v15  ;;  %v1546_v7 = vpop.f32.mrf.mxu2  ;;  %v1787_v15 = vshll.u32 %v3798_v59, 16 }
 0x1f5   : > { %4279 = vst [vmem:[#allocation10_spill] sm:$0xff] %v3789_v18  ;;  %2394 = vmatpush.bf16.msra.mxu3 %v3183_v56  ;;  %2286 = vmatpush.bf16.msra.mxu1 %v4258_v0  ;;  %v3808_v45 = vadd.f32 %v1579_v53, %v1546_v7  ;;  %v1890_v56 = vshll.u32 %v3801_v48, 16  ;;  %v2986_v18 = vld [vmem:[%s3084_s6 + $0x78] sm:$0xff]  }
 0x1f6   : > { %v1789_v40 = vrot.slane %v1787_v15, 1 }
 0x1f7   : > { %v1582_v5 = vpop.f32.mrf.mxu3  ;;  %v1892_v32 = vrot.slane %v1890_v56, 1 }
 0x1f8   : > { %v1434_v33 = vpop.f32.mrf.mxu0  ;;  %v1500_v22 = vpop.f32.mrf.mxu1 }
 0x1f9   : > { %v1451_v0 = vadd.f32 %v1434_v33, %v3708_v20  ;;  %2712 = vmatmul.msk.bf16.vlgmr.msra.gmra.mxu2 %vm245_vm1, %v3811_v38  ;;  %v2819_v20 = vunpack.c.h.b16 %v2986_v18  ;;  %v3829_v33 = vld [vmem:[%s3084_s6 + $0xa8] sm:$0xff]   ;;  %v3834_v4 = vsel %vm377_vm2, %v1888_v41, %v1892_v32  ;;  %v1973_v18 = vrot.slane %v3798_v59, 1 }
 0x1fa   : > { %2328 = vmatpush.bf16.msra.mxu2 %v3076_v13  ;;  %v1790_v13 = vsel %vm377_vm2, %v1785_v42, %v1789_v40 }
 0x1fb   : > { %v3820_v53 = vadd.f32 %v1500_v22, %v1451_v0  ;;  %v2839_v22 = vunpack.c.h.b16 %v3829_v33 }
 0x1fc   : > { %v1549_v7 = vpop.f32.mrf.mxu2 }
 0x1fd   : > { %4280 = vst [vmem:[#allocation12_spill] sm:$0xff] %v3820_v53  ;;  %v3825_v49 = vadd.f32 %v1582_v5, %v1549_v7  ;;  %v4282_v5 = vld [vmem:[#allocation7_spill] sm:$0xff]  ;;  %v3847_v56 = vpack.c.b16 %v4283_v44, %v2839_v22  ;;  %v3856_v7 = vsel %vm963_vm3, %v1971_v50, %v1973_v18 }
 0x1fe   : > { %v3844_v15 = vpack.c.b16 %v4282_v5, %v2819_v20  ;;  %v1791_v20 = vshrl.u32 %v3798_v59, 16 }
 0x1ff   : > { %v1584_v12 = vpop.f32.mrf.mxu3 }
 0x200   : > { %v1437_v0 = vpop.f32.mrf.mxu0  ;;  %v1503_v51 = vpop.f32.mrf.mxu1  ;;  %v1795_v22 = vshll.u32 %v3844_v15, 16  ;;  %v1793_v44 = vor.u32 %v1791_v20, %v1789_v40  ;;  %v3886_v20 = vld [vmem:[%s3084_s6 + $0xb4] sm:$0xff] }
 0x201   : > { %v1452_v30 = vadd.f32 %v1437_v0, %v3713_v3 }
 0x202   : > { %v1797_v50 = vrot.slane %v1795_v22, 1 }
 0x203   : > { %v3837_v24 = vadd.f32 %v1503_v51, %v1452_v30  ;;  %2703 = vmatmul.msk.bf16.gmra.mxu0 %vm245_vm1, %v1790_v13  ;;  %2708 = vmatmul.msk.bf16.gmra.mxu1 %vm245_vm1, %v3834_v4  ;;  %v1894_v30 = vshrl.u32 %v3801_v48, 16 }
 0x204   : > { %2718 = vmatmul.msk.bf16.gmra.mxu3 %vm245_vm1, %v3269_v14  ;;  %v1551_v3 = vpop.f32.mrf.mxu2  ;;  %v1898_v14 = vshll.u32 %v3847_v56, 16 }
 0x205   : > { %4281 = vst [vmem:[#allocation14_spill] sm:$0xff] %v3837_v24  ;;  %v3853_v42 = vadd.f32 %v1584_v12, %v1551_v3  ;;  %v1896_v3 = vor.u32 %v1894_v30, %v1892_v32 }
 0x206   : > { %v1900_v51 = vrot.slane %v1898_v14, 1 }
 0x207   : > { %v1587_v41 = vpop.f32.mrf.mxu3 }
 0x208   : > { %v1439_v0 = vpop.f32.mrf.mxu0  ;;  %v1505_v13 = vpop.f32.mrf.mxu1 }
 0x209   : > { %v1453_v5 = vadd.f32 %v1439_v0, %v3722_v37  ;;  %2713 = vmatmul.msk.bf16.gmra.mxu2 %vm245_vm1, %v3856_v7  ;;  %v1798_v0 = vsel %vm377_vm2, %v1793_v44, %v1797_v50 }
 0x20b   : > { %v3865_v12 = vadd.f32 %v1505_v13, %v1453_v5  ;;  %v3873_v13 = vsel %vm377_vm2, %v1896_v3, %v1900_v51  ;;  %v1799_v3 = vshrl.u32 %v3844_v15, 16 }
 0x20c   : > { %v1554_v2 = vpop.f32.mrf.mxu2 }
 0x20d   : > { %4284 = vst [vmem:[#allocation15_spill] sm:$0xff] %v3865_v12  ;;  %v3869_v24 = vadd.f32 %v1587_v41, %v1554_v2  ;;  %v1975_v2 = vrot.slane %v3844_v15, 1  ;;  %v2959_v41 = vld [vmem:[%s3084_s6 + $0x84] sm:$0xff] }
 0x20f   : > { %v1589_v31 = vpop.f32.mrf.mxu3  ;;  %v3893_v14 = vsel %vm963_vm3, %v1973_v18, %v1975_v2 }
 0x210   : > { %v1442_v53 = vpop.f32.mrf.mxu0  ;;  %v1508_v37 = vpop.f32.mrf.mxu1 }
 0x211   : > { %v1454_v40 = vadd.f32 %v1442_v53, %v3727_v46 }
 0x213   : > { %v3876_v32 = vadd.f32 %v1508_v37, %v1454_v40  ;;  %2704 = vmatmul.msk.bf16.gmra.mxu0 %vm245_vm1, %v1798_v0  ;;  %2709 = vmatmul.msk.bf16.gmra.mxu1 %vm245_vm1, %v3873_v13  ;;  %v1803_v37 = vshll.u32 %v2959_v41, 16  ;;  %v1906_v0 = vshll.u32 %v3886_v20, 16  ;;  %v1801_v40 = vor.u32 %v1799_v3, %v1797_v50 }
 0x214   : > { %2719 = vmatmul.msk.bf16.gmra.mxu3 %vm245_vm1, %v3303_v63  ;;  %v1556_v30 = vpop.f32.mrf.mxu2  ;;  %v1902_v63 = vshrl.u32 %v3847_v56, 16 }
 0x215   : > { %4285 = vst [vmem:[#allocation7_spill] sm:$0xff] %v3876_v32  ;;  %v3890_v46 = vadd.f32 %v1589_v31, %v1556_v30  ;;  %v1805_v22 = vrot.slane %v1803_v37, 1  ;;  %v1908_v30 = vrot.slane %v1906_v0, 1  ;;  %v1910_v0 = vshrl.u32 %v3886_v20, 16 }
 0x216   : > { %v1904_v31 = vor.u32 %v1902_v63, %v1900_v51  ;;  %v3910_v51 = vrot.slane %v2959_v41, 1  ;;  %v1807_v63 = vshrl.u32 %v2959_v41, 16 }
 0x217   : > { %v1592_v53 = vpop.f32.mrf.mxu3  ;;  %v1806_v15 = vsel %vm377_vm2, %v1801_v40, %v1805_v22 }
 0x218   : > { %v1444_v5 = vpop.f32.mrf.mxu0  ;;  %v1510_v44 = vpop.f32.mrf.mxu1  ;;  %v3904_v60 = vsel %vm377_vm2, %v1904_v31, %v1908_v30 }
 0x219   : > { %2714 = vmatmul.msk.bf16.gmra.mxu2 %vm245_vm1, %v3893_v14 }
 0x21c   : > { %v1559_v59 = vpop.f32.mrf.mxu2 }
 0x21d   : > { %v3900_v32 = vadd.f32 %v1592_v53, %v1559_v59  ;;  %v3916_v53 = vsel %vm963_vm3, %v1975_v2, %v3910_v51 }
 0x21f   : > { %v1594_v18 = vpop.f32.mrf.mxu3 }
 0x220   : > { %v1605_v5 = vpop.f32.mrf.mxu0  ;;  %v1647_v44 = vpop.f32.mrf.mxu1  ;;  %v1809_v18 = vor.u32 %v1807_v63, %v1805_v22 }
 0x221   : > { %v1629_v12 = vadd.f32 %v1605_v5, %v3746_v11  ;;  %v3922_v5 = vor.u32 %v1910_v0, %v1908_v30 }
 0x223   : > { %v1671_v10 = vadd.f32 %v1647_v44, %v1629_v12  ;;  %2705 = vmatmul.msk.bf16.gmra.mxu0 %vm245_vm1, %v1806_v15  ;;  %2710 = vmatmul.msk.bf16.gmra.mxu1 %vm245_vm1, %v3904_v60 }
 0x224   : > { %2720 = vmatmul.msk.bf16.gmra.mxu3 %vm245_vm1, %v3335_v25  ;;  %v1561_v50 = vpop.f32.mrf.mxu2 }
 0x227   : > { %v1731_v59 = vpop.f32.mrf.mxu3 }
 0x228   : > { %v1607_v3 = vpop.f32.mrf.mxu0  ;;  %v1649_v37 = vpop.f32.mrf.mxu1 }
 0x229   : > { %v1630_v11 = vadd.f32 %v1607_v3, %v3770_v1  ;;  %2715 = vmatmul.msk.bf16.gmra.mxu2 %vm245_vm1, %v3916_v53 }
 0x22b   : > { %v1672_v12 = vadd.f32 %v1649_v37, %v1630_v11 }
 0x22c   : > { %v1689_v40 = vpop.f32.mrf.mxu2 }
 0x22d   : > { %v1713_v31 = vadd.f32 %v1689_v40, %v1671_v10 }
 0x22f   : > { %v1733_v25 = vpop.f32.mrf.mxu3  ;;  %v3924_v15 = vadd.f32 %v1731_v59, %v1713_v31 }
 0x230   : > { %v1610_v44 = vpop.f32.mrf.mxu0  ;;  %v1652_v2 = vpop.f32.mrf.mxu1 }
 0x231   : > { %v1631_v50 = vadd.f32 %v1610_v44, %v3782_v21  ;;  %v2988_v44 = vld [vmem:[%s3084_s6 + $0x90] sm:$0xff]  }
 0x233   : > { %v1673_v1 = vadd.f32 %v1652_v2, %v1631_v50  ;;  %2706 = vmatmul.msk.bf16.gmra.mxu0 %vm245_vm1, %v1809_v18  ;;  %2711 = vmatmul.msk.bf16.gmra.mxu1 %vm245_vm1, %v3922_v5 }
 0x234   : > { %2721 = vmatmul.msk.bf16.gmra.mxu3 %vm245_vm1, %v3363_v47  ;;  %v1691_v10 = vpop.f32.mrf.mxu2 }
 0x235   : > { %v1714_v41 = vadd.f32 %v1691_v10, %v1672_v12 }
 0x237   : > { %v1736_v22 = vpop.f32.mrf.mxu3  ;;  %v3932_v37 = vadd.f32 %v1733_v25, %v1714_v41 }
 0x238   : > { %v1612_v30 = vpop.f32.mrf.mxu0  ;;  %v1654_v3 = vpop.f32.mrf.mxu1 }
 0x239   : > { %v1632_v59 = vadd.f32 %v1612_v30, %v3808_v45  ;;  %2716 = vmatmul.msk.bf16.gmra.mxu2 %vm245_vm1, %v3910_v51 }
 0x23b   : > { %v1674_v21 = vadd.f32 %v1654_v3, %v1632_v59 }
 0x23c   : > { %v1694_v11 = vpop.f32.mrf.mxu2 }
 0x23d   : > { %v1715_v63 = vadd.f32 %v1694_v11, %v1673_v1 }
 0x23f   : > { %v1738_v0 = vpop.f32.mrf.mxu3  ;;  %v3937_v47 = vadd.f32 %v1736_v22, %v1715_v63  ;;  %v2989_v63 = vld [vmem:[%s3084_s6 + $0x98] sm:$0xff]  }
 0x240   : > { %v1615_v40 = vpop.f32.mrf.mxu0  ;;  %v1657_v31 = vpop.f32.mrf.mxu1 }
 0x241   : > { %v1633_v12 = vadd.f32 %v1615_v40, %v3825_v49 }
 0x243   : > { %v1675_v18 = vadd.f32 %v1657_v31, %v1633_v12  ;;  %2722 = vmatmul.msk.bf16.vlgmr.msrb.gmra.mxu0 %vm245_vm1, %v2988_v44  ;;  %2727 = vmatmul.msk.bf16.vlgmr.msrb.gmra.mxu1 %vm245_vm1, %v3493_v16 }
 0x244   : > { %2737 = vmatmul.msk.bf16.vlgmr.msrb.gmra.mxu3 %vm245_vm1, %v3388_v43  ;;  %v1696_v45 = vpop.f32.mrf.mxu2 }
 0x245   : > { %v1716_v25 = vadd.f32 %v1696_v45, %v1674_v21 }
 0x247   : > { %v1741_v2 = vpop.f32.mrf.mxu3  ;;  %v3946_v10 = vadd.f32 %v1738_v0, %v1716_v25 }
 0x248   : > { %v1617_v50 = vpop.f32.mrf.mxu0  ;;  %v1659_v1 = vpop.f32.mrf.mxu1 }
 0x249   : > { %v1634_v49 = vadd.f32 %v1617_v50, %v3853_v42  ;;  %2732 = vmatmul.msk.bf16.vlgmr.msrb.gmra.mxu2 %vm245_vm1, %v3236_v36 }
 0x24b   : > { %v1676_v41 = vadd.f32 %v1659_v1, %v1634_v49  ;;  %v2990_v49 = vld [vmem:[%s3084_s6 + $0xa0] sm:$0xff]  }
 0x24c   : > { %v1699_v22 = vpop.f32.mrf.mxu2 }
 0x24d   : > { %v1717_v30 = vadd.f32 %v1699_v22, %v1675_v18 }
 0x24f   : > { %v1743_v16 = vpop.f32.mrf.mxu3  ;;  %v3951_v43 = vadd.f32 %v1741_v2, %v1717_v30 }
 0x250   : > { %v1620_v3 = vpop.f32.mrf.mxu0  ;;  %v1662_v59 = vpop.f32.mrf.mxu1 }
 0x251   : > { %v1635_v21 = vadd.f32 %v1620_v3, %v3869_v24 }
 0x253   : > { %v1677_v11 = vadd.f32 %v1662_v59, %v1635_v21  ;;  %2723 = vmatmul.msk.bf16.gmra.mxu0 %vm245_vm1, %v2989_v63  ;;  %2728 = vmatmul.msk.bf16.gmra.mxu1 %vm245_vm1, %v3513_v58 }
 0x254   : > { %2738 = vmatmul.msk.bf16.gmra.mxu3 %vm245_vm1, %v3410_v6  ;;  %v1701_v36 = vpop.f32.mrf.mxu2 }
 0x255   : > { %v1718_v42 = vadd.f32 %v1701_v36, %v1676_v41  ;;  %v4286_v36 = vld [vmem:[#allocation17_spill] sm:$0xff] }
 0x257   : > { %v1746_v0 = vpop.f32.mrf.mxu3  ;;  %v3960_v12 = vadd.f32 %v1743_v16, %v1718_v42 }
 0x258   : > { %v1622_v40 = vpop.f32.mrf.mxu0  ;;  %v1664_v31 = vpop.f32.mrf.mxu1 }
 0x259   : > { %v1636_v24 = vadd.f32 %v1622_v40, %v3890_v46  ;;  %2733 = vmatmul.msk.bf16.gmra.mxu2 %vm245_vm1, %v3273_v19 }
 0x25b   : > { %v1678_v18 = vadd.f32 %v1664_v31, %v1636_v24 }
 0x25c   : > { %v1704_v44 = vpop.f32.mrf.mxu2 }
 0x25d   : > { %v1719_v45 = vadd.f32 %v1704_v44, %v1677_v11  ;;  %v4287_v44 = vmax.f32 %v3543_v54, %v3729_v23  ;;  %v4289_v54 = vmax.f32 %v3555_v26, %v3742_v55  ;;  %v4292_v26 = vld [vmem:[#allocation8_spill] sm:$0xff] }
 0x25f   : > { %v1748_v58 = vpop.f32.mrf.mxu3  ;;  %v3965_v6 = vadd.f32 %v1746_v0, %v1719_v45 }
 0x260   : > { %v1625_v25 = vpop.f32.mrf.mxu0  ;;  %v1667_v2 = vpop.f32.mrf.mxu1 }
 0x261   : > { %v1637_v50 = vadd.f32 %v1625_v25, %v3900_v32 }
 0x263   : > { %v1679_v1 = vadd.f32 %v1667_v2, %v1637_v50  ;;  %2724 = vmatmul.msk.bf16.gmra.mxu0 %vm245_vm1, %v2990_v49  ;;  %2729 = vmatmul.msk.bf16.gmra.mxu1 %vm245_vm1, %v3532_v52 }
 0x264   : > { %2739 = vmatmul.msk.bf16.gmra.mxu3 %vm245_vm1, %v3428_v62  ;;  %v1706_v19 = vpop.f32.mrf.mxu2 }
 0x265   : > { %v1720_v46 = vadd.f32 %v1706_v19, %v1678_v18 }
 0x267   : > { %v1751_v41 = vpop.f32.mrf.mxu3  ;;  %v3974_v16 = vadd.f32 %v1748_v58, %v1720_v46 }
 0x268   : > { %v1627_v22 = vpop.f32.mrf.mxu0  ;;  %v1669_v30 = vpop.f32.mrf.mxu1 }
 0x269   : > { %2734 = vmatmul.msk.bf16.gmra.mxu2 %vm245_vm1, %v3306_v8  ;;  %v2364_v22 = vrot.slane %v3765_v27, 1 }
 0x26c   : > { %v1709_v32 = vpop.f32.mrf.mxu2 }
 0x26d   : > { %v1721_v3 = vadd.f32 %v1709_v32, %v1679_v1 }
 0x26f   : > { %v1753_v59 = vpop.f32.mrf.mxu3  ;;  %v3978_v63 = vadd.f32 %v1751_v41, %v1721_v3  ;;  %v4290_v41 = vld [vmem:[#allocation6_spill] sm:$0xff] }
 0x270   : > { %v1834_v21 = vpop.f32.mrf.mxu0  ;;  %v1937_v11 = vpop.f32.mrf.mxu1  ;;  %v4291_v3 = vld [vmem:[#allocation18_spill] sm:$0xff] }
 0x271   : > { %v1858_v52 = vadd.f32 %v1834_v21, %v3924_v15  ;;  %v4293_v55 = vmax.f32 %v4291_v3, %v4292_v26  ;;  %v4302_v26 = vld [vmem:[#allocation2_spill] sm:$0xff] }
 0x273   : > { %v1961_v62 = vadd.f32 %v1937_v11, %v1858_v52  ;;  %2725 = vmatmul.msk.bf16.gmra.mxu0 %vm245_vm1, %v3829_v33  ;;  %2730 = vmatmul.msk.bf16.gmra.mxu1 %vm245_vm1, %v4286_v36 }
 0x274   : > { %2740 = vmatmul.msk.bf16.gmra.mxu3 %vm245_vm1, %v3449_v17  ;;  %v1711_v8 = vpop.f32.mrf.mxu2 }
 0x277   : > { %v3987_v42 = vpop.f32.mrf.mxu3 }
 0x278   : > { %v1836_v0 = vpop.f32.mrf.mxu0  ;;  %v1939_v40 = vpop.f32.mrf.mxu1 }
 0x279   : > { %v1859_v31 = vadd.f32 %v1836_v0, %v3932_v37  ;;  %2735 = vmatmul.msk.bf16.gmra.mxu2 %vm245_vm1, %v3338_v9  ;;  %v4288_v37 = vld [vmem:[#allocation19_spill] sm:$0xff]  ;;  %v4295_v0 = vmax.f32 %v3576_v28, %v3778_v61 }
 0x27b   : > { %v1962_v15 = vadd.f32 %v1939_v40, %v1859_v31 }
 0x27c   : > { %v2003_v24 = vpop.f32.mrf.mxu2 }
 0x27d   : > { %v2027_v18 = vadd.f32 %v2003_v24, %v1961_v62  ;;  %v4294_v62 = vld [vmem:[#allocation20_spill] sm:$0xff] }
 0x27f   : > { %v3992_v33 = vpop.f32.mrf.mxu3  ;;  %v3997_v45 = vmax.f32 %v4287_v44, %v2027_v18  ;;  %v2366_v18 = vrot.slane %v3801_v48, 1 }
 0x280   : > { %v1839_v17 = vpop.f32.mrf.mxu0  ;;  %v1942_v58 = vpop.f32.mrf.mxu1 }
 0x281   : > { %v1860_v25 = vadd.f32 %v1839_v17, %v3937_v47 }
 0x283   : > { %v1963_v2 = vadd.f32 %v1942_v58, %v1860_v25  ;;  %2726 = vmatmul.msk.bf16.gmra.mxu0 %vm245_vm1, %v3361_v35  ;;  %2731 = vmatmul.msk.bf16.gmra.mxu1 %vm245_vm1, %v4288_v37  ;;  %v4296_v58 = vld [vmem:[#allocation21_spill] sm:$0xff]  ;;  %v4297_v25 = vld [vmem:[#allocation10_spill] sm:$0xff] }
 0x284   : > { %2741 = vmatmul.msk.bf16.gmra.mxu3 %vm245_vm1, %v3445_v34  ;;  %v2005_v9 = vpop.f32.mrf.mxu2  ;;  %v2363_v34 = vrot.slane %v4290_v41, 1 }
 0x285   : > { %v2028_v50 = vadd.f32 %v2005_v9, %v1962_v15 }
 0x287   : > { %v4006_v1 = vpop.f32.mrf.mxu3  ;;  %v4011_v23 = vmax.f32 %v4289_v54, %v2028_v50 }
 0x288   : > { %v1841_v47 = vpop.f32.mrf.mxu0  ;;  %v1944_v49 = vpop.f32.mrf.mxu1 }
 0x289   : > { %v1861_v19 = vadd.f32 %v1841_v47, %v3946_v10  ;;  %2736 = vmatmul.msk.bf16.gmra.mxu2 %vm245_vm1, %v3365_v39  ;;  %v2365_v39 = vsel %vm963_vm3, %v2363_v34, %v2364_v22 }
 0x28b   : > { %v1964_v35 = vadd.f32 %v1944_v49, %v1861_v19  ;;  %v4300_v49 = vld [vmem:[#allocation12_spill] sm:$0xff] }
 0x28c   : > { %v2008_v46 = vpop.f32.mrf.mxu2  ;;  %v4301_v19 = vmax.f32 %v3602_v29, %v4300_v49 }
 0x28d   : > { %v2029_v30 = vadd.f32 %v2008_v46, %v1963_v2  ;;  %v4298_v2 = vmax.f32 %v4296_v58, %v4297_v25  ;;  %v4310_v58 = vld [vmem:[#allocation7_spill] sm:$0xff] }
 0x28f   : > { %v4018_v32 = vpop.f32.mrf.mxu3  ;;  %v4023_v59 = vmax.f32 %v4293_v55, %v2029_v30  ;;  %v4303_v55 = vld [vmem:[#allocation14_spill] sm:$0xff] }
 0x290   : > { %v1844_v21 = vpop.f32.mrf.mxu0  ;;  %v1947_v11 = vpop.f32.mrf.mxu1 }
 0x291   : > { %v1862_v10 = vadd.f32 %v1844_v21, %v3951_v43  ;;  %v4304_v21 = vmax.f32 %v4302_v26, %v4303_v55 }
 0x293   : > { %v1965_v52 = vadd.f32 %v1947_v11, %v1862_v10  ;;  %2742 = vmatmul.msk.bf16.vlgmr.msra.gmra.mxu0 %vm245_vm1, %v4294_v62  ;;  %2747 = vmatmul.msk.bf16.vlgmr.msra.gmra.mxu1 %vm245_vm1, %v3786_v57 }
 0x294   : > { %2757 = vmatmul.msk.bf16.vlgmr.msra.gmra.mxu3 %vm245_vm1, %v2365_v39  ;;  %v2010_v27 = vpop.f32.mrf.mxu2 }
 0x295   : > { %v2030_v36 = vadd.f32 %v2010_v27, %v1964_v35 }
 0x297   : > { %v4032_v8 = vpop.f32.mrf.mxu3  ;;  %v4037_v40 = vmax.f32 %v4295_v0, %v2030_v36  ;;  %v4306_v36 = vld [vmem:[#allocation9_spill] sm:$0xff]  ;;  %v4307_v0 = vld [vmem:[#allocation15_spill] sm:$0xff] }
 0x298   : > { %v1846_v43 = vpop.f32.mrf.mxu0  ;;  %v1949_v31 = vpop.f32.mrf.mxu1 }
 0x299   : > { %v1863_v15 = vadd.f32 %v1846_v43, %v3960_v12  ;;  %2752 = vmatmul.msk.bf16.vlgmr.msra.gmra.mxu2 %vm245_vm1, %v3811_v38  ;;  %v2367_v12 = vsel %vm963_vm3, %v2364_v22, %v2366_v18  ;;  %v4299_v38 = vld [vmem:[#allocation3_spill] sm:$0xff]  ;;  %v2368_v22 = vrot.slane %v3847_v56, 1  ;;  %v4308_v43 = vmax.f32 %v4306_v36, %v4307_v0 }
 0x29b   : > { %v1966_v24 = vadd.f32 %v1949_v31, %v1863_v15 }
 0x29c   : > { %v2013_v57 = vpop.f32.mrf.mxu2 }
 0x29d   : > { %v2031_v44 = vadd.f32 %v2013_v57, %v1965_v52  ;;  %v2370_v57 = vrot.slane %v3886_v20, 1 }
 0x29f   : > { %v4043_v17 = vpop.f32.mrf.mxu3  ;;  %v4048_v28 = vmax.f32 %v4298_v2, %v2031_v44  ;;  %v4309_v44 = vld [vmem:[#allocation11_spill] sm:$0xff] }
 0x2a0   : > { %v1849_v61 = vpop.f32.mrf.mxu0  ;;  %v1952_v37 = vpop.f32.mrf.mxu1  ;;  %v4311_v25 = vmax.f32 %v4309_v44, %v4310_v58 }
 0x2a1   : > { %v1864_v9 = vadd.f32 %v1849_v61, %v3965_v6 }
 0x2a3   : > { %v1967_v50 = vadd.f32 %v1952_v37, %v1864_v9  ;;  %2743 = vmatmul.msk.bf16.gmra.mxu0 %vm245_vm1, %v4299_v38  ;;  %2748 = vmatmul.msk.bf16.gmra.mxu1 %vm245_vm1, %v3834_v4  ;;  %v4312_v38 = vld [vmem:[#allocation13_spill] sm:$0xff] }
 0x2a4   : > { %2758 = vmatmul.msk.bf16.gmra.mxu3 %vm245_vm1, %v2367_v12  ;;  %v2015_v48 = vpop.f32.mrf.mxu2  ;;  %v2371_v12 = vsel %vm963_vm3, %v2368_v22, %v2370_v57 }
 0x2a5   : > { %v2032_v54 = vadd.f32 %v2015_v48, %v1966_v24 }
 0x2a7   : > { %v4057_v47 = vpop.f32.mrf.mxu3  ;;  %v4062_v35 = vmax.f32 %v4301_v19, %v2032_v54 }
 0x2a8   : > { %v1851_v6 = vpop.f32.mrf.mxu0  ;;  %v1954_v46 = vpop.f32.mrf.mxu1 }
 0x2a9   : > { %v1865_v41 = vadd.f32 %v1851_v6, %v3974_v16  ;;  %2753 = vmatmul.msk.bf16.gmra.mxu2 %vm245_vm1, %v3856_v7  ;;  %v2369_v16 = vsel %vm963_vm3, %v2366_v18, %v2368_v22  ;;  %v4305_v7 = vld [vmem:[#allocation4_spill] sm:$0xff] }
 0x2ab   : > { %v1968_v34 = vadd.f32 %v1954_v46, %v1865_v41 }
 0x2ac   : > { %v2018_v4 = vpop.f32.mrf.mxu2 }
 0x2ad   : > { %v2033_v30 = vadd.f32 %v2018_v4, %v1967_v50 }
 0x2af   : > { %v4068_v3 = vpop.f32.mrf.mxu3  ;;  %v4073_v29 = vmax.f32 %v4304_v21, %v2033_v30  ;;  %v4313_v30 = vld [vmem:[#allocation5_spill] sm:$0xff] }
 0x2b0   : > { %v1854_v11 = vpop.f32.mrf.mxu0  ;;  %v1957_v10 = vpop.f32.mrf.mxu1 }
 0x2b1   : > { %v1866_v39 = vadd.f32 %v1854_v11, %v3978_v63 }
 0x2b3   : > { %v1969_v52 = vadd.f32 %v1957_v10, %v1866_v39  ;;  %2744 = vmatmul.msk.bf16.gmra.mxu0 %vm245_vm1, %v4305_v7  ;;  %2749 = vmatmul.msk.bf16.gmra.mxu1 %vm245_vm1, %v3873_v13 }
 0x2b4   : > { %2759 = vmatmul.msk.bf16.gmra.mxu3 %vm245_vm1, %v2369_v16  ;;  %v2020_v56 = vpop.f32.mrf.mxu2 }
 0x2b5   : > { %v2034_v62 = vadd.f32 %v2020_v56, %v1968_v34 }
 0x2b7   : > { %v4082_v27 = vpop.f32.mrf.mxu3  ;;  %v4087_v31 = vmax.f32 %v4308_v43, %v2034_v62 }
 0x2b8   : > { %v1856_v63 = vpop.f32.mrf.mxu0  ;;  %v1959_v15 = vpop.f32.mrf.mxu1 }
 0x2b9   : > { %2754 = vmatmul.msk.bf16.gmra.mxu2 %vm245_vm1, %v3893_v14 }
 0x2bc   : > { %v2023_v24 = vpop.f32.mrf.mxu2 }
 0x2bd   : > { %v2035_v13 = vadd.f32 %v2023_v24, %v1969_v52 }
 0x2bf   : > { %v2076_v18 = vpop.f32.mrf.mxu3  ;;  %v4095_v2 = vmax.f32 %v4311_v25, %v2035_v13 }
 0x2c0   : > { %v2087_v61 = vpop.f32.mrf.mxu0  ;;  %v2120_v37 = vpop.f32.mrf.mxu1 }
 0x2c1   : > { %v2088_v9 = vadd.f32 %v2087_v61, %v3987_v42 }
 0x2c3   : > { %v2144_v50 = vadd.f32 %v2120_v37, %v2088_v9  ;;  %2745 = vmatmul.msk.bf16.gmra.mxu0 %vm245_vm1, %v4312_v38  ;;  %2750 = vmatmul.msk.bf16.gmra.mxu1 %vm245_vm1, %v3904_v60 }
 0x2c4   : > { %2760 = vmatmul.msk.bf16.gmra.mxu3 %vm245_vm1, %v2371_v12  ;;  %v2025_v20 = vpop.f32.mrf.mxu2 }
 0x2c7   : > { %v2204_v14 = vpop.f32.mrf.mxu3 }
 0x2c8   : > { %v2089_v48 = vpop.f32.mrf.mxu0  ;;  %v2122_v54 = vpop.f32.mrf.mxu1 }
 0x2c9   : > { %v2090_v49 = vadd.f32 %v2089_v48, %v3992_v33  ;;  %2755 = vmatmul.msk.bf16.gmra.mxu2 %vm245_vm1, %v3916_v53 }
 0x2cb   : > { %v2145_v42 = vadd.f32 %v2122_v54, %v2090_v49 }
 0x2cc   : > { %v2162_v19 = vpop.f32.mrf.mxu2 }
 0x2cd   : > { %v2186_v6 = vadd.f32 %v2162_v19, %v2144_v50 }
 0x2cf   : > { %v2206_v46 = vpop.f32.mrf.mxu3  ;;  %v4107_v4 = vadd.f32 %v2204_v14, %v2186_v6 }
 0x2d0   : > { %v2092_v41 = vpop.f32.mrf.mxu0  ;;  %v2125_v34 = vpop.f32.mrf.mxu1 }
 0x2d1   : > { %v2093_v60 = vadd.f32 %v2092_v41, %v4006_v1 }
 0x2d3   : > { %v2146_v22 = vadd.f32 %v2125_v34, %v2093_v60  ;;  %2746 = vmatmul.msk.bf16.gmra.mxu0 %vm245_vm1, %v4313_v30  ;;  %2751 = vmatmul.msk.bf16.gmra.mxu1 %vm245_vm1, %v3922_v5 }
 0x2d4   : > { %2761 = vmatmul.msk.bf16.gmra.mxu3 %vm245_vm1, %v2370_v57  ;;  %v2164_v53 = vpop.f32.mrf.mxu2 }
 0x2d5   : > { %v2187_v33 = vadd.f32 %v2164_v53, %v2145_v42 }
 0x2d7   : > { %v2209_v26 = vpop.f32.mrf.mxu3  ;;  %v4115_v11 = vadd.f32 %v2206_v46, %v2187_v33 }
 0x2d8   : > { %v2094_v55 = vpop.f32.mrf.mxu0  ;;  %v2127_v21 = vpop.f32.mrf.mxu1 }
 0x2d9   : > { %v2095_v10 = vadd.f32 %v2094_v55, %v4018_v32  ;;  %2756 = vmatmul.msk.bf16.gmra.mxu2 %vm245_vm1, %v3910_v51 }
 0x2db   : > { %v2147_v1 = vadd.f32 %v2127_v21, %v2095_v10 }
 0x2dc   : > { %v2167_v39 = vpop.f32.mrf.mxu2 }
 0x2dd   : > { %v2188_v16 = vadd.f32 %v2167_v39, %v2146_v22 }
 0x2df   : > { %v2211_v52 = vpop.f32.mrf.mxu3  ;;  %v4120_v56 = vadd.f32 %v2209_v26, %v2188_v16 }
 0x2e0   : > { %v2097_v7 = vpop.f32.mrf.mxu0  ;;  %v2130_v5 = vpop.f32.mrf.mxu1 }
 0x2e1   : > { %v2098_v62 = vadd.f32 %v2097_v7, %v4032_v8 }
 0x2e3   : > { %v2148_v36 = vadd.f32 %v2130_v5, %v2098_v62 }
 0x2e4   : > { %v2169_v0 = vpop.f32.mrf.mxu2 }
 0x2e5   : > { %v2189_v43 = vadd.f32 %v2169_v0, %v2147_v1 }
 0x2e7   : > { %v2214_v63 = vpop.f32.mrf.mxu3  ;;  %v4123_v32 = vadd.f32 %v2211_v52, %v2189_v43 }
 0x2e8   : > { %v2099_v15 = vpop.f32.mrf.mxu0  ;;  %v2132_v24 = vpop.f32.mrf.mxu1 }
 0x2e9   : > { %v2100_v51 = vadd.f32 %v2099_v15, %v4043_v17  ;;  %v4144_v15 = vld [vmem:[%s4200_s2] ss:$0 sm:$0xff] }
 0x2eb   : > { %v2149_v57 = vadd.f32 %v2132_v24, %v2100_v51 }
 0x2ec   : > { %v2172_v13 = vpop.f32.mrf.mxu2 }
 0x2ed   : > { %v2190_v18 = vadd.f32 %v2172_v13, %v2148_v36 }
 0x2ef   : > { %v2216_v44 = vpop.f32.mrf.mxu3  ;;  %v4126_v61 = vadd.f32 %v2214_v63, %v2190_v18 }
 0x2f0   : > { %v2102_v58 = vpop.f32.mrf.mxu0  ;;  %v2135_v25 = vpop.f32.mrf.mxu1 }
 0x2f1   : > { %v2103_v8 = vadd.f32 %v2102_v58, %v4057_v47 }
 0x2f3   : > { %v2150_v37 = vadd.f32 %v2135_v25, %v2103_v8 }
 0x2f4   : > { %v2174_v9 = vpop.f32.mrf.mxu2 }
 0x2f5   : > { %v2191_v12 = vadd.f32 %v2174_v9, %v2149_v57 }
 0x2f7   : > { %v2219_v50 = vpop.f32.mrf.mxu3  ;;  %v4129_v14 = vadd.f32 %v2216_v44, %v2191_v12 }
 0x2f8   : > { %v2104_v38 = vpop.f32.mrf.mxu0  ;;  %v2137_v20 = vpop.f32.mrf.mxu1 }
 0x2f9   : > { %v2105_v17 = vadd.f32 %v2104_v38, %v4068_v3 }
 0x2fb   : > { %v2151_v48 = vadd.f32 %v2137_v20, %v2105_v17 }
 0x2fc   : > { %v2177_v54 = vpop.f32.mrf.mxu2 }
 0x2fd   : > { %v2192_v49 = vadd.f32 %v2177_v54, %v2150_v37 }
 0x2ff   : > { %v2221_v42 = vpop.f32.mrf.mxu3  ;;  %v4132_v46 = vadd.f32 %v2219_v50, %v2192_v49 }
 0x300   : > { %v2107_v19 = vpop.f32.mrf.mxu0  ;;  %v2140_v6 = vpop.f32.mrf.mxu1 }
 0x301   : > { %v2108_v47 = vadd.f32 %v2107_v19, %v4082_v27 }
 0x303   : > { %v2152_v41 = vadd.f32 %v2140_v6, %v2108_v47 }
 0x304   : > { %v2179_v34 = vpop.f32.mrf.mxu2 }
 0x305   : > { %v2193_v60 = vadd.f32 %v2179_v34, %v2151_v48 }
 0x307   : > { %v2224_v22 = vpop.f32.mrf.mxu3  ;;  %v4135_v33 = vadd.f32 %v2221_v42, %v2193_v60 }
 0x308   : > { %v2109_v30 = vpop.f32.mrf.mxu0  ;;  %v2142_v53 = vpop.f32.mrf.mxu1 }
 0x30c   : > { %v2182_v26 = vpop.f32.mrf.mxu2 }
 0x30d   : > { %v2194_v3 = vadd.f32 %v2182_v26, %v2152_v41 }
 0x30f   : > { %v2226_v55 = vpop.f32.mrf.mxu3  ;;  %v4137_v1 = vadd.f32 %v2224_v22, %v2194_v3 }
 0x310   : > { %v2246_v21 = vpop.f32.mrf.mxu0  ;;  %v2288_v10 = vpop.f32.mrf.mxu1 }
 0x311   : > { %v2270_v27 = vadd.f32 %v2246_v21, %v4107_v4 }
 0x313   : > { %v2312_v5 = vadd.f32 %v2288_v10, %v2270_v27 }
 0x314   : > { %v2184_v39 = vpop.f32.mrf.mxu2 }
 0x317   : > { %v2396_v16 = vpop.f32.mrf.mxu3 }
 0x318   : > { %v2248_v52 = vpop.f32.mrf.mxu0  ;;  %v2290_v7 = vpop.f32.mrf.mxu1 }
 0x319   : > { %v2271_v43 = vadd.f32 %v2248_v52, %v4115_v11 }
 0x31b   : > { %v2313_v4 = vadd.f32 %v2290_v7, %v2271_v43 }
 0x31c   : > { %v2330_v62 = vpop.f32.mrf.mxu2 }
 0x31d   : > { %v2354_v36 = vadd.f32 %v2330_v62, %v2312_v5 }
 0x31f   : > { %v2398_v0 = vpop.f32.mrf.mxu3  ;;  %v2420_v63 = vadd.f32 %v2396_v16, %v2354_v36 }
 0x320   : > { %v2251_v24 = vpop.f32.mrf.mxu0  ;;  %v2293_v51 = vpop.f32.mrf.mxu1 }
 0x321   : > { %v2429_v57 = vmax.f32 %v3997_v45, %v2420_v63  ;;  %v2272_v8 = vadd.f32 %v2251_v24, %v4120_v56 }
 0x323   : > { %v2442_v13 = vadd.f32 %v4144_v15, %v2429_v57  ;;  %v2314_v50 = vadd.f32 %v2293_v51, %v2272_v8 }
 0x324   : > { %v2332_v18 = vpop.f32.mrf.mxu2 }
 0x325   : > { %v2451_v44 = vmax.f32 %v2442_v13, 0.0  ;;  %v2355_v58 = vadd.f32 %v2332_v18, %v2313_v4 }
 0x327   : > { %v2401_v11 = vpop.f32.mrf.mxu3  ;;  %v2460_v25 = vpack.c.bf16 %v2451_v44, %v2451_v44  ;;  %v2421_v37 = vadd.f32 %v2398_v0, %v2355_v58 }
 0x328   : > { %v2253_v45 = vpop.f32.mrf.mxu0  ;;  %v2295_v9 = vpop.f32.mrf.mxu1 }
 0x329   : > { %2470 = vst.msk [vmem:[%s4152_s16] sm:$0xf] %vm2469_vm4, %v2460_v25  ;;  %v2430_v12 = vmax.f32 %v4011_v23, %v2421_v37  ;;  %v2273_v42 = vadd.f32 %v2253_v45, %v4123_v32 }
 0x32b   : > { %v2443_v38 = vadd.f32 %v4144_v15, %v2430_v12  ;;  %v2315_v41 = vadd.f32 %v2295_v9, %v2273_v42 }
 0x32c   : > { %v2335_v20 = vpop.f32.mrf.mxu2 }
 0x32d   : > { %v2452_v17 = vmax.f32 %v2443_v38, 0.0  ;;  %v2356_v48 = vadd.f32 %v2335_v20, %v2314_v50 }
 0x32f   : > { %v2403_v54 = vpop.f32.mrf.mxu3  ;;  %v2461_v49 = vpack.c.bf16 %v2452_v17, %v2452_v17  ;;  %v2422_v19 = vadd.f32 %v2401_v11, %v2356_v48 }
 0x330   : > { %v2256_v56 = vpop.f32.mrf.mxu0  ;;  %v2298_v6 = vpop.f32.mrf.mxu1 }
 0x331   : > { %2471 = vst.msk [vmem:[%s4152_s16 + $0x4] sm:$0xf] %vm2469_vm4, %v2461_v49  ;;  %v2431_v47 = vmax.f32 %v4023_v59, %v2422_v19  ;;  %v2274_v26 = vadd.f32 %v2256_v56, %v4126_v61 }
 0x333   : > { %v2444_v23 = vadd.f32 %v4144_v15, %v2431_v47  ;;  %v2316_v10 = vadd.f32 %v2298_v6, %v2274_v26 }
 0x334   : > { %v2337_v34 = vpop.f32.mrf.mxu2 }
 0x335   : > { %v2453_v60 = vmax.f32 %v2444_v23, 0.0  ;;  %v2357_v22 = vadd.f32 %v2337_v34, %v2315_v41 }
 0x337   : > { %v2406_v30 = vpop.f32.mrf.mxu3  ;;  %v2462_v53 = vpack.c.bf16 %v2453_v60, %v2453_v60  ;;  %v2423_v3 = vadd.f32 %v2403_v54, %v2357_v22 }
 0x338   : > { %v2258_v32 = vpop.f32.mrf.mxu0  ;;  %v2300_v55 = vpop.f32.mrf.mxu1 }
 0x339   : > { %2472 = vst.msk [vmem:[%s4152_s16 + $0x8] sm:$0xf] %vm2469_vm4, %v2462_v53  ;;  %v2432_v21 = vmax.f32 %v4037_v40, %v2423_v3  ;;  %v2275_v5 = vadd.f32 %v2258_v32, %v4129_v14 }
 0x33b   : > { %v2445_v59 = vadd.f32 %v4144_v15, %v2432_v21  ;;  %v2317_v43 = vadd.f32 %v2300_v55, %v2275_v5 }
 0x33c   : > { %v2340_v39 = vpop.f32.mrf.mxu2 }
 0x33d   : > { %v2454_v16 = vmax.f32 %v2445_v59, 0.0  ;;  %v2358_v27 = vadd.f32 %v2340_v39, %v2316_v10 }
 0x33f   : > { %v2408_v52 = vpop.f32.mrf.mxu3  ;;  %v2463_v7 = vpack.c.bf16 %v2454_v16, %v2454_v16  ;;  %v2424_v62 = vadd.f32 %v2406_v30, %v2358_v27 }
 0x340   : > { %v2261_v61 = vpop.f32.mrf.mxu0  ;;  %v2303_v36 = vpop.f32.mrf.mxu1 }
 0x341   : > { %2473 = vst.msk [vmem:[%s4152_s16 + $0xc] sm:$0xf] %vm2469_vm4, %v2463_v7  ;;  %v2433_v0 = vmax.f32 %v4048_v28, %v2424_v62  ;;  %v2276_v13 = vadd.f32 %v2261_v61, %v4132_v46 }
 0x343   : > { %v2446_v40 = vadd.f32 %v4144_v15, %v2433_v0  ;;  %v2318_v11 = vadd.f32 %v2303_v36, %v2276_v13 }
 0x344   : > { %v2342_v63 = vpop.f32.mrf.mxu2 }
 0x345   : > { %v2455_v24 = vmax.f32 %v2446_v40, 0.0  ;;  %v2359_v51 = vadd.f32 %v2342_v63, %v2317_v43 }
 0x347   : > { %v2411_v57 = vpop.f32.mrf.mxu3  ;;  %v2464_v4 = vpack.c.bf16 %v2455_v24, %v2455_v24  ;;  %v2425_v18 = vadd.f32 %v2408_v52, %v2359_v51 }
 0x348   : > { %v2263_v14 = vpop.f32.mrf.mxu0  ;;  %v2305_v44 = vpop.f32.mrf.mxu1 }
 0x349   : > { %2474 = vst.msk [vmem:[%s4152_s16 + $0x10] sm:$0xf] %vm2469_vm4, %v2464_v4  ;;  %v2434_v58 = vmax.f32 %v4062_v35, %v2425_v18  ;;  %v2277_v12 = vadd.f32 %v2263_v14, %v4135_v33 }
 0x34b   : > { %v2447_v28 = vadd.f32 %v4144_v15, %v2434_v58  ;;  %v2319_v17 = vadd.f32 %v2305_v44, %v2277_v12 }
 0x34c   : > { %v2345_v25 = vpop.f32.mrf.mxu2 }
 0x34d   : > { %v2456_v8 = vmax.f32 %v2447_v28, 0.0  ;;  %v2360_v37 = vadd.f32 %v2345_v25, %v2318_v11 }
 0x34f   : > { %v2413_v45 = vpop.f32.mrf.mxu3  ;;  %v2465_v9 = vpack.c.bf16 %v2456_v8, %v2456_v8  ;;  %v2426_v50 = vadd.f32 %v2411_v57, %v2360_v37 }
 0x350   : > { %v2266_v46 = vpop.f32.mrf.mxu0  ;;  %v2308_v38 = vpop.f32.mrf.mxu1 }
 0x351   : > { %2475 = vst.msk [vmem:[%s4152_s16 + $0x14] sm:$0xf] %vm2469_vm4, %v2465_v9  ;;  %v2435_v20 = vmax.f32 %v4073_v29, %v2426_v50  ;;  %v2278_v56 = vadd.f32 %v2266_v46, %v4137_v1 }
 0x353   : > { %v2448_v35 = vadd.f32 %v4144_v15, %v2435_v20  ;;  %v2320_v29 = vadd.f32 %v2308_v38, %v2278_v56 }
 0x354   : > { %v2347_v48 = vpop.f32.mrf.mxu2 }
 0x355   : > { %v2457_v54 = vmax.f32 %v2448_v35, 0.0  ;;  %v2361_v49 = vadd.f32 %v2347_v48, %v2319_v17 }
 0x357   : > { %v2416_v42 = vpop.f32.mrf.mxu3  ;;  %v2466_v19 = vpack.c.bf16 %v2457_v54, %v2457_v54  ;;  %v2427_v33 = vadd.f32 %v2413_v45, %v2361_v49 }
 0x358   : > { %v2268_v6 = vpop.f32.mrf.mxu0  ;;  %v2310_v47 = vpop.f32.mrf.mxu1 }
 0x359   : > { %2476 = vst.msk [vmem:[%s4152_s16 + $0x18] sm:$0xf] %vm2469_vm4, %v2466_v19  ;;  %v2436_v41 = vmax.f32 %v4087_v31, %v2427_v33 }
 0x35b   : > { %v2449_v23 = vadd.f32 %v4144_v15, %v2436_v41 }
 0x35c   : > { %v2350_v34 = vpop.f32.mrf.mxu2 }
 0x35d   : > { %v2458_v60 = vmax.f32 %v2449_v23, 0.0  ;;  %v2362_v22 = vadd.f32 %v2350_v34, %v2320_v29 }
 0x35f   : > { %v2418_v30 = vpop.f32.mrf.mxu3  ;;  %v2467_v53 = vpack.c.bf16 %v2458_v60, %v2458_v60  ;;  %v2428_v26 = vadd.f32 %v2416_v42, %v2362_v22 }
 0x361   : > { %2477 = vst.msk [vmem:[%s4152_s16 + $0x1c] sm:$0xf] %vm2469_vm4, %v2467_v53  ;;  %v2437_v1 = vmax.f32 %v4095_v2, %v2428_v26 }
 0x363   : > { %v2450_v3 = vadd.f32 %v4144_v15, %v2437_v1 }
 0x364   : > { %v2352_v32 = vpop.f32.mrf.mxu2 }
 0x365   : > { %v2459_v55 = vmax.f32 %v2450_v3, 0.0 }
 0x367   : > { %v2468_v21 = vpack.c.bf16 %v2459_v55, %v2459_v55 }
 0x369   : > { %2478 = vst.msk [vmem:[%s4152_s16 + $0x20] sm:$0xf] %vm2469_vm4, %v2468_v21 }
 0x36a PF: > { %s13_s12 = sadd.s32 1, %s2997_s12  }
 0x36b   : > { %p10_p4 = scmp.ge.s32.totalorder %s13_s12, 6  }
 0x36d   :  { %12 = sbr.rel (!%p10_p4) target bundleno = 1 (0x1), region = 73 }

// kernel: siamese_net.5
= control target key start
LH: loop header
LB: loop body
LE: loop exit
PB: predicated region body
PF: predicated region fallthrough
CT: control target
= control target key end

     0   :  { %vm224_vm0 = vcmask 523264   ;;  %vm242_vm1 = vcmask 257024   ;;  %s472_s1 = inlined_call_operand.vmem [shape: bf16[256,64], index: 1, kind: input, shape index: {}]   ;;  %s473_s0 = inlined_call_operand.vmem [shape: bf16[4,256], index: 0, kind: input, shape index: {}]   ;;  %s474_s3 = inlined_call_operand.vmem [shape: bf16[64,32], index: 3, kind: input, shape index: {}]   ;;  %s475_s2 = inlined_call_operand.vmem [shape: f32[1,64], index: 2, kind: input, shape index: {}]   ;;  %s476_s4 = inlined_call_operand.vmem [shape: f32[1,32], index: 4, kind: input, shape index: {}]   ;;  %s477_s5 = inlined_call_operand.vmem [shape: f32[4,32], index: 5, kind: output, shape index: {}]  }
   0x1   :  { %v351_v0 = vld [vmem:[%s472_s1 + $0x38] sm:$0xff]  ;;  %v350_v2 = vld [vmem:[%s472_s1 + $0x30] sm:$0xff]  ;;  %v21_v4 = vld [vmem:[%s473_s0] sm:$0xf] }
   0x2   :  { %v359_v1 = vld [vmem:[%s472_s1 + $0x78] sm:$0xff]  ;;  %160 = vmatpush.bf16.msra.mxu0 %v351_v0  ;;  %v358_v3 = vld [vmem:[%s472_s1 + $0x70] sm:$0xff]  ;;  %v349_v6 = vld [vmem:[%s472_s1 + $0x28] sm:$0xff]  ;;  %59 = vst [vmem:[#allocation1] ss:$4 sm:$0xff] %v21_v4 }
   0x3   :  { %173 = vmatpush.bf16.msra.mxu1 %v359_v1  ;;  %v363_v5 = vld [vmem:[%s474_s3 + $0x18] sm:$0xff]  ;;  %v357_v7 = vld [vmem:[%s472_s1 + $0x68] sm:$0xff]  ;;  %v362_v8 = vld [vmem:[%s474_s3 + $0x10] sm:$0xff] }
   0x4   :  { %232 = vmatpush.bf16.msra.mxu2 %v363_v5  ;;  %v348_v9 = vld [vmem:[%s472_s1 + $0x20] sm:$0xff]  ;;  %v347_v11 = vld [vmem:[%s472_s1 + $0x18] sm:$0xff]  ;;  %v346_v13 = vld [vmem:[%s472_s1 + $0x10] sm:$0xff] }
   0x5   :  { %v356_v10 = vld [vmem:[%s472_s1 + $0x60] sm:$0xff]  ;;  %v355_v12 = vld [vmem:[%s472_s1 + $0x58] sm:$0xff]  ;;  %v354_v14 = vld [vmem:[%s472_s1 + $0x50] sm:$0xff] }
   0x6   :  { %161 = vmatpush.bf16.msra.mxu0 %v350_v2  ;;  %v345_v15 = vld [vmem:[%s472_s1 + $0x8] sm:$0xff]  ;;  %v344_v17 = vld [vmem:[%s472_s1] sm:$0xff] }
   0x7   :  { %174 = vmatpush.bf16.msra.mxu1 %v358_v3  ;;  %v353_v16 = vld [vmem:[%s472_s1 + $0x48] sm:$0xff]  ;;  %v352_v18 = vld [vmem:[%s472_s1 + $0x40] sm:$0xff] }
   0x8   :  { %233 = vmatpush.bf16.msra.mxu2 %v362_v8  ;;  %v361_v21 = vld [vmem:[%s474_s3 + $0x8] sm:$0xff]  ;;  %v360_v22 = vld [vmem:[%s474_s3] sm:$0xff] }
   0x9   :  { %v60_v19 = vld.sshfl [vmem:[#allocation1] sm:$0xff pattern:$0x73625140]  ;;  %v61_v20 = vld.sshfl [vmem:[#allocation1 + $0x8] sm:$0xff pattern:$0x73625140] }
   0xa   :  { %162 = vmatpush.bf16.msra.mxu0 %v349_v6  ;;  %v364_v23 = vld [vmem:[%s475_s2] ss:$0 sm:$0xff] }
   0xb   :  { %175 = vmatpush.bf16.msra.mxu1 %v357_v7  ;;  %v365_v32 = vld [vmem:[%s476_s4] ss:$0 sm:$0xff] }
   0xc   :  { %234 = vmatpush.bf16.msra.mxu2 %v361_v21 }
   0xe   :  { %163 = vmatpush.bf16.msra.mxu0 %v348_v9 }
   0xf   :  { %176 = vmatpush.bf16.msra.mxu1 %v356_v10 }
  0x10   :  { %235 = vmatpush.bf16.msra.mxu2 %v360_v22 }
  0x12   :  { %164 = vmatpush.bf16.msra.mxu0 %v347_v11 }
  0x13   :  { %177 = vmatpush.bf16.msra.mxu1 %v355_v12 }
  0x16   :  { %165 = vmatpush.bf16.msra.mxu0 %v346_v13 }
  0x17   :  { %178 = vmatpush.bf16.msra.mxu1 %v354_v14 }
  0x1a   :  { %166 = vmatpush.bf16.msra.mxu0 %v345_v15 }
  0x1b   :  { %179 = vmatpush.bf16.msra.mxu1 %v353_v16 }
  0x1e   :  { %167 = vmatpush.bf16.msra.mxu0 %v344_v17 }
  0x1f   :  { %180 = vmatpush.bf16.msra.mxu1 %v352_v18 }
  0x21   :  { %168 = vmatmul.bf16.vlgmr.msra.gmra.mxu0 %v60_v19 }
  0x22   :  { %181 = vmatmul.bf16.vlgmr.msra.gmra.mxu1 %v61_v20 }
  0x9e   :  { %v169_v24 = vpop.f32.mrf.mxu0 }
  0x9f   :  { %v182_v25 = vpop.f32.mrf.mxu1  ;;  %v170_v26 = vadd.f32 %v364_v23, %v169_v24 }
  0xa1   :  { %v183_v27 = vadd.f32 %v182_v25, %v170_v26 }
  0xa3   :  { %v186_v28 = vmax.f32 %v183_v27, 0.0 }
  0xa5   :  { %v187_v29 = vpack.c.bf16 %v186_v28, %v186_v28 }
  0xa6   :  { %v171_v30 = vpop.f32.mrf.mxu0 }
  0xa7   :  { %v184_v31 = vpop.f32.mrf.mxu1  ;;  %343 = vmatmul.msk.bf16.vlgmr.msra.gmra.mxu2 %vm224_vm0, %v187_v29 }
 0x12a   :  { %v237_v33 = vpop.f32.mrf.mxu2 }
 0x12b   :  { %v238_v34 = vadd.f32 %v365_v32, %v237_v33 }
 0x12d   :  { %v241_v35 = vmul.f32 %v238_v34, %v238_v34 }
 0x12f   :  { %v243_v36 = vsel %vm242_vm1, %v241_v35, 0.0 }
 0x130   :  { %244 = vadd.xlane.f32.xlu0 %v243_v36 }
 0x132   :  { %v239_v37 = vpop.f32.mrf.mxu2 }
 0x1a3   :  { %v245_v38 = vpop.xlane.xlu0 %244 }
 0x1a4   :  { %v246_v39 = vmax.f32 %v245_v38, 1e-24 }
 0x1a6   :  { %366 = vrsqrt.f32 %v246_v39  ;;  %vm253_vm3 = vweird.f32 %v246_v39 }
 0x1ac   :  { %v367_v40 = vpop.eup %366 }
 0x1ad   :  { %v248_v41 = vmul.f32 %v367_v40, %v246_v39  ;;  %vm254_vm2 = vweird.f32 %v367_v40 }
 0x1ae   :  { %vm255_vm4 = vmor %vm253_vm3, %vm254_vm2 }
 0x1af   :  { %v249_v42 = vmul.f32 %v367_v40, %v248_v41 }
 0x1b1   :  { %v250_v43 = vmul.f32 0.5, %v249_v42 }
 0x1b3   :  { %v251_v44 = vsub.f32 1.5, %v250_v43 }
 0x1b5   :  { %v252_v45 = vmul.f32 %v367_v40, %v251_v44 }
 0x1b7   :  { %v256_v46 = vsel %vm255_vm4, %v367_v40, %v252_v45 }
 0x1b8   :  { %v257_v47 = vmul.f32 %v256_v46, %v238_v34 }
 0x1ba   :  { %258 = vst.msk [vmem:[%s477_s5] sm:$0xf] %vm242_vm1, %v257_v47 }

// kernel: siamese_net.4
= control target key start
LH: loop header
LB: loop body
LE: loop exit
PB: predicated region body
PF: predicated region fallthrough
CT: control target
= control target key end

     0   :  { %s1476_s12 = smov 0   ;;  %s1899_s0 = inlined_call_operand.vmem [shape: bf16[4,4,33,8], index: 0, kind: input, shape index: {}]   ;;  %s1900_s1 = inlined_call_operand.vmem [shape: bf16[9,8,16], index: 1, kind: input, shape index: {}]   ;;  %s1901_s2 = inlined_call_operand.vmem [shape: f32[1,16], index: 2, kind: input, shape index: {}]   ;;  %s1902_s3 = inlined_call_operand.vmem [shape: bf16[4,20,16], index: 3, kind: output, shape index: {}]  }
   0x1 LB: > { %s1306_s13 = sadd.s32 4294967295, %s1454_s12   ;;  %p1310_p0 = scmp.ge.s32.totalorder %s1454_s12, 1  ;;  %s1454_s12 = sphi %s1476_s12, %s13_s12  }
   0x2   : > { %p137_p1 = scmp.lt.s32.totalorder %s1454_s12, 5 }
   0x4   : > { %p138_p2 = pnand %p1310_p0, %p137_p1 }
   0x5   : > { %p161_p3 = scmp.lt.s32.totalorder (!%p138_p2), %s1306_s13, 3 }
   0x6   : > { %141 = sbr.rel (%p138_p2) target bundleno = 445 (0x1bd), region = 32 }
   0xb   : > { %v1325_v0 = vld [vmem:[%s1900_s1 + $0x4] sm:$0xf]  ;;  %vm209_vm0 = vcmask 1043456   ;;  %v191_v1 = vld [vmem:[%s1900_s1] sm:$0xf]  ;;  %s1904_s13 = smov (!%p161_p3, %s1306_s13), 3 }
   0xc   : > { %v1491_v2 = vsel %vm209_vm0, %v1325_v0, 0  ;;  %v1494_v3 = vsel %vm209_vm0, %v191_v1, 0  ;;  %v1341_v4 = vld [vmem:[%s1900_s1 + $0xc] sm:$0xf]  ;;  %v1338_v6 = vld [vmem:[%s1900_s1 + $0x8] sm:$0xf] }
   0xd   : > { %220 = vmatpush.bf16.msra.mxu0 %v1491_v2  ;;  %255 = vmatpush.bf16.msra.mxu1 %v1494_v3  ;;  %v1502_v5 = vsel %vm209_vm0, %v1341_v4, 0  ;;  %v1511_v7 = vsel %vm209_vm0, %v1338_v6, 0  ;;  %v1358_v8 = vld [vmem:[%s1900_s1 + $0x18] sm:$0xf]  ;;  %v1348_v9 = vld [vmem:[%s1900_s1 + $0x10] sm:$0xf] }
   0xe   : > { %338 = vmatpush.bf16.msra.mxu3 %v1502_v5  ;;  %s1437_s26 = smul.u32 80, %s1904_s13  ;;  %298 = vmatpush.bf16.msra.mxu2 %v1511_v7  ;;  %v1522_v10 = vsel %vm209_vm0, %v1358_v8, 0  ;;  %v1525_v11 = vsel %vm209_vm0, %v1348_v9, 0  ;;  %v1361_v12 = vld [vmem:[%s1900_s1 + $0x1c] sm:$0xf]  ;;  %vm202_vm1 = vcmask 64512  }
   0xf   : > { %v1533_v13 = vsel %vm209_vm0, %v1361_v12, 0  ;;  %v1355_v14 = vld [vmem:[%s1900_s1 + $0x14] sm:$0xf]  ;;  %vm268_vm2 = vsmask.f32 7424  ;;  %vm538_vm4 = vcmask 1044480  }
  0x10   : > { %s1541_s6 = scalar_lea.vmem %s1899_s0, %s1437_s26  ;;  %v1545_v15 = vsel %vm209_vm0, %v1355_v14, 0  ;;  %v1364_v33 = vld [vmem:[%s1900_s1 + $0x20] sm:$0xf]  ;;  %vm442_vm3 = vsmask.f32 5376  ;;  %s1438_s11 = smul.u32 12, %s1904_s13 }
  0x11   : > { %378 = vmatpush.bf16.msrb.mxu0 %v1525_v11  ;;  %v1548_v16 = vld [vmem:[%s1541_s6 + $0x14] sm:$0xff]  ;;  %v1551_v17 = vld [vmem:[%s1541_s6] sm:$0xff]  ;;  %v1554_v18 = vld [vmem:[%s1541_s6 + $0x28] sm:$0xff]  ;;  %423 = vmatpush.bf16.msrb.mxu1 %v1545_v15  ;;  %v1589_v34 = vsel %vm209_vm0, %v1364_v33, 0  ;;  %vm1246_vm5 = vcmask 125952   ;;  %vm1249_vm6 = vcmask 123904  }
  0x12   : > { %471 = vmatpush.bf16.msrb.mxu2 %v1522_v10  ;;  %522 = vmatpush.bf16.msrb.mxu3 %v1533_v13  ;;  %v1558_v19 = vld [vmem:[%s1541_s6 + $0x8] sm:$0xff]   ;;  %v269_v21 = vshrl.u32 %v1551_v17, 16  ;;  %v271_v22 = vshll.u32 %v1551_v17, 16  ;;  %v1572_v27 = vld [vmem:[%s1541_s6 + $0x1c] sm:$0xff]   ;;  %v1575_v29 = vld [vmem:[%s1541_s6 + $0x30] sm:$0xff]   ;;  %v396_v38 = vshll.u32 %v1554_v18, 16  ;;  %s170_s16 = scalar_lea.vmem %s1902_s3, %s1438_s11 }
  0x13   : > { %1330 = vmatmul.msk.bf16.vlgmr.msra.gmra.mxu0 %vm202_vm1, %v1548_v16  ;;  %1336 = vmatmul.msk.bf16.vlgmr.msra.gmra.mxu1 %vm202_vm1, %v1551_v17  ;;  %v1429_v20 = vunpack.c.l.b16 %v1558_v19  ;;  %v199_v31 = vunpack.c.l.b16 %v1572_v27  ;;  %v1433_v32 = vunpack.c.l.b16 %v1575_v29  ;;  %v498_v39 = vshrl.u32 %v1572_v27, 16  ;;  %v1621_v57 = vld [vmem:[%s1541_s6 + $0x3c] sm:$0xff]  ;;  %v1642_v4 = vld [vmem:[%s1541_s6 + $0x44] sm:$0xff]  }
  0x14   : > { %1346 = vmatmul.msk.bf16.vlgmr.msra.gmra.mxu3 %vm202_vm1, %v1554_v18  ;;  %v273_v24 = vrot.slane %v271_v22, 1  ;;  %v501_v40 = vshll.u32 %v1572_v27, 16  ;;  %v490_v41 = vshrl.u32 %v1548_v16, 16  ;;  %v493_v42 = vshll.u32 %v1548_v16, 16 }
  0x15   : > { %579 = vmatpush.bf16.msra.mxu1 %v1491_v2  ;;  %v238_v23 = vpack.c.b16 %v1429_v20, %v1429_v20  ;;  %558 = vmatpush.bf16.msra.mxu0 %v1589_v34  ;;  %v1592_v35 = vpack.c.b16 %v199_v31, %v199_v31  ;;  %v1594_v36 = vpack.c.b16 %v1433_v32, %v1433_v32  ;;  %v394_v44 = vshrl.u32 %v1554_v18, 16 }
  0x16   : > { %630 = vmatpush.bf16.msra.mxu3 %v1511_v7  ;;  %v274_v25 = vor.u32 %v273_v24, %v269_v21  ;;  %v398_v45 = vrot.slane %v396_v38, 1  ;;  %v500_v47 = vrot.slane %v498_v39, 2  ;;  %v503_v48 = vrot.slane %v501_v40, 3 }
  0x17   : > { %v275_v26 = vshll.u32 %v238_v23, 16  ;;  %v279_v37 = vshrl.u32 %v238_v23, 16  ;;  %v400_v46 = vshll.u32 %v1594_v36, 16  ;;  %v492_v49 = vrot.slane %v490_v41, 2 }
  0x18   : > { %v495_v50 = vrot.slane %v493_v42, 3  ;;  %v399_v51 = vor.u32 %v398_v45, %v394_v44  ;;  %v1616_v54 = vor.u32 %v503_v48, %v500_v47  ;;  %v447_v55 = vshrl.u32 %v1558_v19, 16 }
  0x19   : > { %v277_v28 = vrot.slane %v275_v26, 1  ;;  %v402_v52 = vrot.slane %v400_v46, 1  ;;  %v450_v56 = vshll.u32 %v1558_v19, 16  ;;  %v443_v59 = vrot.slane %v269_v21, 2 }
  0x1a   : > { %v496_v53 = vor.u32 %v495_v50, %v492_v49  ;;  %v444_v61 = vrot.slane %v271_v22, 3  ;;  %v449_v62 = vrot.slane %v447_v55, 2  ;;  %v359_v8 = vunpack.c.l.b16 %v1642_v4 }
  0x1b   : > { %v1578_v30 = vsel %vm268_vm2, %v274_v25, %v277_v28  ;;  %v1606_v43 = vor.u32 %v279_v37, %v277_v28  ;;  %v1624_v58 = vsel %vm268_vm2, %v399_v51, %v402_v52  ;;  %v452_v63 = vrot.slane %v450_v56, 3 }
  0x1c   : > { %1339 = vmatmul.msk.bf16.vlgmr.msra.gmra.mxu2 %vm202_vm1, %v1578_v30  ;;  %v1628_v60 = vsel %vm442_vm3, %v496_v53, %v1616_v54  ;;  %v445_v0 = vor.u32 %v444_v61, %v443_v59  ;;  %v404_v9 = vshrl.u32 %v1594_v36, 16  ;;  %v1653_v12 = vpack.c.b16 %v359_v8, %v359_v8 }
  0x1d   : > { %597 = vmatpush.bf16.msra.mxu2 %v1494_v3  ;;  %v1637_v1 = vor.u32 %v452_v63, %v449_v62  ;;  %v608_v20 = vrot.slane %v493_v42, 1  ;;  %v610_v21 = vshll.u32 %v1592_v35, 16  ;;  %v539_v22 = vrot.slane %v1551_v17, 3 }
  0x1e   : > { %v1655_v14 = vor.u32 %v404_v9, %v402_v52  ;;  %v614_v17 = vshrl.u32 %v1592_v35, 16  ;;  %v686_v31 = vshrl.u32 %v1621_v57, 16  ;;  %v692_v33 = vshll.u32 %v1653_v12, 16 }
  0x1f   : > { %v1646_v6 = vsel %vm442_vm3, %v445_v0, %v1637_v1  ;;  %v609_v24 = vor.u32 %v608_v20, %v490_v41  ;;  %v612_v25 = vrot.slane %v610_v21, 1  ;;  %v696_v40 = vshrl.u32 %v1653_v12, 16 }
  0x20   : > { %v694_v37 = vrot.slane %v692_v33, 1  ;;  %v768_v42 = vrot.slane %v1548_v16, 3  ;;  %v1757_v20 = vrot.slane %v394_v44, 2  ;;  %v925_v21 = vrot.slane %v396_v38, 3 }
  0x21   : > { %v613_v28 = vsel %vm268_vm2, %v609_v24, %v612_v25 }
  0x22   : > { %v1723_v41 = vor.u32 %v696_v40, %v694_v37 }
  0x23   : > { %1331 = vmatmul.msk.bf16.gmra.mxu0 %vm202_vm1, %v1592_v35  ;;  %1337 = vmatmul.msk.bf16.gmra.mxu1 %vm202_vm1, %v238_v23  ;;  %v1668_v23 = vrot.slane %v1558_v19, 3  ;;  %v616_v19 = vor.u32 %v614_v17, %v612_v25 }
  0x24   : > { %1347 = vmatmul.msk.bf16.gmra.mxu3 %vm202_vm1, %v1594_v36 }
  0x25   : > { %v1672_v26 = vsel %vm538_vm4, %v539_v22, %v1668_v23 }
  0x2c   : > { %1340 = vmatmul.msk.bf16.gmra.mxu2 %vm202_vm1, %v1606_v43 }
  0x33   : > { %1353 = vmatmul.msk.bf16.vlgmr.msrb.gmra.mxu0 %vm202_vm1, %v1621_v57  ;;  %1356 = vmatmul.msk.bf16.vlgmr.msrb.gmra.mxu1 %vm202_vm1, %v1624_v58 }
  0x34   : > { %1362 = vmatmul.msk.bf16.vlgmr.msrb.gmra.mxu3 %vm202_vm1, %v1628_v60  ;;  %651 = vmatpush.bf16.msrb.mxu0 %v1502_v5 }
  0x35   : > { %733 = vmatpush.bf16.msrb.mxu3 %v1522_v10  ;;  %672 = vmatpush.bf16.msrb.mxu1 %v1525_v11 }
  0x3c   : > { %1359 = vmatmul.msk.bf16.vlgmr.msrb.gmra.mxu2 %vm202_vm1, %v1646_v6 }
  0x3d   : > { %712 = vmatpush.bf16.msrb.mxu2 %v1545_v15 }
  0x43   : > { %1354 = vmatmul.msk.bf16.gmra.mxu0 %vm202_vm1, %v1653_v12  ;;  %1357 = vmatmul.msk.bf16.gmra.mxu1 %vm202_vm1, %v1655_v14 }
  0x44   : > { %1363 = vmatmul.msk.bf16.gmra.mxu3 %vm202_vm1, %v1616_v54 }
  0x4c   : > { %1360 = vmatmul.msk.bf16.gmra.mxu2 %vm202_vm1, %v1637_v1 }
  0x53   : > { %1365 = vmatmul.msk.bf16.vlgmr.msra.gmra.mxu0 %vm202_vm1, %v1672_v26  ;;  %1367 = vmatmul.msk.bf16.vlgmr.msra.gmra.mxu1 %vm202_vm1, %v1578_v30  ;;  %v688_v30 = vshll.u32 %v1621_v57, 16 }
  0x54   : > { %1371 = vmatmul.msk.bf16.vlgmr.msra.gmra.mxu3 %vm202_vm1, %v613_v28  ;;  %754 = vmatpush.bf16.msra.mxu0 %v1533_v13 }
  0x55   : > { %826 = vmatpush.bf16.msra.mxu3 %v1494_v3  ;;  %784 = vmatpush.bf16.msra.mxu1 %v1589_v34  ;;  %v690_v32 = vrot.slane %v688_v30, 1 }
  0x5c   : > { %1369 = vmatmul.msk.bf16.vlgmr.msra.gmra.mxu2 %vm202_vm1, %v1548_v16 }
  0x5d   : > { %808 = vmatpush.bf16.msra.mxu2 %v1491_v2 }
  0x63   : > { %1366 = vmatmul.msk.bf16.gmra.mxu0 %vm202_vm1, %v1668_v23  ;;  %1368 = vmatmul.msk.bf16.gmra.mxu1 %vm202_vm1, %v1606_v43  ;;  %v1729_v43 = vrot.slane %v1572_v27, 3 }
  0x64   : > { %1372 = vmatmul.msk.bf16.gmra.mxu3 %vm202_vm1, %v616_v19  ;;  %v926_v19 = vor.u32 %v925_v21, %v1757_v20 }
  0x65   : > { %v1733_v47 = vsel %vm538_vm4, %v768_v42, %v1729_v43 }
  0x6c   : > { %1370 = vmatmul.msk.bf16.gmra.mxu2 %vm202_vm1, %v1592_v35  ;;  %v691_v35 = vor.u32 %v690_v32, %v686_v31 }
  0x6e   : > { %v1711_v39 = vsel %vm268_vm2, %v691_v35, %v694_v37 }
  0x73   : > { %1373 = vmatmul.msk.bf16.vlgmr.msrb.gmra.mxu0 %vm202_vm1, %v1621_v57  ;;  %1375 = vmatmul.msk.bf16.vlgmr.msrb.gmra.mxu1 %vm202_vm1, %v1624_v58 }
  0x74   : > { %1379 = vmatmul.msk.bf16.vlgmr.msrb.gmra.mxu3 %vm202_vm1, %v1628_v60  ;;  %844 = vmatpush.bf16.msrb.mxu0 %v1511_v7 }
  0x75   : > { %907 = vmatpush.bf16.msrb.mxu3 %v1545_v15  ;;  %865 = vmatpush.bf16.msrb.mxu1 %v1502_v5 }
  0x7c   : > { %1377 = vmatmul.msk.bf16.vlgmr.msrb.gmra.mxu2 %vm202_vm1, %v1711_v39 }
  0x7d   : > { %886 = vmatpush.bf16.msrb.mxu2 %v1525_v11 }
  0x83   : > { %1374 = vmatmul.msk.bf16.gmra.mxu0 %vm202_vm1, %v1653_v12  ;;  %1376 = vmatmul.msk.bf16.gmra.mxu1 %vm202_vm1, %v1655_v14 }
  0x84   : > { %1380 = vmatmul.msk.bf16.gmra.mxu3 %vm202_vm1, %v1616_v54 }
  0x8c   : > { %1378 = vmatmul.msk.bf16.gmra.mxu2 %vm202_vm1, %v1723_v41 }
  0x90   : > { %v222_v45 = vpop.f32.mrf.mxu0  ;;  %v257_v46 = vpop.f32.mrf.mxu1 }
  0x91   : > { %v258_v48 = vadd.f32 %v257_v46, %v222_v45 }
  0x93   : > { %1381 = vmatmul.msk.bf16.vlgmr.msra.gmra.mxu0 %vm202_vm1, %v1672_v26  ;;  %1383 = vmatmul.msk.bf16.vlgmr.msra.gmra.mxu1 %vm202_vm1, %v1733_v47 }
  0x94   : > { %1387 = vmatmul.msk.bf16.vlgmr.msra.gmra.mxu3 %vm202_vm1, %v1554_v18  ;;  %949 = vmatpush.bf16.msra.mxu0 %v1522_v10 }
  0x95   : > { %1045 = vmatpush.bf16.msra.mxu3 %v1491_v2  ;;  %991 = vmatpush.bf16.msra.mxu1 %v1533_v13 }
  0x97   : > { %v340_v16 = vpop.f32.mrf.mxu3 }
  0x98   : > { %v224_v27 = vpop.f32.mrf.mxu0  ;;  %v259_v49 = vpop.f32.mrf.mxu1 }
  0x99   : > { %v260_v50 = vadd.f32 %v259_v49, %v224_v27  ;;  %v931_v49 = vshll.u32 %v1575_v29, 16 }
  0x9c   : > { %1385 = vmatmul.msk.bf16.vlgmr.msra.gmra.mxu2 %vm202_vm1, %v1621_v57 }
  0x9d   : > { %1021 = vmatpush.bf16.msra.mxu2 %v1589_v34 }
  0x9f   : > { %v300_v51 = vpop.f32.mrf.mxu2  ;;  %v342_v52 = vpop.f32.mrf.mxu3 }
  0xa0   : > { %v309_v53 = vadd.f32 %v300_v51, %v258_v48  ;;  %v227_v55 = vpop.f32.mrf.mxu0  ;;  %v262_v56 = vpop.f32.mrf.mxu1  ;;  %v966_v51 = vrot.slane %v686_v31, 2 }
  0xa1   : > { %v263_v59 = vadd.f32 %v262_v56, %v227_v55  ;;  %v933_v56 = vrot.slane %v931_v49, 3 }
  0xa2   : > { %v349_v61 = vadd.f32 %v340_v16, %v309_v53 }
  0xa3   : > { %1382 = vmatmul.msk.bf16.gmra.mxu0 %vm202_vm1, %v1668_v23  ;;  %1384 = vmatmul.msk.bf16.gmra.mxu1 %vm202_vm1, %v1729_v43 }
  0xa4   : > { %1388 = vmatmul.msk.bf16.gmra.mxu3 %vm202_vm1, %v1594_v36 }
  0xa7   : > { %v302_v2 = vpop.f32.mrf.mxu2  ;;  %v345_v62 = vpop.f32.mrf.mxu3 }
  0xa8   : > { %v310_v63 = vadd.f32 %v302_v2, %v260_v50  ;;  %v229_v0 = vpop.f32.mrf.mxu0  ;;  %v264_v8 = vpop.f32.mrf.mxu1  ;;  %v973_v50 = vshll.u32 %v1642_v4, 16  ;;  %v967_v2 = vrot.slane %v688_v30, 3 }
  0xaa   : > { %v350_v9 = vadd.f32 %v342_v52, %v310_v63  ;;  %v975_v63 = vrot.slane %v973_v50, 3 }
  0xac   : > { %1386 = vmatmul.msk.bf16.gmra.mxu2 %vm202_vm1, %v1653_v12 }
  0xaf   : > { %v305_v22 = vpop.f32.mrf.mxu2  ;;  %v347_v24 = vpop.f32.mrf.mxu3 }
  0xb0   : > { %v311_v25 = vadd.f32 %v305_v22, %v263_v59  ;;  %v380_v36 = vpop.f32.mrf.mxu0  ;;  %v425_v28 = vpop.f32.mrf.mxu1 }
  0xb1   : > { %v389_v17 = vadd.f32 %v380_v36, %v349_v61 }
  0xb2   : > { %v351_v32 = vadd.f32 %v345_v62, %v311_v25 }
  0xb3   : > { %v434_v33 = vadd.f32 %v425_v28, %v389_v17  ;;  %1389 = vmatmul.msk.bf16.vlgmr.msrb.gmra.mxu0 %vm202_vm1, %v1624_v58  ;;  %1391 = vmatmul.msk.bf16.vlgmr.msrb.gmra.mxu1 %vm202_vm1, %v1646_v6 }
  0xb4   : > { %1395 = vmatmul.msk.bf16.vlgmr.msrb.gmra.mxu3 %vm202_vm1, %v1672_v26  ;;  %1063 = vmatpush.bf16.msrb.mxu0 %v1494_v3 }
  0xb5   : > { %1123 = vmatpush.bf16.msrb.mxu3 %v1525_v11  ;;  %1081 = vmatpush.bf16.msrb.mxu1 %v1511_v7  ;;  %v928_v7 = vshrl.u32 %v1575_v29, 16 }
  0xb7   : > { %v307_v38 = vpop.f32.mrf.mxu2  ;;  %v524_v44 = vpop.f32.mrf.mxu3  ;;  %v930_v55 = vrot.slane %v928_v7, 2 }
  0xb8   : > { %v382_v35 = vpop.f32.mrf.mxu0  ;;  %v427_v37 = vpop.f32.mrf.mxu1 }
  0xb9   : > { %v390_v40 = vadd.f32 %v382_v35, %v350_v9  ;;  %v934_v8 = vor.u32 %v933_v56, %v930_v55  ;;  %v968_v9 = vor.u32 %v967_v2, %v966_v51 }
  0xbb   : > { %v435_v42 = vadd.f32 %v427_v37, %v390_v40  ;;  %v935_v36 = vsel %vm442_vm3, %v926_v19, %v934_v8  ;;  %v1807_v19 = vrot.slane %v1575_v29, 3 }
  0xbc   : > { %1393 = vmatmul.msk.bf16.vlgmr.msrb.gmra.mxu2 %vm202_vm1, %v1628_v60 }
  0xbd   : > { %1102 = vmatpush.bf16.msrb.mxu2 %v1502_v5  ;;  %v970_v5 = vshrl.u32 %v1642_v4, 16 }
  0xbf   : > { %v473_v6 = vpop.f32.mrf.mxu2  ;;  %v526_v45 = vpop.f32.mrf.mxu3  ;;  %v972_v62 = vrot.slane %v970_v5, 2 }
  0xc0   : > { %v482_v46 = vadd.f32 %v473_v6, %v434_v33  ;;  %v385_v48 = vpop.f32.mrf.mxu0  ;;  %v430_v3 = vpop.f32.mrf.mxu1 }
  0xc1   : > { %v391_v16 = vadd.f32 %v385_v48, %v351_v32  ;;  %v1790_v20 = vor.u32 %v975_v63, %v972_v62  ;;  %v1005_v32 = vrot.slane %v1554_v18, 3 }
  0xc2   : > { %v533_v11 = vadd.f32 %v524_v44, %v482_v46 }
  0xc3   : > { %v436_v27 = vadd.f32 %v430_v3, %v391_v16  ;;  %1390 = vmatmul.msk.bf16.gmra.mxu0 %vm202_vm1, %v1655_v14  ;;  %1392 = vmatmul.msk.bf16.gmra.mxu1 %vm202_vm1, %v1637_v1  ;;  %v1795_v30 = vsel %vm442_vm3, %v968_v9, %v1790_v20 }
  0xc4   : > { %1396 = vmatmul.msk.bf16.gmra.mxu3 %vm202_vm1, %v1668_v23 }
  0xc7   : > { %v475_v52 = vpop.f32.mrf.mxu2  ;;  %v529_v53 = vpop.f32.mrf.mxu3 }
  0xc8   : > { %v483_v59 = vadd.f32 %v475_v52, %v435_v42  ;;  %v387_v1 = vpop.f32.mrf.mxu0  ;;  %v432_v61 = vpop.f32.mrf.mxu1 }
  0xca   : > { %v534_v0 = vadd.f32 %v526_v45, %v483_v59 }
  0xcc   : > { %1394 = vmatmul.msk.bf16.gmra.mxu2 %vm202_vm1, %v1616_v54 }
  0xcf   : > { %v478_v31 = vpop.f32.mrf.mxu2  ;;  %v531_v21 = vpop.f32.mrf.mxu3 }
  0xd0   : > { %v484_v22 = vadd.f32 %v478_v31, %v436_v27  ;;  %v560_v24 = vpop.f32.mrf.mxu0  ;;  %v581_v25 = vpop.f32.mrf.mxu1 }
  0xd1   : > { %v1797_v28 = vadd.f32 %v560_v24, %v533_v11  ;;  %v1200_v24 = vrot.slane %v1621_v57, 3 }
  0xd2   : > { %v535_v17 = vadd.f32 %v529_v53, %v484_v22 }
  0xd3   : > { %1397 = vmatmul.msk.bf16.vlgmr.msra.gmra.mxu0 %vm202_vm1, %v935_v36  ;;  %1399 = vmatmul.msk.bf16.vlgmr.msra.gmra.mxu1 %vm202_vm1, %v1795_v30 }
  0xd4   : > { %1403 = vmatmul.msk.bf16.vlgmr.msra.gmra.mxu3 %vm202_vm1, %v1624_v58  ;;  %1144 = vmatpush.bf16.msra.mxu0 %v1545_v15  ;;  %v1815_v58 = vsel %vm538_vm4, %v1005_v32, %v1807_v19 }
  0xd5   : > { %1216 = vmatpush.bf16.msra.mxu3 %v1589_v34  ;;  %1165 = vmatpush.bf16.msra.mxu1 %v1522_v10 }
  0xd7   : > { %v480_v33 = vpop.f32.mrf.mxu2  ;;  %v632_v38 = vpop.f32.mrf.mxu3 }
  0xd8   : > { %v562_v44 = vpop.f32.mrf.mxu0  ;;  %v583_v35 = vpop.f32.mrf.mxu1 }
  0xd9   : > { %v1811_v37 = vadd.f32 %v562_v44, %v534_v0 }
  0xdc   : > { %1401 = vmatmul.msk.bf16.vlgmr.msra.gmra.mxu2 %vm202_vm1, %v1815_v58 }
  0xdd   : > { %1186 = vmatpush.bf16.msra.mxu2 %v1533_v13 }
  0xdf   : > { %v599_v15 = vpop.f32.mrf.mxu2  ;;  %v634_v18 = vpop.f32.mrf.mxu3 }
  0xe0   : > { %v600_v29 = vadd.f32 %v599_v15, %v581_v25  ;;  %v565_v34 = vpop.f32.mrf.mxu0  ;;  %v586_v10 = vpop.f32.mrf.mxu1  ;;  %v1201_v25 = vrot.slane %v1642_v4, 3 }
  0xe1   : > { %v1820_v40 = vadd.f32 %v565_v34, %v535_v17 }
  0xe2   : > { %v641_v42 = vadd.f32 %v632_v38, %v600_v29 }
  0xe3   : > { %1398 = vmatmul.msk.bf16.gmra.mxu0 %vm202_vm1, %v934_v8  ;;  %1400 = vmatmul.msk.bf16.gmra.mxu1 %vm202_vm1, %v1790_v20 }
  0xe4   : > { %1404 = vmatmul.msk.bf16.gmra.mxu3 %vm202_vm1, %v1655_v14 }
  0xe7   : > { %v601_v6 = vpop.f32.mrf.mxu2  ;;  %v637_v45 = vpop.f32.mrf.mxu3 }
  0xe8   : > { %v602_v46 = vadd.f32 %v601_v6, %v583_v35  ;;  %v567_v13 = vpop.f32.mrf.mxu0  ;;  %v588_v48 = vpop.f32.mrf.mxu1 }
  0xea   : > { %v642_v3 = vadd.f32 %v634_v18, %v602_v46 }
  0xec   : > { %1402 = vmatmul.msk.bf16.gmra.mxu2 %vm202_vm1, %v1807_v19 }
  0xef   : > { %v604_v16 = vpop.f32.mrf.mxu2  ;;  %v639_v11 = vpop.f32.mrf.mxu3 }
  0xf0   : > { %v605_v27 = vadd.f32 %v604_v16, %v586_v10  ;;  %v653_v7 = vpop.f32.mrf.mxu0  ;;  %v674_v49 = vpop.f32.mrf.mxu1 }
  0xf1   : > { %v662_v5 = vadd.f32 %v653_v7, %v641_v42 }
  0xf2   : > { %v643_v50 = vadd.f32 %v637_v45, %v605_v27 }
  0xf3   : > { %v683_v51 = vadd.f32 %v674_v49, %v662_v5  ;;  %1405 = vmatmul.msk.bf16.vlgmr.msrb.gmra.mxu0 %vm202_vm1, %v1621_v57  ;;  %1407 = vmatmul.msk.bf16.vlgmr.msrb.gmra.mxu1 %vm202_vm1, %v1711_v39 }
  0xf4   : > { %1411 = vmatmul.msk.bf16.vlgmr.msrb.gmra.mxu3 %vm202_vm1, %v1672_v26 }
  0xf7   : > { %v606_v14 = vpop.f32.mrf.mxu2  ;;  %v735_v52 = vpop.f32.mrf.mxu3 }
  0xf8   : > { %v655_v53 = vpop.f32.mrf.mxu0  ;;  %v676_v55 = vpop.f32.mrf.mxu1 }
  0xf9   : > { %v663_v56 = vadd.f32 %v655_v53, %v642_v3 }
  0xfb   : > { %v684_v59 = vadd.f32 %v676_v55, %v663_v56 }
  0xfc   : > { %1409 = vmatmul.msk.bf16.vlgmr.msrb.gmra.mxu2 %vm202_vm1, %v1628_v60 }
  0xff   : > { %v714_v1 = vpop.f32.mrf.mxu2  ;;  %v737_v61 = vpop.f32.mrf.mxu3 }
 0x100   : > { %v723_v2 = vadd.f32 %v714_v1, %v683_v51  ;;  %v658_v62 = vpop.f32.mrf.mxu0  ;;  %v679_v63 = vpop.f32.mrf.mxu1 }
 0x101   : > { %v664_v0 = vadd.f32 %v658_v62, %v643_v50 }
 0x102   : > { %v744_v8 = vadd.f32 %v735_v52, %v723_v2 }
 0x103   : > { %v685_v39 = vadd.f32 %v679_v63, %v664_v0  ;;  %1406 = vmatmul.msk.bf16.gmra.mxu0 %vm202_vm1, %v1653_v12  ;;  %1408 = vmatmul.msk.bf16.gmra.mxu1 %vm202_vm1, %v1723_v41 }
 0x104   : > { %1412 = vmatmul.msk.bf16.gmra.mxu3 %vm202_vm1, %v1668_v23  ;;  %v1202_v23 = vsel %vm538_vm4, %v1200_v24, %v1201_v25 }
 0x107   : > { %v716_v26 = vpop.f32.mrf.mxu2  ;;  %v740_v9 = vpop.f32.mrf.mxu3 }
 0x108   : > { %v724_v60 = vadd.f32 %v716_v26, %v684_v59  ;;  %v660_v31 = vpop.f32.mrf.mxu0  ;;  %v681_v21 = vpop.f32.mrf.mxu1 }
 0x10a   : > { %v745_v22 = vadd.f32 %v737_v61, %v724_v60 }
 0x10c   : > { %1410 = vmatmul.msk.bf16.gmra.mxu2 %vm202_vm1, %v1616_v54 }
 0x10f   : > { %v719_v12 = vpop.f32.mrf.mxu2  ;;  %v742_v36 = vpop.f32.mrf.mxu3 }
 0x110   : > { %v725_v17 = vadd.f32 %v719_v12, %v685_v39  ;;  %v756_v41 = vpop.f32.mrf.mxu0  ;;  %v786_v32 = vpop.f32.mrf.mxu1 }
 0x111   : > { %v765_v33 = vadd.f32 %v756_v41, %v744_v8 }
 0x112   : > { %v746_v38 = vadd.f32 %v740_v9, %v725_v17 }
 0x113   : > { %v1848_v44 = vadd.f32 %v786_v32, %v765_v33  ;;  %1413 = vmatmul.msk.bf16.vlgmr.msra.gmra.mxu0 %vm202_vm1, %v1733_v47  ;;  %1415 = vmatmul.msk.bf16.vlgmr.msra.gmra.mxu1 %vm202_vm1, %v1795_v30 }
 0x114   : > { %1419 = vmatmul.msk.bf16.vlgmr.msra.gmra.mxu3 %vm202_vm1, %v1202_v23 }
 0x115   : > { %v798_v54 = vmax.f32 %v1797_v28, %v1848_v44 }
 0x117   : > { %v721_v57 = vpop.f32.mrf.mxu2  ;;  %v828_v4 = vpop.f32.mrf.mxu3 }
 0x118   : > { %v758_v35 = vpop.f32.mrf.mxu0  ;;  %v788_v15 = vpop.f32.mrf.mxu1 }
 0x119   : > { %v766_v18 = vadd.f32 %v758_v35, %v745_v22 }
 0x11b   : > { %v1857_v29 = vadd.f32 %v788_v15, %v766_v18 }
 0x11c   : > { %1417 = vmatmul.msk.bf16.vlgmr.msra.gmra.mxu2 %vm202_vm1, %v1815_v58 }
 0x11d   : > { %v799_v47 = vmax.f32 %v1811_v37, %v1857_v29 }
 0x11f   : > { %v810_v34 = vpop.f32.mrf.mxu2  ;;  %v830_v30 = vpop.f32.mrf.mxu3 }
 0x120   : > { %v829_v10 = vadd.f32 %v828_v4, %v810_v34  ;;  %v761_v42 = vpop.f32.mrf.mxu0  ;;  %v791_v6 = vpop.f32.mrf.mxu1 }
 0x121   : > { %v767_v45 = vadd.f32 %v761_v42, %v746_v38 }
 0x123   : > { %v1863_v46 = vadd.f32 %v791_v6, %v767_v45  ;;  %1414 = vmatmul.msk.bf16.gmra.mxu0 %vm202_vm1, %v1729_v43  ;;  %1416 = vmatmul.msk.bf16.gmra.mxu1 %vm202_vm1, %v1790_v20 }
 0x124   : > { %1420 = vmatmul.msk.bf16.gmra.mxu3 %vm202_vm1, %v1201_v25 }
 0x125   : > { %v800_v58 = vmax.f32 %v1820_v40, %v1863_v46 }
 0x127   : > { %v812_v13 = vpop.f32.mrf.mxu2  ;;  %v833_v48 = vpop.f32.mrf.mxu3 }
 0x128   : > { %v831_v3 = vadd.f32 %v830_v30, %v812_v13  ;;  %v763_v16 = vpop.f32.mrf.mxu0  ;;  %v793_v11 = vpop.f32.mrf.mxu1 }
 0x12c   : > { %1418 = vmatmul.msk.bf16.gmra.mxu2 %vm202_vm1, %v1807_v19 }
 0x12f   : > { %v815_v27 = vpop.f32.mrf.mxu2  ;;  %v835_v7 = vpop.f32.mrf.mxu3 }
 0x130   : > { %v834_v49 = vadd.f32 %v833_v48, %v815_v27  ;;  %v846_v43 = vpop.f32.mrf.mxu0  ;;  %v867_v5 = vpop.f32.mrf.mxu1 }
 0x131   : > { %v855_v50 = vadd.f32 %v846_v43, %v829_v10 }
 0x133   : > { %v876_v20 = vadd.f32 %v867_v5, %v855_v50 }
 0x137   : > { %v817_v51 = vpop.f32.mrf.mxu2  ;;  %v909_v14 = vpop.f32.mrf.mxu3 }
 0x138   : > { %v848_v52 = vpop.f32.mrf.mxu0  ;;  %v869_v53 = vpop.f32.mrf.mxu1 }
 0x139   : > { %v856_v55 = vadd.f32 %v848_v52, %v831_v3 }
 0x13b   : > { %v877_v56 = vadd.f32 %v869_v53, %v856_v55 }
 0x13f   : > { %v888_v59 = vpop.f32.mrf.mxu2  ;;  %v911_v1 = vpop.f32.mrf.mxu3 }
 0x140   : > { %v897_v61 = vadd.f32 %v888_v59, %v876_v20  ;;  %v851_v2 = vpop.f32.mrf.mxu0  ;;  %v872_v62 = vpop.f32.mrf.mxu1 }
 0x141   : > { %v857_v63 = vadd.f32 %v851_v2, %v834_v49 }
 0x142   : > { %v918_v19 = vadd.f32 %v909_v14, %v897_v61 }
 0x143   : > { %v878_v0 = vadd.f32 %v872_v62, %v857_v63 }
 0x147   : > { %v890_v8 = vpop.f32.mrf.mxu2  ;;  %v914_v39 = vpop.f32.mrf.mxu3 }
 0x148   : > { %v898_v26 = vadd.f32 %v890_v8, %v877_v56  ;;  %v853_v9 = vpop.f32.mrf.mxu0  ;;  %v874_v60 = vpop.f32.mrf.mxu1 }
 0x14a   : > { %v919_v31 = vadd.f32 %v911_v1, %v898_v26 }
 0x14f   : > { %v893_v21 = vpop.f32.mrf.mxu2  ;;  %v916_v22 = vpop.f32.mrf.mxu3 }
 0x150   : > { %v899_v24 = vadd.f32 %v893_v21, %v878_v0  ;;  %v951_v25 = vpop.f32.mrf.mxu0  ;;  %v993_v12 = vpop.f32.mrf.mxu1 }
 0x151   : > { %v960_v36 = vadd.f32 %v951_v25, %v918_v19 }
 0x152   : > { %v920_v17 = vadd.f32 %v914_v39, %v899_v24 }
 0x153   : > { %v1002_v41 = vadd.f32 %v993_v12, %v960_v36 }
 0x157   : > { %v895_v32 = vpop.f32.mrf.mxu2  ;;  %v1047_v33 = vpop.f32.mrf.mxu3 }
 0x158   : > { %v953_v23 = vpop.f32.mrf.mxu0  ;;  %v995_v38 = vpop.f32.mrf.mxu1 }
 0x159   : > { %v961_v57 = vadd.f32 %v953_v23, %v919_v31 }
 0x15b   : > { %v1003_v4 = vadd.f32 %v995_v38, %v961_v57 }
 0x15f   : > { %v1023_v35 = vpop.f32.mrf.mxu2  ;;  %v1049_v15 = vpop.f32.mrf.mxu3 }
 0x160   : > { %v1032_v18 = vadd.f32 %v1023_v35, %v1002_v41  ;;  %v956_v34 = vpop.f32.mrf.mxu0  ;;  %v998_v30 = vpop.f32.mrf.mxu1 }
 0x161   : > { %v962_v10 = vadd.f32 %v956_v34, %v920_v17 }
 0x162   : > { %v1035_v42 = vmax.f32 %v798_v54, %v1032_v18 }
 0x163   : > { %v1004_v6 = vadd.f32 %v998_v30, %v962_v10 }
 0x167   : > { %v1025_v45 = vpop.f32.mrf.mxu2  ;;  %v1052_v13 = vpop.f32.mrf.mxu3 }
 0x168   : > { %v1033_v48 = vadd.f32 %v1025_v45, %v1003_v4  ;;  %v958_v3 = vpop.f32.mrf.mxu0  ;;  %v1000_v16 = vpop.f32.mrf.mxu1 }
 0x16a   : > { %v1880_v11 = vmax.f32 %v799_v47, %v1033_v48 }
 0x16f   : > { %v1028_v27 = vpop.f32.mrf.mxu2  ;;  %v1054_v7 = vpop.f32.mrf.mxu3 }
 0x170   : > { %v1034_v49 = vadd.f32 %v1028_v27, %v1004_v6  ;;  %v1065_v43 = vpop.f32.mrf.mxu0  ;;  %v1083_v5 = vpop.f32.mrf.mxu1 }
 0x171   : > { %v1066_v56 = vadd.f32 %v1065_v43, %v1047_v33  ;;  %v1447_v33 = vld [vmem:[%s1901_s2] ss:$0 sm:$0xff] }
 0x172   : > { %v1885_v28 = vmax.f32 %v800_v58, %v1034_v49 }
 0x173   : > { %v1092_v40 = vadd.f32 %v1083_v5, %v1066_v56 }
 0x177   : > { %v1030_v44 = vpop.f32.mrf.mxu2  ;;  %v1125_v54 = vpop.f32.mrf.mxu3 }
 0x178   : > { %v1067_v50 = vpop.f32.mrf.mxu0  ;;  %v1085_v20 = vpop.f32.mrf.mxu1 }
 0x179   : > { %v1068_v58 = vadd.f32 %v1067_v50, %v1049_v15 }
 0x17b   : > { %v1093_v39 = vadd.f32 %v1085_v20, %v1068_v58 }
 0x17f   : > { %v1104_v51 = vpop.f32.mrf.mxu2  ;;  %v1127_v14 = vpop.f32.mrf.mxu3 }
 0x180   : > { %v1070_v52 = vpop.f32.mrf.mxu0  ;;  %v1088_v37 = vpop.f32.mrf.mxu1  ;;  %v1113_v46 = vadd.f32 %v1104_v51, %v1092_v40 }
 0x181   : > { %v1071_v60 = vadd.f32 %v1070_v52, %v1052_v13 }
 0x182   : > { %v1134_v19 = vadd.f32 %v1125_v54, %v1113_v46 }
 0x183   : > { %v1094_v17 = vadd.f32 %v1088_v37, %v1071_v60 }
 0x187   : > { %v1106_v29 = vpop.f32.mrf.mxu2  ;;  %v1130_v47 = vpop.f32.mrf.mxu3 }
 0x188   : > { %v1072_v53 = vpop.f32.mrf.mxu0  ;;  %v1090_v55 = vpop.f32.mrf.mxu1  ;;  %v1114_v9 = vadd.f32 %v1106_v29, %v1093_v39 }
 0x18a   : > { %v1135_v24 = vadd.f32 %v1127_v14, %v1114_v9 }
 0x18f   : > { %v1109_v59 = vpop.f32.mrf.mxu2  ;;  %v1132_v1 = vpop.f32.mrf.mxu3 }
 0x190   : > { %v1146_v61 = vpop.f32.mrf.mxu0  ;;  %v1167_v2 = vpop.f32.mrf.mxu1  ;;  %v1115_v23 = vadd.f32 %v1109_v59, %v1094_v17 }
 0x191   : > { %v1155_v26 = vadd.f32 %v1146_v61, %v1134_v19 }
 0x192   : > { %v1136_v34 = vadd.f32 %v1130_v47, %v1115_v23 }
 0x193   : > { %v1176_v31 = vadd.f32 %v1167_v2, %v1155_v26 }
 0x197   : > { %v1111_v62 = vpop.f32.mrf.mxu2  ;;  %v1218_v63 = vpop.f32.mrf.mxu3 }
 0x198   : > { %v1148_v0 = vpop.f32.mrf.mxu0  ;;  %v1169_v8 = vpop.f32.mrf.mxu1 }
 0x199   : > { %v1156_v41 = vadd.f32 %v1148_v0, %v1135_v24 }
 0x19b   : > { %v1177_v57 = vadd.f32 %v1169_v8, %v1156_v41 }
 0x19f   : > { %v1188_v21 = vpop.f32.mrf.mxu2  ;;  %v1220_v22 = vpop.f32.mrf.mxu3 }
 0x1a0   : > { %v1197_v25 = vadd.f32 %v1188_v21, %v1176_v31  ;;  %v1151_v12 = vpop.f32.mrf.mxu0  ;;  %v1172_v36 = vpop.f32.mrf.mxu1 }
 0x1a1   : > { %v1157_v13 = vadd.f32 %v1151_v12, %v1136_v34 }
 0x1a2   : > { %v1227_v32 = vadd.f32 %v1218_v63, %v1197_v25 }
 0x1a3   : > { %v1178_v3 = vadd.f32 %v1172_v36, %v1157_v13 }
 0x1a4   : > { %v1230_v38 = vmax.f32 %v1035_v42, %v1227_v32 }
 0x1a6   : > { %v1237_v4 = vadd.f32 %v1447_v33, %v1230_v38 }
 0x1a7   : > { %v1190_v35 = vpop.f32.mrf.mxu2  ;;  %v1223_v15 = vpop.f32.mrf.mxu3 }
 0x1a8   : > { %v1240_v18 = vmax.f32 %v1237_v4, 0.0  ;;  %v1198_v30 = vadd.f32 %v1190_v35, %v1177_v57  ;;  %v1153_v10 = vpop.f32.mrf.mxu0  ;;  %v1174_v6 = vpop.f32.mrf.mxu1 }
 0x1aa   : > { %v1243_v45 = vpack.c.bf16 %v1240_v18, %v1240_v18  ;;  %v1228_v48 = vadd.f32 %v1220_v22, %v1198_v30 }
 0x1ac   : > { %1247 = vst.msk [vmem:[%s170_s16] sm:$0xf] %vm1246_vm5, %v1243_v45  ;;  %v1231_v42 = vmax.f32 %v1880_v11, %v1228_v48 }
 0x1ae   : > { %v1238_v16 = vadd.f32 %v1447_v33, %v1231_v42 }
 0x1af   : > { %v1193_v27 = vpop.f32.mrf.mxu2  ;;  %v1225_v7 = vpop.f32.mrf.mxu3 }
 0x1b0   : > { %v1241_v49 = vmax.f32 %v1238_v16, 0.0  ;;  %v1199_v43 = vadd.f32 %v1193_v27, %v1178_v3 }
 0x1b2   : > { %v1244_v5 = vpack.c.bf16 %v1241_v49, %v1241_v49  ;;  %v1229_v44 = vadd.f32 %v1223_v15, %v1199_v43 }
 0x1b4   : > { %1248 = vst.msk [vmem:[%s170_s16 + $0x4] sm:$0xf] %vm1246_vm5, %v1244_v5  ;;  %v1232_v54 = vmax.f32 %v1885_v28, %v1229_v44 }
 0x1b6   : > { %v1239_v50 = vadd.f32 %v1447_v33, %v1232_v54 }
 0x1b7   : > { %v1195_v20 = vpop.f32.mrf.mxu2 }
 0x1b8   : > { %v1242_v51 = vmax.f32 %v1239_v50, 0.0 }
 0x1ba   : > { %v1245_v14 = vpack.c.bf16 %v1242_v51, %v1242_v51 }
 0x1bc   : > { %1250 = vst.msk [vmem:[%s170_s16 + $0x8] sm:$0x3] %vm1249_vm6, %v1245_v14 }
 0x1bd PF: > { %s13_s12 = sadd.s32 1, %s1454_s12  }
 0x1be   : > { %p10_p4 = scmp.ge.s32.totalorder %s13_s12, 6  }
 0x1c0   :  { %12 = sbr.rel (!%p10_p4) target bundleno = 1 (0x1), region = 73 }

</bundles_post_ra>
